<compile_context>
chip_gen: v5e
topology: v5e:2x2
jax: 0.10.0
libtpu: 0.0.40
codegen_flags: <defaults>
</compile_context>

<pallas_src>
import jax
import jax.numpy as jnp
from jax.experimental import pallas as pl
from jax.experimental.pallas import tpu as pltpu

# ----- model hyper-parameters (small, consistent with the module) -----
N_PER_BATCH = 16          # nodes in one graph-batch (2 graphs x 8 nodes)
GRAPHS_PER_BATCH = 2      # graphs per batch (data.batch has 2 values)
N_FEAT = 8                # args.num_features
NHID = 32                 # args.nhid
N_CLASSES = 4             # args.num_classes
BN_EPS = 1e-5

# ----- blocking: stack SUBS_PER_BLOCK independent graph-batches block-diagonally -----
SUBS_PER_BLOCK = 8                                # batches per grid step
M = SUBS_PER_BLOCK * N_PER_BATCH                  # 128 node rows per step
GPAD = SUBS_PER_BLOCK * GRAPHS_PER_BATCH          # 16 graphs per step (multiple of 8)
LANES = 128
NEG = -1e30                                       # masked-max / softmax-pad fill

# packed parameter row offsets (all multiples of 8 -> sublane aligned slices)
_W1_R = 0                        # rows [0,  8)  : folded W1   (N_FEAT, NHID)
_W2_R = _W1_R + N_FEAT           # rows [8, 40)  : folded W2   (NHID,  NHID)
_L1_R = _W2_R + NHID             # rows [40,72)  : lin1 W      (NHID,  NHID//2)
_L2_R = _L1_R + NHID             # rows [72,88)  : lin2 W_a    (NHID//2, NHID//4)
_L3_R = _L2_R + NHID // 2        # rows [88,96)  : lin3 W      (NHID//4, N_CLASSES), lane padded
_B_R = _L3_R + NHID // 4         # rows [96,104) : bias rows
PPACK_ROWS = _B_R + 8            # 104


def gnn_kernel(adj_ref, feat_ref, ppack_ref, out_ref):
    # adj_ref : (M, M)      block-diagonal normalized adjacency (with self loops)
    # feat_ref: (M, 128)    cols [0:8)=x, [8:24)=additive graph-mask bias, col 24=paper_count
    # ppack_ref: (104, 128) packed BN-folded weights + biases
    # out_ref : (GPAD, 128) log-probs in cols [0:N_CLASSES), lane-dense full store
    adj = adj_ref[...]                                         # (M, M)
    x = feat_ref[:, 0:N_FEAT]                                  # (M, F)
    maskb = feat_ref[:, N_FEAT:N_FEAT + GPAD]                  # (M, GPAD) 0 / -1e30
    pc = feat_ref[0:GPAD, N_FEAT + GPAD:N_FEAT + GPAD + 1]     # (GPAD, 1)

    # ---- packed parameters (static, sublane-aligned row slices) ----
    w1 = ppack_ref[_W1_R:_W2_R, 0:NHID]                        # (F, NHID)   BN1-folded
    w2 = ppack_ref[_W2_R:_L1_R, 0:NHID]                        # (NHID,NHID) BN2-folded
    l1w = ppack_ref[_L1_R:_L2_R, 0:NHID // 2]                  # (NHID, NHID//2)
    l2wa = ppack_ref[_L2_R:_L3_R, 0:NHID // 4]                 # (NHID//2, NHID//4)
    l3w = ppack_ref[_L3_R:_B_R, :]                             # (NHID//4, 128) cols>=C are 0
    brows = ppack_ref[_B_R:PPACK_ROWS, :]                      # (8, 128)
    b1 = brows[0:1, 0:NHID]
    b2 = brows[1:2, 0:NHID]
    l1b = brows[2:3, 0:NHID // 2]
    l2wb = brows[3:4, 0:NHID // 4]
    l2b = brows[4:5, 0:NHID // 4]
    l3b = brows[5:6, :]                                        # (1,128): cols>=C are -1e30

    # ---- GCN layer 1: Ahat @ (X @ W1') + b1' -> ReLU  (BN folded) ----
    h = jnp.dot(x, w1, preferred_element_type=jnp.float32)
    h1 = jnp.maximum(jnp.dot(adj, h, preferred_element_type=jnp.float32) + b1, 0.0)

    # ---- GCN layer 2 (last): Ahat @ (h1 @ W2') + b2'  (BN folded, no ReLU) ----
    h = jnp.dot(h1, w2, preferred_element_type=jnp.float32)
    h2 = jnp.dot(adj, h, preferred_element_type=jnp.float32) + b2

    # ---- per-graph masked max pool (additive -1e30 bias), ReLU, sum over layers ----
    reps = []
    for g in range(GPAD):                                      # static unroll
        bg = maskb[:, g:g + 1]                                 # (M, 1)
        p1 = jnp.max(h1 + bg, axis=0, keepdims=True)           # (1, NHID)
        p2 = jnp.max(h2 + bg, axis=0, keepdims=True)           # (1, NHID)
        reps.append(jnp.maximum(p1, 0.0) + jnp.maximum(p2, 0.0))
    rep = jnp.concatenate(reps, axis=0)                        # (GPAD, NHID)

    # ---- MLP head ----
    z = jnp.maximum(jnp.dot(rep, l1w, preferred_element_type=jnp.float32) + l1b, 0.0)
    # lin2 over concat(z, paper_count): z @ W2a + pc @ W2b + b
    z = jnp.maximum(jnp.dot(z, l2wa, preferred_element_type=jnp.float32)
                    + pc * l2wb + l2b, 0.0)
    # lin3 into a full 128-lane row; padded lanes carry -1e30 so they vanish in softmax
    logits = jnp.dot(z, l3w, preferred_element_type=jnp.float32) + l3b   # (GPAD, 128)

    m = jnp.max(logits, axis=-1, keepdims=True)
    lse = jnp.log(jnp.sum(jnp.exp(logits - m), axis=-1, keepdims=True)) + m
    out_ref[...] = logits - lse                                # lane-dense full store


def pack_params(p):
    """Fold eval-mode BatchNorm into the GCN weights/biases and pack everything into
    a single (104, 128) array.  Called ONCE (params are static in eval); the packed
    array is passed to run_model so no per-inference param math remains."""
    s1 = p["g1"] * jax.lax.rsqrt(p["rv1"] + BN_EPS)            # (1, NHID)
    w1f = p["w1"] * s1
    b1f = (p["b1"] - p["rm1"]) * s1 + p["be1"]
    s2 = p["g2"] * jax.lax.rsqrt(p["rv2"] + BN_EPS)
    w2f = p["w2"] * s2
    b2f = (p["b2"] - p["rm2"]) * s2 + p["be2"]

    def row(a, fill=0.0):
        out = jnp.full((a.shape[0], LANES), fill, jnp.float32)
        return out.at[:, :a.shape[1]].set(a)

    wrows = jnp.concatenate(
        [row(w1f), row(w2f), row(p["l1w"]), row(p["l2wa"]), row(p["l3w"])], axis=0)  # (96,128)
    brows = jnp.concatenate(
        [row(b1f), row(b2f), row(p["l1b"]), row(p["l2wb"]), row(p["l2b"]),
         row(p["l3b"], fill=NEG),                       # -1e30 in padded class lanes
         jnp.zeros((2, LANES), jnp.float32)], axis=0)   # (8,128)
    return jnp.concatenate([wrows, brows], axis=0)       # (104,128)


@jax.jit
def run_model(x_all, pc_all, adj, mask, ppack):
    """x_all: (T, 16, 8) node features for T independent graph-batches
       pc_all: (T, 2, 1) paper_count per graph
       adj:   (16, 16)   normalized adjacency (shared topology in this demo)
       mask:  (2, 16)    graph-membership mask per batch
       ppack: (104, 128) packed params from pack_params()
       returns (T, 2, 4) log-probs."""
    T = x_all.shape[0]
    assert T % SUBS_PER_BLOCK == 0
    B = T // SUBS_PER_BLOCK

    # block-diagonal stacking of SUBS_PER_BLOCK batches -> M=128 node rows per step
    eye = jnp.eye(SUBS_PER_BLOCK, dtype=jnp.float32)
    adj_blk = jnp.kron(eye, adj)                               # (M, M)
    mask_blk = jnp.kron(eye, mask.T)                           # (M, GPAD) 1/0 membership
    bias_blk = (mask_blk - 1.0) * (-NEG)                       # 0 where member, -1e30 else

    x_blk = x_all.reshape(B, M, N_FEAT)
    pc_col = jnp.pad(pc_all.reshape(B, GPAD, 1),
                     ((0, 0), (0, M - GPAD), (0, 0)))          # (B, M, 1)
    tail = jnp.zeros((B, M, LANES - N_FEAT - GPAD - 1), jnp.float32)
    feat = jnp.concatenate(
        [x_blk, jnp.broadcast_to(bias_blk[None], (B, M, GPAD)), pc_col, tail],
        axis=-1)                                               # (B, M, 128)
    adj_full = jnp.broadcast_to(adj_blk[None], (B, M, M))      # (B, M, M)

    out = pl.pallas_call(
        gnn_kernel,
        grid=(B,),
        in_specs=[
            pl.BlockSpec((None, M, M), lambda b: (b, 0, 0)),
            pl.BlockSpec((None, M, LANES), lambda b: (b, 0, 0)),
            pl.BlockSpec((PPACK_ROWS, LANES), lambda b: (0, 0)),   # resident params
        ],
        out_specs=pl.BlockSpec((None, GPAD, LANES), lambda b: (b, 0, 0)),
        out_shape=jax.ShapeDtypeStruct((B, GPAD, LANES), jnp.float32),
        compiler_params=pltpu.CompilerParams(
            dimension_semantics=("parallel",)),                # v7x: split blocks across TCs
    )(adj_full, feat, ppack)

    # (B, GPAD, 128) -> (T, G, C): graph column s*2+g of block b is batch b*8+s, graph g
    return out[:, :, :N_CLASSES].reshape(T, GRAPHS_PER_BATCH, N_CLASSES)


def reference_single(x, adj, mask, pc, p):
    h = adj @ (x @ p["w1"]) + p["b1"]
    h = (h - p["rm1"]) * jax.lax.rsqrt(p["rv1"] + BN_EPS) * p["g1"] + p["be1"]
    h1 = jax.nn.relu(h)
    h = adj @ (h1 @ p["w2"]) + p["b2"]
    h2 = (h - p["rm2"]) * jax.lax.rsqrt(p["rv2"] + BN_EPS) * p["g2"] + p["be2"]

    def gmp(hl):
        hm = jnp.where(mask[:, :, None] > 0.5, hl[None, :, :], NEG)
        return jnp.max(hm, axis=1)

    rep = jax.nn.relu(gmp(h1)) + jax.nn.relu(gmp(h2))
    z = jax.nn.relu(rep @ p["l1w"] + p["l1b"])
    z = jax.nn.relu(z @ p["l2wa"] + pc * p["l2wb"] + p["l2b"])
    logits = z @ p["l3w"] + p["l3b"]
    return jax.nn.log_softmax(logits, axis=-1)


if __name__ == "__main__":
    key = jax.random.PRNGKey(0)
    ks = jax.random.split(key, 24)

    N_BLOCKS = 2
    T = N_BLOCKS * SUBS_PER_BLOCK                      # 16 independent graph-batches

    # ---- per-batch node features and paper counts ----
    x_all = jax.random.normal(ks[0], (T, N_PER_BATCH, N_FEAT), jnp.float32)
    paper_count = jax.random.uniform(ks[1], (T, GRAPHS_PER_BATCH, 1), jnp.float32, 1.0, 10.0)

    # ---- batch assignment: two graphs, 8 contiguous nodes each (shared topology) ----
    npg = N_PER_BATCH // GRAPHS_PER_BATCH
    batch_vec = jnp.repeat(jnp.arange(GRAPHS_PER_BATCH), npg)
    mask = (batch_vec[None, :] == jnp.arange(GRAPHS_PER_BATCH)[:, None]).astype(jnp.float32)  # (G, N)

    # ---- edge_index: ring inside each graph -> dense normalized adjacency ----
    src, dst = [], []
    for g in range(GRAPHS_PER_BATCH):
        base = g * npg
        for i in range(npg):
            src.append(base + i)
            dst.append(base + (i + 1) % npg)
    src = jnp.array(src, jnp.int32)
    dst = jnp.array(dst, jnp.int32)
    A = jnp.zeros((N_PER_BATCH, N_PER_BATCH), jnp.float32).at[dst, src].add(1.0)
    A = A + jnp.eye(N_PER_BATCH, dtype=jnp.float32)             # add self loops
    dinv = jax.lax.rsqrt(jnp.sum(A, axis=1))
    adj = dinv[:, None] * A * dinv[None, :]                     # D^-1/2 (A+I) D^-1/2

    # ---- deterministic parameter init ----
    def rnd(k, shape, scale=0.1):
        return scale * jax.random.normal(k, shape, jnp.float32)

    params = {
        # GCNConv 1: num_features -> nhid  (weight stored (in,out); bias (1,out))
        "w1": rnd(ks[2], (N_FEAT, NHID)), "b1": rnd(ks[3], (1, NHID)),
        "g1": 1.0 + rnd(ks[4], (1, NHID)), "be1": rnd(ks[5], (1, NHID)),
        "rm1": rnd(ks[6], (1, NHID)), "rv1": 1.0 + 0.1 * jax.random.uniform(ks[7], (1, NHID)),
        # GCNConv 2: nhid -> nhid
        "w2": rnd(ks[8], (NHID, NHID)), "b2": rnd(ks[9], (1, NHID)),
        "g2": 1.0 + rnd(ks[10], (1, NHID)), "be2": rnd(ks[11], (1, NHID)),
        "rm2": rnd(ks[12], (1, NHID)), "rv2": 1.0 + 0.1 * jax.random.uniform(ks[13], (1, NHID)),
        # lin1: nhid -> nhid//2
        "l1w": rnd(ks[14], (NHID, NHID // 2)), "l1b": rnd(ks[15], (1, NHID // 2)),
        # lin2: (nhid//2 + 1) -> nhid//4, split into [features | paper_count] columns
        "l2wa": rnd(ks[16], (NHID // 2, NHID // 4)), "l2wb": rnd(ks[17], (1, NHID // 4)),
        "l2b": rnd(ks[18], (1, NHID // 4)),
        # lin3: nhid//4 -> num_classes
        "l3w": rnd(ks[19], (NHID // 4, N_CLASSES)), "l3b": rnd(ks[20], (1, N_CLASSES)),
    }

    # BN fold + packing done ONCE, outside the per-inference jitted path
    ppack = jax.block_until_ready(pack_params(params))

    out = run_model(x_all, paper_count, adj, mask, ppack)
    out = jax.block_until_ready(out)

    ref = jax.vmap(lambda xb, pcb: reference_single(xb, adj, mask, pcb, params))(
        x_all, paper_count)

    assert out.shape == (T, GRAPHS_PER_BATCH, N_CLASSES)
    assert jnp.allclose(out, ref, rtol=1e-4, atol=1e-4), (out, ref)

    print("KERNEL_OK")
</pallas_src>

<mosaic_0001>
module attributes {stable_mosaic.version = 11 : i64} {
  func.func @gnn_kernel(%arg0: i32, %arg1: memref<1x128x128xf32, #tpu.memory_space<vmem>>, %arg2: memref<1x128x128xf32, #tpu.memory_space<vmem>>, %arg3: memref<104x128xf32, #tpu.memory_space<vmem>>, %arg4: memref<1x16x128xf32, #tpu.memory_space<vmem>>) attributes {dimension_semantics = [#tpu.dimension_semantics<parallel>], iteration_bounds = array<i64: 2>, scalar_prefetch = 0 : i64, scratch_operands = 0 : i64, tpu.core_type = #tpu.core_type<tc>, window_params = [{transform_indices = @transform_0, window_bounds = array<i64: 1, 128, 128>}, {transform_indices = @transform_1, window_bounds = array<i64: 1, 128, 128>}, {pipeline_mode = #tpu.pipeline_mode<synchronous>, transform_indices = @transform_2, window_bounds = array<i64: 104, 128>}, {transform_indices = @transform_3, window_bounds = array<i64: 1, 16, 128>}]} {
    %c0 = arith.constant 0 : index
    %c0_0 = arith.constant 0 : index
    %c0_1 = arith.constant 0 : index
    %0 = vector.load %arg1[%c0, %c0_0, %c0_1] : memref<1x128x128xf32, #tpu.memory_space<vmem>>, vector<1x128x128xf32>
    %1 = vector.shape_cast %0 : vector<1x128x128xf32> to vector<128x128xf32>
    %c0_2 = arith.constant 0 : index
    %c0_3 = arith.constant 0 : index
    %c0_4 = arith.constant 0 : index
    %2 = vector.load %arg2[%c0_2, %c0_3, %c0_4] : memref<1x128x128xf32, #tpu.memory_space<vmem>>, vector<1x128x8xf32>
    %3 = vector.shape_cast %2 : vector<1x128x8xf32> to vector<128x8xf32>
    %c0_5 = arith.constant 0 : index
    %c0_6 = arith.constant 0 : index
    %c8 = arith.constant 8 : index
    %4 = vector.load %arg2[%c0_5, %c0_6, %c8] : memref<1x128x128xf32, #tpu.memory_space<vmem>>, vector<1x128x16xf32>
    %5 = vector.shape_cast %4 : vector<1x128x16xf32> to vector<128x16xf32>
    %c0_7 = arith.constant 0 : index
    %c0_8 = arith.constant 0 : index
    %c24 = arith.constant 24 : index
    %6 = vector.load %arg2[%c0_7, %c0_8, %c24] : memref<1x128x128xf32, #tpu.memory_space<vmem>>, vector<1x16x1xf32>
    %7 = vector.shape_cast %6 : vector<1x16x1xf32> to vector<16x1xf32>
    %c0_9 = arith.constant 0 : index
    %c0_10 = arith.constant 0 : index
    %8 = vector.load %arg3[%c0_9, %c0_10] : memref<104x128xf32, #tpu.memory_space<vmem>>, vector<8x32xf32>
    %c8_11 = arith.constant 8 : index
    %c0_12 = arith.constant 0 : index
    %9 = vector.load %arg3[%c8_11, %c0_12] : memref<104x128xf32, #tpu.memory_space<vmem>>, vector<32x32xf32>
    %c40 = arith.constant 40 : index
    %c0_13 = arith.constant 0 : index
    %10 = vector.load %arg3[%c40, %c0_13] : memref<104x128xf32, #tpu.memory_space<vmem>>, vector<32x16xf32>
    %c72 = arith.constant 72 : index
    %c0_14 = arith.constant 0 : index
    %11 = vector.load %arg3[%c72, %c0_14] : memref<104x128xf32, #tpu.memory_space<vmem>>, vector<16x8xf32>
    %c88 = arith.constant 88 : index
    %c0_15 = arith.constant 0 : index
    %12 = vector.load %arg3[%c88, %c0_15] : memref<104x128xf32, #tpu.memory_space<vmem>>, vector<8x128xf32>
    %c96 = arith.constant 96 : index
    %c0_16 = arith.constant 0 : index
    %13 = vector.load %arg3[%c96, %c0_16] : memref<104x128xf32, #tpu.memory_space<vmem>>, vector<8x128xf32>
    %14 = vector.extract_strided_slice %13 {offsets = [0, 0], sizes = [1, 32], strides = [1, 1]} : vector<8x128xf32> to vector<1x32xf32>
    %15 = vector.extract_strided_slice %13 {offsets = [1, 0], sizes = [1, 32], strides = [1, 1]} : vector<8x128xf32> to vector<1x32xf32>
    %16 = vector.extract_strided_slice %13 {offsets = [2, 0], sizes = [1, 16], strides = [1, 1]} : vector<8x128xf32> to vector<1x16xf32>
    %17 = vector.extract_strided_slice %13 {offsets = [3, 0], sizes = [1, 8], strides = [1, 1]} : vector<8x128xf32> to vector<1x8xf32>
    %18 = vector.extract_strided_slice %13 {offsets = [4, 0], sizes = [1, 8], strides = [1, 1]} : vector<8x128xf32> to vector<1x8xf32>
    %19 = vector.extract_strided_slice %13 {offsets = [5, 0], sizes = [1, 128], strides = [1, 1]} : vector<8x128xf32> to vector<1x128xf32>
    %cst = arith.constant dense<0.000000e+00> : vector<128x32xf32>
    %20 = tpu.matmul %3, %8, %cst {dimension_numbers = #tpu.dot_dimension_numbers<[1], [0], [0], [1], [0, 0, 1, 1], [], []>} : vector<128x8xf32>, vector<8x32xf32>, vector<128x32xf32> -> vector<128x32xf32>
    %cst_17 = arith.constant dense<0.000000e+00> : vector<128x32xf32>
    %21 = tpu.matmul %1, %20, %cst_17 {dimension_numbers = #tpu.dot_dimension_numbers<[1], [0], [0], [1], [0, 0, 1, 1], [], []>} : vector<128x128xf32>, vector<128x32xf32>, vector<128x32xf32> -> vector<128x32xf32>
    %22 = vector.broadcast %14 : vector<1x32xf32> to vector<128x32xf32>
    %23 = arith.addf %21, %22 : vector<128x32xf32>
    %cst_18 = arith.constant 0.000000e+00 : f32
    %24 = vector.broadcast %cst_18 : f32 to vector<128x32xf32>
    %25 = arith.maximumf %23, %24 : vector<128x32xf32>
    %cst_19 = arith.constant dense<0.000000e+00> : vector<128x32xf32>
    %26 = tpu.matmul %25, %9, %cst_19 {dimension_numbers = #tpu.dot_dimension_numbers<[1], [0], [0], [1], [0, 0, 1, 1], [], []>} : vector<128x32xf32>, vector<32x32xf32>, vector<128x32xf32> -> vector<128x32xf32>
    %cst_20 = arith.constant dense<0.000000e+00> : vector<128x32xf32>
    %27 = tpu.matmul %1, %26, %cst_20 {dimension_numbers = #tpu.dot_dimension_numbers<[1], [0], [0], [1], [0, 0, 1, 1], [], []>} : vector<128x128xf32>, vector<128x32xf32>, vector<128x32xf32> -> vector<128x32xf32>
    %28 = vector.broadcast %15 : vector<1x32xf32> to vector<128x32xf32>
    %29 = arith.addf %27, %28 : vector<128x32xf32>
    %30 = vector.extract_strided_slice %5 {offsets = [0, 0], sizes = [128, 1], strides = [1, 1]} : vector<128x16xf32> to vector<128x1xf32>
    %31 = vector.broadcast %30 : vector<128x1xf32> to vector<128x32xf32>
    %32 = arith.addf %25, %31 : vector<128x32xf32>
    %cst_21 = arith.constant dense<0xFF800000> : vector<32xf32>
    %33 = vector.multi_reduction <maximumf>, %32, %cst_21 [0] : vector<128x32xf32> to vector<32xf32>
    %34 = vector.shape_cast %33 : vector<32xf32> to vector<1x32xf32>
    %35 = vector.broadcast %30 : vector<128x1xf32> to vector<128x32xf32>
    %36 = arith.addf %29, %35 : vector<128x32xf32>
    %cst_22 = arith.constant dense<0xFF800000> : vector<32xf32>
    %37 = vector.multi_reduction <maximumf>, %36, %cst_22 [0] : vector<128x32xf32> to vector<32xf32>
    %38 = vector.shape_cast %37 : vector<32xf32> to vector<1x32xf32>
    %cst_23 = arith.constant 0.000000e+00 : f32
    %39 = vector.broadcast %cst_23 : f32 to vector<1x32xf32>
    %40 = arith.maximumf %34, %39 : vector<1x32xf32>
    %cst_24 = arith.constant 0.000000e+00 : f32
    %41 = vector.broadcast %cst_24 : f32 to vector<1x32xf32>
    %42 = arith.maximumf %38, %41 : vector<1x32xf32>
    %43 = arith.addf %40, %42 : vector<1x32xf32>
    %44 = vector.extract_strided_slice %5 {offsets = [0, 1], sizes = [128, 1], strides = [1, 1]} : vector<128x16xf32> to vector<128x1xf32>
    %45 = vector.broadcast %44 : vector<128x1xf32> to vector<128x32xf32>
    %46 = arith.addf %25, %45 : vector<128x32xf32>
    %cst_25 = arith.constant dense<0xFF800000> : vector<32xf32>
    %47 = vector.multi_reduction <maximumf>, %46, %cst_25 [0] : vector<128x32xf32> to vector<32xf32>
    %48 = vector.shape_cast %47 : vector<32xf32> to vector<1x32xf32>
    %49 = vector.broadcast %44 : vector<128x1xf32> to vector<128x32xf32>
    %50 = arith.addf %29, %49 : vector<128x32xf32>
    %cst_26 = arith.constant dense<0xFF800000> : vector<32xf32>
    %51 = vector.multi_reduction <maximumf>, %50, %cst_26 [0] : vector<128x32xf32> to vector<32xf32>
    %52 = vector.shape_cast %51 : vector<32xf32> to vector<1x32xf32>
    %cst_27 = arith.constant 0.000000e+00 : f32
    %53 = vector.broadcast %cst_27 : f32 to vector<1x32xf32>
    %54 = arith.maximumf %48, %53 : vector<1x32xf32>
    %cst_28 = arith.constant 0.000000e+00 : f32
    %55 = vector.broadcast %cst_28 : f32 to vector<1x32xf32>
    %56 = arith.maximumf %52, %55 : vector<1x32xf32>
    %57 = arith.addf %54, %56 : vector<1x32xf32>
    %58 = vector.extract_strided_slice %5 {offsets = [0, 2], sizes = [128, 1], strides = [1, 1]} : vector<128x16xf32> to vector<128x1xf32>
    %59 = vector.broadcast %58 : vector<128x1xf32> to vector<128x32xf32>
    %60 = arith.addf %25, %59 : vector<128x32xf32>
    %cst_29 = arith.constant dense<0xFF800000> : vector<32xf32>
    %61 = vector.multi_reduction <maximumf>, %60, %cst_29 [0] : vector<128x32xf32> to vector<32xf32>
    %62 = vector.shape_cast %61 : vector<32xf32> to vector<1x32xf32>
    %63 = vector.broadcast %58 : vector<128x1xf32> to vector<128x32xf32>
    %64 = arith.addf %29, %63 : vector<128x32xf32>
    %cst_30 = arith.constant dense<0xFF800000> : vector<32xf32>
    %65 = vector.multi_reduction <maximumf>, %64, %cst_30 [0] : vector<128x32xf32> to vector<32xf32>
    %66 = vector.shape_cast %65 : vector<32xf32> to vector<1x32xf32>
    %cst_31 = arith.constant 0.000000e+00 : f32
    %67 = vector.broadcast %cst_31 : f32 to vector<1x32xf32>
    %68 = arith.maximumf %62, %67 : vector<1x32xf32>
    %cst_32 = arith.constant 0.000000e+00 : f32
    %69 = vector.broadcast %cst_32 : f32 to vector<1x32xf32>
    %70 = arith.maximumf %66, %69 : vector<1x32xf32>
    %71 = arith.addf %68, %70 : vector<1x32xf32>
    %72 = vector.extract_strided_slice %5 {offsets = [0, 3], sizes = [128, 1], strides = [1, 1]} : vector<128x16xf32> to vector<128x1xf32>
    %73 = vector.broadcast %72 : vector<128x1xf32> to vector<128x32xf32>
    %74 = arith.addf %25, %73 : vector<128x32xf32>
    %cst_33 = arith.constant dense<0xFF800000> : vector<32xf32>
    %75 = vector.multi_reduction <maximumf>, %74, %cst_33 [0] : vector<128x32xf32> to vector<32xf32>
    %76 = vector.shape_cast %75 : vector<32xf32> to vector<1x32xf32>
    %77 = vector.broadcast %72 : vector<128x1xf32> to vector<128x32xf32>
    %78 = arith.addf %29, %77 : vector<128x32xf32>
    %cst_34 = arith.constant dense<0xFF800000> : vector<32xf32>
    %79 = vector.multi_reduction <maximumf>, %78, %cst_34 [0] : vector<128x32xf32> to vector<32xf32>
    %80 = vector.shape_cast %79 : vector<32xf32> to vector<1x32xf32>
    %cst_35 = arith.constant 0.000000e+00 : f32
    %81 = vector.broadcast %cst_35 : f32 to vector<1x32xf32>
    %82 = arith.maximumf %76, %81 : vector<1x32xf32>
    %cst_36 = arith.constant 0.000000e+00 : f32
    %83 = vector.broadcast %cst_36 : f32 to vector<1x32xf32>
    %84 = arith.maximumf %80, %83 : vector<1x32xf32>
    %85 = arith.addf %82, %84 : vector<1x32xf32>
    %86 = vector.extract_strided_slice %5 {offsets = [0, 4], sizes = [128, 1], strides = [1, 1]} : vector<128x16xf32> to vector<128x1xf32>
    %87 = vector.broadcast %86 : vector<128x1xf32> to vector<128x32xf32>
    %88 = arith.addf %25, %87 : vector<128x32xf32>
    %cst_37 = arith.constant dense<0xFF800000> : vector<32xf32>
    %89 = vector.multi_reduction <maximumf>, %88, %cst_37 [0] : vector<128x32xf32> to vector<32xf32>
    %90 = vector.shape_cast %89 : vector<32xf32> to vector<1x32xf32>
    %91 = vector.broadcast %86 : vector<128x1xf32> to vector<128x32xf32>
    %92 = arith.addf %29, %91 : vector<128x32xf32>
    %cst_38 = arith.constant dense<0xFF800000> : vector<32xf32>
    %93 = vector.multi_reduction <maximumf>, %92, %cst_38 [0] : vector<128x32xf32> to vector<32xf32>
    %94 = vector.shape_cast %93 : vector<32xf32> to vector<1x32xf32>
    %cst_39 = arith.constant 0.000000e+00 : f32
    %95 = vector.broadcast %cst_39 : f32 to vector<1x32xf32>
    %96 = arith.maximumf %90, %95 : vector<1x32xf32>
    %cst_40 = arith.constant 0.000000e+00 : f32
    %97 = vector.broadcast %cst_40 : f32 to vector<1x32xf32>
    %98 = arith.maximumf %94, %97 : vector<1x32xf32>
    %99 = arith.addf %96, %98 : vector<1x32xf32>
    %100 = vector.extract_strided_slice %5 {offsets = [0, 5], sizes = [128, 1], strides = [1, 1]} : vector<128x16xf32> to vector<128x1xf32>
    %101 = vector.broadcast %100 : vector<128x1xf32> to vector<128x32xf32>
    %102 = arith.addf %25, %101 : vector<128x32xf32>
    %cst_41 = arith.constant dense<0xFF800000> : vector<32xf32>
    %103 = vector.multi_reduction <maximumf>, %102, %cst_41 [0] : vector<128x32xf32> to vector<32xf32>
    %104 = vector.shape_cast %103 : vector<32xf32> to vector<1x32xf32>
    %105 = vector.broadcast %100 : vector<128x1xf32> to vector<128x32xf32>
    %106 = arith.addf %29, %105 : vector<128x32xf32>
    %cst_42 = arith.constant dense<0xFF800000> : vector<32xf32>
    %107 = vector.multi_reduction <maximumf>, %106, %cst_42 [0] : vector<128x32xf32> to vector<32xf32>
    %108 = vector.shape_cast %107 : vector<32xf32> to vector<1x32xf32>
    %cst_43 = arith.constant 0.000000e+00 : f32
    %109 = vector.broadcast %cst_43 : f32 to vector<1x32xf32>
    %110 = arith.maximumf %104, %109 : vector<1x32xf32>
    %cst_44 = arith.constant 0.000000e+00 : f32
    %111 = vector.broadcast %cst_44 : f32 to vector<1x32xf32>
    %112 = arith.maximumf %108, %111 : vector<1x32xf32>
    %113 = arith.addf %110, %112 : vector<1x32xf32>
    %114 = vector.extract_strided_slice %5 {offsets = [0, 6], sizes = [128, 1], strides = [1, 1]} : vector<128x16xf32> to vector<128x1xf32>
    %115 = vector.broadcast %114 : vector<128x1xf32> to vector<128x32xf32>
    %116 = arith.addf %25, %115 : vector<128x32xf32>
    %cst_45 = arith.constant dense<0xFF800000> : vector<32xf32>
    %117 = vector.multi_reduction <maximumf>, %116, %cst_45 [0] : vector<128x32xf32> to vector<32xf32>
    %118 = vector.shape_cast %117 : vector<32xf32> to vector<1x32xf32>
    %119 = vector.broadcast %114 : vector<128x1xf32> to vector<128x32xf32>
    %120 = arith.addf %29, %119 : vector<128x32xf32>
    %cst_46 = arith.constant dense<0xFF800000> : vector<32xf32>
    %121 = vector.multi_reduction <maximumf>, %120, %cst_46 [0] : vector<128x32xf32> to vector<32xf32>
    %122 = vector.shape_cast %121 : vector<32xf32> to vector<1x32xf32>
    %cst_47 = arith.constant 0.000000e+00 : f32
    %123 = vector.broadcast %cst_47 : f32 to vector<1x32xf32>
    %124 = arith.maximumf %118, %123 : vector<1x32xf32>
    %cst_48 = arith.constant 0.000000e+00 : f32
    %125 = vector.broadcast %cst_48 : f32 to vector<1x32xf32>
    %126 = arith.maximumf %122, %125 : vector<1x32xf32>
    %127 = arith.addf %124, %126 : vector<1x32xf32>
    %128 = vector.extract_strided_slice %5 {offsets = [0, 7], sizes = [128, 1], strides = [1, 1]} : vector<128x16xf32> to vector<128x1xf32>
    %129 = vector.broadcast %128 : vector<128x1xf32> to vector<128x32xf32>
    %130 = arith.addf %25, %129 : vector<128x32xf32>
    %cst_49 = arith.constant dense<0xFF800000> : vector<32xf32>
    %131 = vector.multi_reduction <maximumf>, %130, %cst_49 [0] : vector<128x32xf32> to vector<32xf32>
    %132 = vector.shape_cast %131 : vector<32xf32> to vector<1x32xf32>
    %133 = vector.broadcast %128 : vector<128x1xf32> to vector<128x32xf32>
    %134 = arith.addf %29, %133 : vector<128x32xf32>
    %cst_50 = arith.constant dense<0xFF800000> : vector<32xf32>
    %135 = vector.multi_reduction <maximumf>, %134, %cst_50 [0] : vector<128x32xf32> to vector<32xf32>
    %136 = vector.shape_cast %135 : vector<32xf32> to vector<1x32xf32>
    %cst_51 = arith.constant 0.000000e+00 : f32
    %137 = vector.broadcast %cst_51 : f32 to vector<1x32xf32>
    %138 = arith.maximumf %132, %137 : vector<1x32xf32>
    %cst_52 = arith.constant 0.000000e+00 : f32
    %139 = vector.broadcast %cst_52 : f32 to vector<1x32xf32>
    %140 = arith.maximumf %136, %139 : vector<1x32xf32>
    %141 = arith.addf %138, %140 : vector<1x32xf32>
    %142 = vector.extract_strided_slice %5 {offsets = [0, 8], sizes = [128, 1], strides = [1, 1]} : vector<128x16xf32> to vector<128x1xf32>
    %143 = vector.broadcast %142 : vector<128x1xf32> to vector<128x32xf32>
    %144 = arith.addf %25, %143 : vector<128x32xf32>
    %cst_53 = arith.constant dense<0xFF800000> : vector<32xf32>
    %145 = vector.multi_reduction <maximumf>, %144, %cst_53 [0] : vector<128x32xf32> to vector<32xf32>
    %146 = vector.shape_cast %145 : vector<32xf32> to vector<1x32xf32>
    %147 = vector.broadcast %142 : vector<128x1xf32> to vector<128x32xf32>
    %148 = arith.addf %29, %147 : vector<128x32xf32>
    %cst_54 = arith.constant dense<0xFF800000> : vector<32xf32>
    %149 = vector.multi_reduction <maximumf>, %148, %cst_54 [0] : vector<128x32xf32> to vector<32xf32>
    %150 = vector.shape_cast %149 : vector<32xf32> to vector<1x32xf32>
    %cst_55 = arith.constant 0.000000e+00 : f32
    %151 = vector.broadcast %cst_55 : f32 to vector<1x32xf32>
    %152 = arith.maximumf %146, %151 : vector<1x32xf32>
    %cst_56 = arith.constant 0.000000e+00 : f32
    %153 = vector.broadcast %cst_56 : f32 to vector<1x32xf32>
    %154 = arith.maximumf %150, %153 : vector<1x32xf32>
    %155 = arith.addf %152, %154 : vector<1x32xf32>
    %156 = vector.extract_strided_slice %5 {offsets = [0, 9], sizes = [128, 1], strides = [1, 1]} : vector<128x16xf32> to vector<128x1xf32>
    %157 = vector.broadcast %156 : vector<128x1xf32> to vector<128x32xf32>
    %158 = arith.addf %25, %157 : vector<128x32xf32>
    %cst_57 = arith.constant dense<0xFF800000> : vector<32xf32>
    %159 = vector.multi_reduction <maximumf>, %158, %cst_57 [0] : vector<128x32xf32> to vector<32xf32>
    %160 = vector.shape_cast %159 : vector<32xf32> to vector<1x32xf32>
    %161 = vector.broadcast %156 : vector<128x1xf32> to vector<128x32xf32>
    %162 = arith.addf %29, %161 : vector<128x32xf32>
    %cst_58 = arith.constant dense<0xFF800000> : vector<32xf32>
    %163 = vector.multi_reduction <maximumf>, %162, %cst_58 [0] : vector<128x32xf32> to vector<32xf32>
    %164 = vector.shape_cast %163 : vector<32xf32> to vector<1x32xf32>
    %cst_59 = arith.constant 0.000000e+00 : f32
    %165 = vector.broadcast %cst_59 : f32 to vector<1x32xf32>
    %166 = arith.maximumf %160, %165 : vector<1x32xf32>
    %cst_60 = arith.constant 0.000000e+00 : f32
    %167 = vector.broadcast %cst_60 : f32 to vector<1x32xf32>
    %168 = arith.maximumf %164, %167 : vector<1x32xf32>
    %169 = arith.addf %166, %168 : vector<1x32xf32>
    %170 = vector.extract_strided_slice %5 {offsets = [0, 10], sizes = [128, 1], strides = [1, 1]} : vector<128x16xf32> to vector<128x1xf32>
    %171 = vector.broadcast %170 : vector<128x1xf32> to vector<128x32xf32>
    %172 = arith.addf %25, %171 : vector<128x32xf32>
    %cst_61 = arith.constant dense<0xFF800000> : vector<32xf32>
    %173 = vector.multi_reduction <maximumf>, %172, %cst_61 [0] : vector<128x32xf32> to vector<32xf32>
    %174 = vector.shape_cast %173 : vector<32xf32> to vector<1x32xf32>
    %175 = vector.broadcast %170 : vector<128x1xf32> to vector<128x32xf32>
    %176 = arith.addf %29, %175 : vector<128x32xf32>
    %cst_62 = arith.constant dense<0xFF800000> : vector<32xf32>
    %177 = vector.multi_reduction <maximumf>, %176, %cst_62 [0] : vector<128x32xf32> to vector<32xf32>
    %178 = vector.shape_cast %177 : vector<32xf32> to vector<1x32xf32>
    %cst_63 = arith.constant 0.000000e+00 : f32
    %179 = vector.broadcast %cst_63 : f32 to vector<1x32xf32>
    %180 = arith.maximumf %174, %179 : vector<1x32xf32>
    %cst_64 = arith.constant 0.000000e+00 : f32
    %181 = vector.broadcast %cst_64 : f32 to vector<1x32xf32>
    %182 = arith.maximumf %178, %181 : vector<1x32xf32>
    %183 = arith.addf %180, %182 : vector<1x32xf32>
    %184 = vector.extract_strided_slice %5 {offsets = [0, 11], sizes = [128, 1], strides = [1, 1]} : vector<128x16xf32> to vector<128x1xf32>
    %185 = vector.broadcast %184 : vector<128x1xf32> to vector<128x32xf32>
    %186 = arith.addf %25, %185 : vector<128x32xf32>
    %cst_65 = arith.constant dense<0xFF800000> : vector<32xf32>
    %187 = vector.multi_reduction <maximumf>, %186, %cst_65 [0] : vector<128x32xf32> to vector<32xf32>
    %188 = vector.shape_cast %187 : vector<32xf32> to vector<1x32xf32>
    %189 = vector.broadcast %184 : vector<128x1xf32> to vector<128x32xf32>
    %190 = arith.addf %29, %189 : vector<128x32xf32>
    %cst_66 = arith.constant dense<0xFF800000> : vector<32xf32>
    %191 = vector.multi_reduction <maximumf>, %190, %cst_66 [0] : vector<128x32xf32> to vector<32xf32>
    %192 = vector.shape_cast %191 : vector<32xf32> to vector<1x32xf32>
    %cst_67 = arith.constant 0.000000e+00 : f32
    %193 = vector.broadcast %cst_67 : f32 to vector<1x32xf32>
    %194 = arith.maximumf %188, %193 : vector<1x32xf32>
    %cst_68 = arith.constant 0.000000e+00 : f32
    %195 = vector.broadcast %cst_68 : f32 to vector<1x32xf32>
    %196 = arith.maximumf %192, %195 : vector<1x32xf32>
    %197 = arith.addf %194, %196 : vector<1x32xf32>
    %198 = vector.extract_strided_slice %5 {offsets = [0, 12], sizes = [128, 1], strides = [1, 1]} : vector<128x16xf32> to vector<128x1xf32>
    %199 = vector.broadcast %198 : vector<128x1xf32> to vector<128x32xf32>
    %200 = arith.addf %25, %199 : vector<128x32xf32>
    %cst_69 = arith.constant dense<0xFF800000> : vector<32xf32>
    %201 = vector.multi_reduction <maximumf>, %200, %cst_69 [0] : vector<128x32xf32> to vector<32xf32>
    %202 = vector.shape_cast %201 : vector<32xf32> to vector<1x32xf32>
    %203 = vector.broadcast %198 : vector<128x1xf32> to vector<128x32xf32>
    %204 = arith.addf %29, %203 : vector<128x32xf32>
    %cst_70 = arith.constant dense<0xFF800000> : vector<32xf32>
    %205 = vector.multi_reduction <maximumf>, %204, %cst_70 [0] : vector<128x32xf32> to vector<32xf32>
    %206 = vector.shape_cast %205 : vector<32xf32> to vector<1x32xf32>
    %cst_71 = arith.constant 0.000000e+00 : f32
    %207 = vector.broadcast %cst_71 : f32 to vector<1x32xf32>
    %208 = arith.maximumf %202, %207 : vector<1x32xf32>
    %cst_72 = arith.constant 0.000000e+00 : f32
    %209 = vector.broadcast %cst_72 : f32 to vector<1x32xf32>
    %210 = arith.maximumf %206, %209 : vector<1x32xf32>
    %211 = arith.addf %208, %210 : vector<1x32xf32>
    %212 = vector.extract_strided_slice %5 {offsets = [0, 13], sizes = [128, 1], strides = [1, 1]} : vector<128x16xf32> to vector<128x1xf32>
    %213 = vector.broadcast %212 : vector<128x1xf32> to vector<128x32xf32>
    %214 = arith.addf %25, %213 : vector<128x32xf32>
    %cst_73 = arith.constant dense<0xFF800000> : vector<32xf32>
    %215 = vector.multi_reduction <maximumf>, %214, %cst_73 [0] : vector<128x32xf32> to vector<32xf32>
    %216 = vector.shape_cast %215 : vector<32xf32> to vector<1x32xf32>
    %217 = vector.broadcast %212 : vector<128x1xf32> to vector<128x32xf32>
    %218 = arith.addf %29, %217 : vector<128x32xf32>
    %cst_74 = arith.constant dense<0xFF800000> : vector<32xf32>
    %219 = vector.multi_reduction <maximumf>, %218, %cst_74 [0] : vector<128x32xf32> to vector<32xf32>
    %220 = vector.shape_cast %219 : vector<32xf32> to vector<1x32xf32>
    %cst_75 = arith.constant 0.000000e+00 : f32
    %221 = vector.broadcast %cst_75 : f32 to vector<1x32xf32>
    %222 = arith.maximumf %216, %221 : vector<1x32xf32>
    %cst_76 = arith.constant 0.000000e+00 : f32
    %223 = vector.broadcast %cst_76 : f32 to vector<1x32xf32>
    %224 = arith.maximumf %220, %223 : vector<1x32xf32>
    %225 = arith.addf %222, %224 : vector<1x32xf32>
    %226 = vector.extract_strided_slice %5 {offsets = [0, 14], sizes = [128, 1], strides = [1, 1]} : vector<128x16xf32> to vector<128x1xf32>
    %227 = vector.broadcast %226 : vector<128x1xf32> to vector<128x32xf32>
    %228 = arith.addf %25, %227 : vector<128x32xf32>
    %cst_77 = arith.constant dense<0xFF800000> : vector<32xf32>
    %229 = vector.multi_reduction <maximumf>, %228, %cst_77 [0] : vector<128x32xf32> to vector<32xf32>
    %230 = vector.shape_cast %229 : vector<32xf32> to vector<1x32xf32>
    %231 = vector.broadcast %226 : vector<128x1xf32> to vector<128x32xf32>
    %232 = arith.addf %29, %231 : vector<128x32xf32>
    %cst_78 = arith.constant dense<0xFF800000> : vector<32xf32>
    %233 = vector.multi_reduction <maximumf>, %232, %cst_78 [0] : vector<128x32xf32> to vector<32xf32>
    %234 = vector.shape_cast %233 : vector<32xf32> to vector<1x32xf32>
    %cst_79 = arith.constant 0.000000e+00 : f32
    %235 = vector.broadcast %cst_79 : f32 to vector<1x32xf32>
    %236 = arith.maximumf %230, %235 : vector<1x32xf32>
    %cst_80 = arith.constant 0.000000e+00 : f32
    %237 = vector.broadcast %cst_80 : f32 to vector<1x32xf32>
    %238 = arith.maximumf %234, %237 : vector<1x32xf32>
    %239 = arith.addf %236, %238 : vector<1x32xf32>
    %240 = vector.extract_strided_slice %5 {offsets = [0, 15], sizes = [128, 1], strides = [1, 1]} : vector<128x16xf32> to vector<128x1xf32>
    %241 = vector.broadcast %240 : vector<128x1xf32> to vector<128x32xf32>
    %242 = arith.addf %25, %241 : vector<128x32xf32>
    %cst_81 = arith.constant dense<0xFF800000> : vector<32xf32>
    %243 = vector.multi_reduction <maximumf>, %242, %cst_81 [0] : vector<128x32xf32> to vector<32xf32>
    %244 = vector.shape_cast %243 : vector<32xf32> to vector<1x32xf32>
    %245 = vector.broadcast %240 : vector<128x1xf32> to vector<128x32xf32>
    %246 = arith.addf %29, %245 : vector<128x32xf32>
    %cst_82 = arith.constant dense<0xFF800000> : vector<32xf32>
    %247 = vector.multi_reduction <maximumf>, %246, %cst_82 [0] : vector<128x32xf32> to vector<32xf32>
    %248 = vector.shape_cast %247 : vector<32xf32> to vector<1x32xf32>
    %cst_83 = arith.constant 0.000000e+00 : f32
    %249 = vector.broadcast %cst_83 : f32 to vector<1x32xf32>
    %250 = arith.maximumf %244, %249 : vector<1x32xf32>
    %cst_84 = arith.constant 0.000000e+00 : f32
    %251 = vector.broadcast %cst_84 : f32 to vector<1x32xf32>
    %252 = arith.maximumf %248, %251 : vector<1x32xf32>
    %253 = arith.addf %250, %252 : vector<1x32xf32>
    %254 = tpu.concatenate %43, %57, %71, %85, %99, %113, %127, %141, %155, %169, %183, %197, %211, %225, %239, %253 in 0 : vector<1x32xf32>, vector<1x32xf32>, vector<1x32xf32>, vector<1x32xf32>, vector<1x32xf32>, vector<1x32xf32>, vector<1x32xf32>, vector<1x32xf32>, vector<1x32xf32>, vector<1x32xf32>, vector<1x32xf32>, vector<1x32xf32>, vector<1x32xf32>, vector<1x32xf32>, vector<1x32xf32>, vector<1x32xf32> -> vector<16x32xf32>
    %cst_85 = arith.constant dense<0.000000e+00> : vector<16x16xf32>
    %255 = tpu.matmul %254, %10, %cst_85 {dimension_numbers = #tpu.dot_dimension_numbers<[1], [0], [0], [1], [0, 0, 1, 1], [], []>} : vector<16x32xf32>, vector<32x16xf32>, vector<16x16xf32> -> vector<16x16xf32>
    %256 = vector.broadcast %16 : vector<1x16xf32> to vector<16x16xf32>
    %257 = arith.addf %255, %256 : vector<16x16xf32>
    %cst_86 = arith.constant 0.000000e+00 : f32
    %258 = vector.broadcast %cst_86 : f32 to vector<16x16xf32>
    %259 = arith.maximumf %257, %258 : vector<16x16xf32>
    %cst_87 = arith.constant dense<0.000000e+00> : vector<16x8xf32>
    %260 = tpu.matmul %259, %11, %cst_87 {dimension_numbers = #tpu.dot_dimension_numbers<[1], [0], [0], [1], [0, 0, 1, 1], [], []>} : vector<16x16xf32>, vector<16x8xf32>, vector<16x8xf32> -> vector<16x8xf32>
    %261 = vector.broadcast %7 : vector<16x1xf32> to vector<16x8xf32>
    %262 = vector.broadcast %17 : vector<1x8xf32> to vector<16x8xf32>
    %263 = arith.mulf %261, %262 : vector<16x8xf32>
    %264 = arith.addf %260, %263 : vector<16x8xf32>
    %265 = vector.broadcast %18 : vector<1x8xf32> to vector<16x8xf32>
    %266 = arith.addf %264, %265 : vector<16x8xf32>
    %cst_88 = arith.constant 0.000000e+00 : f32
    %267 = vector.broadcast %cst_88 : f32 to vector<16x8xf32>
    %268 = arith.maximumf %266, %267 : vector<16x8xf32>
    %cst_89 = arith.constant dense<0.000000e+00> : vector<16x128xf32>
    %269 = tpu.matmul %268, %12, %cst_89 {dimension_numbers = #tpu.dot_dimension_numbers<[1], [0], [0], [1], [0, 0, 1, 1], [], []>} : vector<16x8xf32>, vector<8x128xf32>, vector<16x128xf32> -> vector<16x128xf32>
    %270 = vector.broadcast %19 : vector<1x128xf32> to vector<16x128xf32>
    %271 = arith.addf %269, %270 : vector<16x128xf32>
    %cst_90 = arith.constant dense<0xFF800000> : vector<16xf32>
    %272 = vector.multi_reduction <maximumf>, %271, %cst_90 [1] : vector<16x128xf32> to vector<16xf32>
    %273 = vector.shape_cast %272 : vector<16xf32> to vector<16x1xf32>
    %274 = vector.broadcast %273 : vector<16x1xf32> to vector<16x128xf32>
    %275 = arith.subf %271, %274 : vector<16x128xf32>
    %276 = math.exp %275 : vector<16x128xf32>
    %cst_91 = arith.constant dense<0.000000e+00> : vector<16xf32>
    %277 = vector.multi_reduction <add>, %276, %cst_91 [1] : vector<16x128xf32> to vector<16xf32>
    %278 = vector.shape_cast %277 : vector<16xf32> to vector<16x1xf32>
    %279 = math.log %278 : vector<16x1xf32>
    %280 = arith.addf %279, %273 : vector<16x1xf32>
    %281 = vector.broadcast %280 : vector<16x1xf32> to vector<16x128xf32>
    %282 = arith.subf %271, %281 : vector<16x128xf32>
    %c0_92 = arith.constant 0 : index
    %c0_93 = arith.constant 0 : index
    %c0_94 = arith.constant 0 : index
    %283 = vector.load %arg4[%c0_92, %c0_93, %c0_94] : memref<1x16x128xf32, #tpu.memory_space<vmem>>, vector<1x16x128xf32>
    %284 = vector.shape_cast %283 : vector<1x16x128xf32> to vector<16x128xf32>
    %285 = vector.shape_cast %282 : vector<16x128xf32> to vector<1x16x128xf32>
    tpu.vector_store %arg4[%c0_92, %c0_93, %c0_94], %285 {strides = array<i32>} : memref<1x16x128xf32, #tpu.memory_space<vmem>>, vector<1x16x128xf32>,
    return
  }
  func.func @transform_0(%arg0: i32) -> (i32, i32, i32) {
    %c0_i32 = arith.constant 0 : i32
    %c0_i32_0 = arith.constant 0 : i32
    %c0_i32_1 = arith.constant 0 : i32
    return %arg0, %c0_i32, %c0_i32_0 : i32, i32, i32
  }
  func.func @transform_1(%arg0: i32) -> (i32, i32, i32) {
    %c0_i32 = arith.constant 0 : i32
    %c0_i32_0 = arith.constant 0 : i32
    %c0_i32_1 = arith.constant 0 : i32
    return %arg0, %c0_i32, %c0_i32_0 : i32, i32, i32
  }
  func.func @transform_2(%arg0: i32) -> (i32, i32) {
    %c0_i32 = arith.constant 0 : i32
    %c0_i32_0 = arith.constant 0 : i32
    %c0_i32_1 = arith.constant 0 : i32
    return %c0_i32, %c0_i32_0 : i32, i32
  }
  func.func @transform_3(%arg0: i32) -> (i32, i32, i32) {
    %c0_i32 = arith.constant 0 : i32
    %c0_i32_0 = arith.constant 0 : i32
    %c0_i32_1 = arith.constant 0 : i32
    return %arg0, %c0_i32, %c0_i32_0 : i32, i32, i32
  }
}

</mosaic_0001>

<bundles_post_ra>
// kernel: run_model.1
= control target key start
LH: loop header
LB: loop body
LE: loop exit
PB: predicated region body
PF: predicated region fallthrough
CT: control target
= control target key end

     0   :  { %s3855_s12 = smov 0   ;;  %s7830_s0 = inlined_call_operand.vmem [shape: f32[2,128,128], index: 0, kind: input, shape index: {}]   ;;  %s7831_s1 = inlined_call_operand.vmem [shape: f32[2,128,128], index: 1, kind: input, shape index: {}]   ;;  %s7832_s2 = inlined_call_operand.vmem [shape: f32[104,128], index: 2, kind: input, shape index: {}]   ;;  %s7833_s3 = inlined_call_operand.vmem [shape: f32[2,16,128], index: 3, kind: output, shape index: {}]  }
   0x1 LB: > { %s3604_s13 = sadd.s32 4294967295, %s3816_s12   ;;  %p3608_p0 = scmp.ge.s32.totalorder %s3816_s12, 1  ;;  %s3816_s12 = sphi %s3855_s12, %s13_s12  }
   0x2   : > { %p147_p1 = scmp.lt.s32.totalorder %s3816_s12, 3 }
   0x4   : > { %p148_p2 = pnand %p3608_p0, %p147_p1 }
   0x6   : > { %151 = sbr.rel (%p148_p2) target bundleno = 1803 (0x70b), region = 32 }
   0xb   : > { %v225_v0 = vld [vmem:[%s7832_s2] sm:$0xff]  ;;  %p176_p3 = scmp.lt.s32.totalorder %s3604_s13, 1  ;;  %v3818_v1 = vmov 8   ;;  %vm238_vm0 = vcmask 64512   ;;  %v3819_v18 = vmov 9   ;;  %v3820_v19 = vmov 10  }
   0xc   : > { %3689 = vset.pattern.permute.xlu2 %v3818_v1  ;;  %3688 = vset.pattern.permute.xlu1 %v3818_v1  ;;  %v3821_v27 = vmov 11   ;;  %v3822_v45 = vmov 12   ;;  %v3823_v62 = vmov 13   ;;  %vm434_vm1 = vcmask 261120  }
   0xd   : > { %3687 = vset.pattern.permute.xlu0 %v3818_v1  ;;  %302 = vmatpush.msra.mxu0 %v225_v0  ;;  %s9306_s13 = smov (!%p176_p3, %s3604_s13), 1  ;;  %vm3382_vm2 = vcmask 1040384   ;;  %vm3384_vm3 = vcmask 1041408   ;;  %vm3386_vm4 = vcmask 1042432   ;;  %vm3388_vm5 = vcmask 1043456  }
   0xe   : > { %s3655_s16 = sshll.u32 %s9306_s13, 7  ;;  %vm3390_vm6 = vcmask 1044480   ;;  %vm3392_vm7 = vcmask 1045504   ;;  %vm3394_vm8 = vcmask 1046528   ;;  %vm3448_vm9 = vcmask 130048  }
   0xf   : > { %s3874_s19 = scalar_lea.vmem %s7831_s1, %s3655_s16  ;;  %s4199_s22 = scalar_lea.vmem %s7830_s0, %s3655_s16 }
  0x10   : > { %v3877_v2 = vld [vmem:[%s3874_s19 + $0x20] sm:$0xff]  ;;  %v3880_v3 = vld [vmem:[%s3874_s19 + $0x10] sm:$0xff]  ;;  %v3891_v5 = vld [vmem:[%s3874_s19 + $0x28] sm:$0xff] }
  0x11   : > { %v3883_v4 = vld [vmem:[%s3874_s19] sm:$0xff]  ;;  %631 = vperm.xlu2 %3689, %v3877_v2   ;;  %623 = vperm.xlu1 %3688, %v3880_v3   ;;  %v3894_v6 = vld [vmem:[%s3874_s19 + $0x18] sm:$0xff]  ;;  %v3897_v7 = vld [vmem:[%s3874_s19 + $0x8] sm:$0xff] }
  0x12   : > { %615 = vperm.xlu0 %3687, %v3883_v4   ;;  %3615 = vmatmul.msk.f32.vlgmr.msra.gmra.mxu0 %vm238_vm0, %v3883_v4  ;;  %v3905_v8 = vld [vmem:[%s3874_s19 + $0x40] sm:$0xff]  ;;  %v3908_v9 = vld [vmem:[%s3874_s19 + $0x38] sm:$0xff]  ;;  %v3911_v10 = vld [vmem:[%s3874_s19 + $0x30] sm:$0xff] }
  0x13   : > { %v3919_v11 = vld [vmem:[%s3874_s19 + $0x58] sm:$0xff]  ;;  %v3922_v12 = vld [vmem:[%s3874_s19 + $0x50] sm:$0xff]  ;;  %v3925_v13 = vld [vmem:[%s3874_s19 + $0x48] sm:$0xff] }
  0x14   : > { %v3933_v14 = vld [vmem:[%s3874_s19 + $0x70] sm:$0xff]  ;;  %v3936_v15 = vld [vmem:[%s3874_s19 + $0x68] sm:$0xff]  ;;  %v3939_v16 = vld [vmem:[%s3874_s19 + $0x60] sm:$0xff] }
  0x15   : > { %v3947_v17 = vld [vmem:[%s3874_s19 + $0x78] sm:$0xff] }
  0x19   : > { %635 = vperm.xlu2 %3689, %v3891_v5   ;;  %627 = vperm.xlu1 %3688, %v3894_v6  }
  0x1a   : > { %619 = vperm.xlu0 %3687, %v3897_v7   ;;  %3616 = vmatmul.msk.f32.gmra.mxu0 %vm238_vm0, %v3897_v7 }
  0x21   : > { %647 = vperm.xlu2 %3689, %v3905_v8   ;;  %643 = vperm.xlu1 %3688, %v3908_v9  }
  0x22   : > { %639 = vperm.xlu0 %3687, %v3911_v10   ;;  %3617 = vmatmul.msk.f32.gmra.mxu0 %vm238_vm0, %v3880_v3 }
  0x29   : > { %659 = vperm.xlu2 %3689, %v3919_v11   ;;  %655 = vperm.xlu1 %3688, %v3922_v12  }
  0x2a   : > { %651 = vperm.xlu0 %3687, %v3925_v13   ;;  %3618 = vmatmul.msk.f32.gmra.mxu0 %vm238_vm0, %v3894_v6 }
  0x31   : > { %671 = vperm.xlu2 %3689, %v3933_v14   ;;  %667 = vperm.xlu1 %3688, %v3936_v15  }
  0x32   : > { %663 = vperm.xlu0 %3687, %v3939_v16   ;;  %3619 = vmatmul.msk.f32.gmra.mxu0 %vm238_vm0, %v3877_v2 }
  0x39   : > { %3691 = vset.pattern.permute.xlu2 %v3819_v18  ;;  %3690 = vset.pattern.permute.xlu1 %v3819_v18 }
  0x3a   : > { %675 = vperm.xlu0 %3687, %v3947_v17   ;;  %3620 = vmatmul.msk.f32.gmra.mxu0 %vm238_vm0, %v3891_v5 }
  0x3b   : > { %792 = vperm.xlu2 %3691, %v3897_v7   ;;  %788 = vperm.xlu1 %3690, %v3883_v4  }
  0x42   : > { %3692 = vset.pattern.permute.xlu0 %v3819_v18  ;;  %3621 = vmatmul.msk.f32.gmra.mxu0 %vm238_vm0, %v3911_v10 }
  0x43   : > { %804 = vperm.xlu2 %3691, %v3877_v2   ;;  %800 = vperm.xlu1 %3690, %v3894_v6  }
  0x44   : > { %796 = vperm.xlu0 %3692, %v3880_v3  }
  0x4a   : > { %3622 = vmatmul.msk.f32.gmra.mxu0 %vm238_vm0, %v3908_v9 }
  0x4b   : > { %812 = vperm.xlu2 %3691, %v3911_v10   ;;  %808 = vperm.xlu1 %3690, %v3891_v5  }
  0x4c   : > { %816 = vperm.xlu0 %3692, %v3908_v9  }
  0x52   : > { %3623 = vmatmul.msk.f32.gmra.mxu0 %vm238_vm0, %v3905_v8 }
  0x53   : > { %824 = vperm.xlu2 %3691, %v3925_v13   ;;  %820 = vperm.xlu1 %3690, %v3905_v8  }
  0x54   : > { %828 = vperm.xlu0 %3692, %v3922_v12  }
  0x5a   : > { %3624 = vmatmul.msk.f32.gmra.mxu0 %vm238_vm0, %v3925_v13 }
  0x5b   : > { %836 = vperm.xlu2 %3691, %v3939_v16   ;;  %832 = vperm.xlu1 %3690, %v3919_v11  }
  0x5c   : > { %840 = vperm.xlu0 %3692, %v3936_v15  }
  0x62   : > { %3625 = vmatmul.msk.f32.gmra.mxu0 %vm238_vm0, %v3922_v12 }
  0x63   : > { %848 = vperm.xlu2 %3691, %v3947_v17   ;;  %844 = vperm.xlu1 %3690, %v3933_v14  }
  0x64   : > { %3693 = vset.pattern.permute.xlu0 %v3820_v19 }
  0x65   : > { %961 = vperm.xlu0 %3693, %v3883_v4  }
  0x6a   : > { %3626 = vmatmul.msk.f32.gmra.mxu0 %vm238_vm0, %v3919_v11 }
  0x6b   : > { %3695 = vset.pattern.permute.xlu2 %v3820_v19  ;;  %3694 = vset.pattern.permute.xlu1 %v3820_v19  ;;  %v3981_v20 = vpop.permute.xlu2 %631 }
  0x6c   : > { %8237 = vst [vmem:[#allocation2_spill] sm:$0xff] %v3981_v20  ;;  %969 = vperm.xlu2 %3695, %v3880_v3   ;;  %965 = vperm.xlu1 %3694, %v3897_v7  }
  0x6d   : > { %981 = vperm.xlu0 %3693, %v3891_v5  }
  0x72   : > { %3627 = vmatmul.msk.f32.gmra.mxu0 %vm238_vm0, %v3939_v16 }
  0x73   : > { %v3988_v21 = vpop.permute.xlu2 %635 }
  0x74   : > { %8238 = vst [vmem:[#allocation3_spill] sm:$0xff] %v3988_v21  ;;  %977 = vperm.xlu2 %3695, %v3877_v2   ;;  %973 = vperm.xlu1 %3694, %v3894_v6  }
  0x75   : > { %993 = vperm.xlu0 %3693, %v3905_v8  }
  0x7a   : > { %3628 = vmatmul.msk.f32.gmra.mxu0 %vm238_vm0, %v3936_v15 }
  0x7b   : > { %v3995_v22 = vpop.permute.xlu2 %647 }
  0x7c   : > { %8239 = vst [vmem:[#allocation4_spill] sm:$0xff] %v3995_v22  ;;  %989 = vperm.xlu2 %3695, %v3908_v9   ;;  %985 = vperm.xlu1 %3694, %v3911_v10  }
  0x7d   : > { %1005 = vperm.xlu0 %3693, %v3919_v11  }
  0x82   : > { %3629 = vmatmul.msk.f32.gmra.mxu0 %vm238_vm0, %v3933_v14 }
  0x83   : > { %v4002_v23 = vpop.permute.xlu1 %623  ;;  %v4004_v24 = vpop.permute.xlu2 %659 }
  0x84   : > { %8240 = vst [vmem:[#allocation5_spill] sm:$0xff] %v4002_v23  ;;  %1001 = vperm.xlu2 %3695, %v3922_v12   ;;  %997 = vperm.xlu1 %3694, %v3925_v13   ;;  %v4040_v36 = vpop.permute.xlu0 %615 }
  0x85   : > { %8241 = vst [vmem:[#allocation6_spill] sm:$0xff] %v4004_v24  ;;  %1017 = vperm.xlu0 %3693, %v3933_v14  }
  0x86   : > { %8249 = vst [vmem:[#allocation14_spill] sm:$0xff] %v4040_v36 }
  0x8a   : > { %3630 = vmatmul.msk.f32.gmra.mxu0 %vm238_vm0, %v3947_v17 }
  0x8b   : > { %v4011_v25 = vpop.permute.xlu1 %627  ;;  %v4013_v26 = vpop.permute.xlu2 %671 }
  0x8c   : > { %8242 = vst [vmem:[#allocation7_spill] sm:$0xff] %v4011_v25  ;;  %1013 = vperm.xlu2 %3695, %v3936_v15   ;;  %1009 = vperm.xlu1 %3694, %v3939_v16   ;;  %v4055_v41 = vpop.permute.xlu0 %619 }
  0x8d   : > { %8243 = vst [vmem:[#allocation8_spill] sm:$0xff] %v4013_v26  ;;  %3697 = vset.pattern.permute.xlu0 %v3821_v27 }
  0x8e   : > { %1138 = vperm.xlu0 %3697, %v3897_v7   ;;  %8253 = vst [vmem:[#allocation18_spill] sm:$0xff] %v4055_v41 }
  0x8f   : > { %v4018_v28 = vpop.f32.mrf.mxu0 }
  0x93   : > { %v4020_v29 = vpop.permute.xlu1 %643 }
  0x94   : > { %8244 = vst [vmem:[#allocation9_spill] sm:$0xff] %v4020_v29  ;;  %3696 = vset.pattern.permute.xlu2 %v3821_v27  ;;  %1021 = vperm.xlu1 %3694, %v3947_v17   ;;  %v4069_v47 = vpop.permute.xlu0 %639 }
  0x95   : > { %1134 = vperm.xlu2 %3696, %v3883_v4   ;;  %v4024_v30 = vpop.permute.xlu2 %792  ;;  %8256 = vst [vmem:[#allocation21_spill] sm:$0xff] %v4069_v47 }
  0x96   : > { %8245 = vst [vmem:[#allocation10_spill] sm:$0xff] %v4024_v30  ;;  %1158 = vperm.xlu0 %3697, %v3911_v10  }
  0x97   : > { %v4027_v31 = vpop.f32.mrf.mxu0 }
  0x9b   : > { %v4029_v32 = vpop.permute.xlu1 %655 }
  0x9c   : > { %8246 = vst [vmem:[#allocation11_spill] sm:$0xff] %v4029_v32  ;;  %3698 = vset.pattern.permute.xlu1 %v3821_v27  ;;  %v4080_v51 = vpop.permute.xlu0 %651  ;;  %v3824_v32 = vmov 14  }
  0x9d   : > { %1146 = vperm.xlu2 %3696, %v3894_v6   ;;  %1142 = vperm.xlu1 %3698, %v3880_v3   ;;  %v4033_v33 = vpop.permute.xlu2 %804  ;;  %8259 = vst [vmem:[#allocation24_spill] sm:$0xff] %v4080_v51 }
  0x9e   : > { %8247 = vst [vmem:[#allocation12_spill] sm:$0xff] %v4033_v33  ;;  %1170 = vperm.xlu0 %3697, %v3925_v13  }
  0x9f   : > { %v4036_v34 = vpop.f32.mrf.mxu0 }
  0xa3   : > { %v4038_v35 = vpop.permute.xlu1 %667 }
  0xa4   : > { %8248 = vst [vmem:[#allocation13_spill] sm:$0xff] %v4038_v35  ;;  %v4091_v55 = vpop.permute.xlu0 %663 }
  0xa5   : > { %1154 = vperm.xlu2 %3696, %v3891_v5   ;;  %1150 = vperm.xlu1 %3698, %v3877_v2   ;;  %v4044_v37 = vpop.permute.xlu2 %812  ;;  %8262 = vst [vmem:[#allocation27_spill] sm:$0xff] %v4091_v55 }
  0xa6   : > { %8250 = vst [vmem:[#allocation15_spill] sm:$0xff] %v4044_v37  ;;  %1182 = vperm.xlu0 %3697, %v3939_v16  }
  0xa7   : > { %v4047_v38 = vpop.f32.mrf.mxu0 }
  0xac   : > { %v4104_v60 = vpop.permute.xlu0 %675 }
  0xad   : > { %1166 = vperm.xlu2 %3696, %v3905_v8   ;;  %1162 = vperm.xlu1 %3698, %v3908_v9   ;;  %v4051_v39 = vpop.permute.xlu1 %788  ;;  %v4053_v40 = vpop.permute.xlu2 %824  ;;  %8266 = vst [vmem:[#allocation31_spill] sm:$0xff] %v4104_v60 }
  0xae   : > { %8251 = vst [vmem:[#allocation16_spill] sm:$0xff] %v4051_v39  ;;  %1194 = vperm.xlu0 %3697, %v3947_v17  }
  0xaf   : > { %8252 = vst [vmem:[#allocation17_spill] sm:$0xff] %v4053_v40  ;;  %v4058_v42 = vpop.f32.mrf.mxu0 }
  0xb5   : > { %1178 = vperm.xlu2 %3696, %v3919_v11   ;;  %1174 = vperm.xlu1 %3698, %v3922_v12   ;;  %v4062_v43 = vpop.permute.xlu1 %800  ;;  %v4064_v44 = vpop.permute.xlu2 %836 }
  0xb6   : > { %8254 = vst [vmem:[#allocation19_spill] sm:$0xff] %v4062_v43  ;;  %3701 = vset.pattern.permute.xlu0 %v3822_v45  ;;  %v4117_v19 = vpop.permute.xlu0 %796 }
  0xb7   : > { %8255 = vst [vmem:[#allocation20_spill] sm:$0xff] %v4064_v44  ;;  %1315 = vperm.xlu0 %3701, %v3880_v3   ;;  %v4067_v46 = vpop.f32.mrf.mxu0 }
  0xb8   : > { %8270 = vst [vmem:[#allocation35_spill] sm:$0xff] %v4117_v19 }
  0xbd   : > { %1190 = vperm.xlu2 %3696, %v3933_v14   ;;  %1186 = vperm.xlu1 %3698, %v3936_v15   ;;  %v4073_v48 = vpop.permute.xlu1 %808  ;;  %v4075_v49 = vpop.permute.xlu2 %848 }
  0xbe   : > { %8257 = vst [vmem:[#allocation22_spill] sm:$0xff] %v4073_v48  ;;  %v4127_v26 = vpop.permute.xlu0 %816 }
  0xbf   : > { %8258 = vst [vmem:[#allocation23_spill] sm:$0xff] %v4075_v49  ;;  %1335 = vperm.xlu0 %3701, %v3908_v9   ;;  %v4078_v50 = vpop.f32.mrf.mxu0 }
  0xc0   : > { %8273 = vst [vmem:[#allocation38_spill] sm:$0xff] %v4127_v26 }
  0xc5   : > { %3700 = vset.pattern.permute.xlu2 %v3822_v45  ;;  %3699 = vset.pattern.permute.xlu1 %v3822_v45  ;;  %v4082_v52 = vpop.permute.xlu1 %820 }
  0xc6   : > { %8260 = vst [vmem:[#allocation25_spill] sm:$0xff] %v4082_v52  ;;  %1311 = vperm.xlu2 %3700, %v3897_v7   ;;  %1307 = vperm.xlu1 %3699, %v3883_v4   ;;  %v4086_v53 = vpop.permute.xlu2 %969  ;;  %v4136_v44 = vpop.permute.xlu0 %828  ;;  %v200_v52 = vld [vmem:[%s4199_s22 + $0x48] sm:$0xff] }
  0xc7   : > { %8261 = vst [vmem:[#allocation26_spill] sm:$0xff] %v4086_v53  ;;  %1347 = vperm.xlu0 %3701, %v3922_v12   ;;  %v4089_v54 = vpop.f32.mrf.mxu0 }
  0xc8   : > { %8276 = vst [vmem:[#allocation41_spill] sm:$0xff] %v4136_v44 }
  0xcd   : > { %v4093_v56 = vpop.permute.xlu1 %832 }
  0xce   : > { %8263 = vst [vmem:[#allocation28_spill] sm:$0xff] %v4093_v56  ;;  %1323 = vperm.xlu2 %3700, %v3877_v2   ;;  %1319 = vperm.xlu1 %3699, %v3894_v6   ;;  %v4097_v57 = vpop.permute.xlu2 %977  ;;  %v4145_v24 = vpop.permute.xlu0 %840 }
  0xcf   : > { %8264 = vst [vmem:[#allocation29_spill] sm:$0xff] %v4097_v57  ;;  %1359 = vperm.xlu0 %3701, %v3936_v15   ;;  %v4100_v58 = vpop.f32.mrf.mxu0 }
  0xd0   : > { %8279 = vst [vmem:[#allocation44_spill] sm:$0xff] %v4145_v24 }
  0xd5   : > { %v4102_v59 = vpop.permute.xlu1 %844 }
  0xd6   : > { %8265 = vst [vmem:[#allocation30_spill] sm:$0xff] %v4102_v59  ;;  %1331 = vperm.xlu2 %3700, %v3911_v10   ;;  %1327 = vperm.xlu1 %3699, %v3891_v5   ;;  %v4108_v61 = vpop.permute.xlu2 %989 }
  0xd7   : > { %8267 = vst [vmem:[#allocation32_spill] sm:$0xff] %v4108_v61  ;;  %3702 = vset.pattern.permute.xlu0 %v3823_v62  ;;  %v331_v63 = vpop.f32.mrf.mxu0 }
  0xd8   : > { %1480 = vperm.xlu0 %3702, %v3883_v4  }
  0xde   : > { %1343 = vperm.xlu2 %3700, %v3925_v13   ;;  %1339 = vperm.xlu1 %3699, %v3905_v8   ;;  %v4113_v0 = vpop.permute.xlu1 %965  ;;  %v4115_v1 = vpop.permute.xlu2 %1001 }
  0xdf   : > { %8268 = vst [vmem:[#allocation33_spill] sm:$0xff] %v4113_v0  ;;  %v334_v18 = vpop.f32.mrf.mxu0 }
  0xe0   : > { %8269 = vst [vmem:[#allocation34_spill] sm:$0xff] %v4115_v1  ;;  %1500 = vperm.xlu0 %3702, %v3891_v5  }
  0xe6   : > { %1355 = vperm.xlu2 %3700, %v3939_v16   ;;  %1351 = vperm.xlu1 %3699, %v3919_v11   ;;  %v4122_v27 = vpop.permute.xlu1 %973  ;;  %v4124_v45 = vpop.permute.xlu2 %1013 }
  0xe7   : > { %8271 = vst [vmem:[#allocation36_spill] sm:$0xff] %v4122_v27  ;;  %v337_v59 = vpop.f32.mrf.mxu0 }
  0xe8   : > { %8272 = vst [vmem:[#allocation37_spill] sm:$0xff] %v4124_v45  ;;  %1512 = vperm.xlu0 %3702, %v3905_v8  }
  0xee   : > { %1367 = vperm.xlu2 %3700, %v3947_v17   ;;  %1363 = vperm.xlu1 %3699, %v3933_v14   ;;  %v4131_v49 = vpop.permute.xlu1 %985 }
  0xef   : > { %8274 = vst [vmem:[#allocation39_spill] sm:$0xff] %v4131_v49  ;;  %v340_v60 = vpop.f32.mrf.mxu0  ;;  %v4133_v35 = vpop.permute.xlu2 %1134 }
  0xf0   : > { %8275 = vst [vmem:[#allocation40_spill] sm:$0xff] %v4133_v35  ;;  %1524 = vperm.xlu0 %3702, %v3919_v11  }
  0xf6   : > { %3704 = vset.pattern.permute.xlu2 %v3823_v62  ;;  %3703 = vset.pattern.permute.xlu1 %v3823_v62  ;;  %v4138_v45 = vpop.permute.xlu1 %997 }
  0xf7   : > { %8277 = vst [vmem:[#allocation42_spill] sm:$0xff] %v4138_v45  ;;  %1488 = vperm.xlu2 %3704, %v3880_v3   ;;  %1484 = vperm.xlu1 %3703, %v3897_v7   ;;  %v343_v55 = vpop.f32.mrf.mxu0  ;;  %v4142_v56 = vpop.permute.xlu2 %1146 }
  0xf8   : > { %8278 = vst [vmem:[#allocation43_spill] sm:$0xff] %v4142_v56  ;;  %1536 = vperm.xlu0 %3702, %v3933_v14  }
  0xfe   : > { %v4147_v1 = vpop.permute.xlu1 %1009 }
  0xff   : > { %8280 = vst [vmem:[#allocation45_spill] sm:$0xff] %v4147_v1  ;;  %1496 = vperm.xlu2 %3704, %v3877_v2   ;;  %1492 = vperm.xlu1 %3703, %v3894_v6   ;;  %v346_v62 = vpop.f32.mrf.mxu0  ;;  %v4151_v44 = vpop.permute.xlu2 %1154 }
 0x100   : > { %8281 = vst [vmem:[#allocation46_spill] sm:$0xff] %v4151_v44  ;;  %3706 = vset.pattern.permute.xlu0 %v3824_v32  ;;  %v4160_v1 = vpop.permute.xlu0 %961 }
 0x101   : > { %1657 = vperm.xlu0 %3706, %v3897_v7   ;;  %8284 = vst [vmem:[#allocation49_spill] sm:$0xff] %v4160_v1 }
 0x106   : > { %v4154_v45 = vpop.permute.xlu1 %1021 }
 0x107   : > { %8282 = vst [vmem:[#allocation47_spill] sm:$0xff] %v4154_v45  ;;  %1508 = vperm.xlu2 %3704, %v3908_v9   ;;  %1504 = vperm.xlu1 %3703, %v3911_v10   ;;  %v349_v24 = vpop.f32.mrf.mxu0  ;;  %v4158_v40 = vpop.permute.xlu2 %1166 }
 0x108   : > { %8283 = vst [vmem:[#allocation48_spill] sm:$0xff] %v4158_v40  ;;  %353 = vmatpush.msra.mxu1 %v349_v24  ;;  %v4170_v24 = vpop.permute.xlu0 %981 }
 0x109   : > { %1677 = vperm.xlu0 %3706, %v3911_v10   ;;  %8287 = vst [vmem:[#allocation52_spill] sm:$0xff] %v4170_v24 }
 0x10a   : > { %354 = vmatpush.msra.mxu1 %v346_v62 }
 0x10c   : > { %355 = vmatpush.msra.mxu1 %v343_v55 }
 0x10e   : > { %356 = vmatpush.msra.mxu1 %v340_v60 }
 0x10f   : > { %1520 = vperm.xlu2 %3704, %v3922_v12   ;;  %1516 = vperm.xlu1 %3703, %v3925_v13   ;;  %v4165_v45 = vpop.permute.xlu1 %1142  ;;  %v4167_v51 = vpop.permute.xlu2 %1178 }
 0x110   : > { %8285 = vst [vmem:[#allocation50_spill] sm:$0xff] %v4165_v45  ;;  %357 = vmatpush.msra.mxu1 %v337_v59  ;;  %v4183_v59 = vpop.permute.xlu0 %993 }
 0x111   : > { %8286 = vst [vmem:[#allocation51_spill] sm:$0xff] %v4167_v51  ;;  %1689 = vperm.xlu0 %3706, %v3925_v13  }
 0x112   : > { %358 = vmatpush.msra.mxu1 %v334_v18  ;;  %8290 = vst [vmem:[#allocation55_spill] sm:$0xff] %v4183_v59  ;;  %v193_v18 = vld [vmem:[%s4199_s22 + $0x10] sm:$0xff] }
 0x114   : > { %359 = vmatpush.msra.mxu1 %v331_v63  ;;  %v3825_v63 = vmov 15  }
 0x116   : > { %360 = vmatpush.msra.mxu1 %v4100_v58 }
 0x117   : > { %1532 = vperm.xlu2 %3704, %v3936_v15   ;;  %1528 = vperm.xlu1 %3703, %v3939_v16   ;;  %v4175_v55 = vpop.permute.xlu1 %1150  ;;  %v4177_v60 = vpop.permute.xlu2 %1190 }
 0x118   : > { %8288 = vst [vmem:[#allocation53_spill] sm:$0xff] %v4175_v55  ;;  %361 = vmatpush.msra.mxu1 %v4089_v54 }
 0x119   : > { %8289 = vst [vmem:[#allocation54_spill] sm:$0xff] %v4177_v60  ;;  %1701 = vperm.xlu0 %3706, %v3939_v16   ;;  %v194_v60 = vld [vmem:[%s4199_s22 + $0x18] sm:$0xff] }
 0x11a   : > { %362 = vmatpush.msra.mxu1 %v4078_v50 }
 0x11c   : > { %363 = vmatpush.msra.mxu1 %v4067_v46 }
 0x11e   : > { %364 = vmatpush.msra.mxu1 %v4058_v42  ;;  %v191_v42 = vld [vmem:[%s4199_s22] sm:$0xff] }
 0x11f   : > { %3705 = vset.pattern.permute.xlu2 %v3824_v32  ;;  %1540 = vperm.xlu1 %3703, %v3947_v17   ;;  %v4187_v58 = vpop.permute.xlu1 %1162 }
 0x120   : > { %8291 = vst [vmem:[#allocation56_spill] sm:$0xff] %v4187_v58  ;;  %1653 = vperm.xlu2 %3705, %v3883_v4   ;;  %365 = vmatpush.msra.mxu1 %v4047_v38  ;;  %v4191_v54 = vpop.permute.xlu2 %1311  ;;  %v4205_v38 = vpop.permute.xlu0 %1005 }
 0x121   : > { %8292 = vst [vmem:[#allocation57_spill] sm:$0xff] %v4191_v54  ;;  %1713 = vperm.xlu0 %3706, %v3947_v17  }
 0x122   : > { %366 = vmatpush.msra.mxu1 %v4036_v34  ;;  %8293 = vst [vmem:[#allocation58_spill] sm:$0xff] %v4205_v38 }
 0x124   : > { %367 = vmatpush.msra.mxu1 %v4027_v31  ;;  %v192_v31 = vld [vmem:[%s4199_s22 + $0x8] sm:$0xff] }
 0x126   : > { %368 = vmatpush.msra.mxu1 %v4018_v28 }
 0x127   : > { %3707 = vset.pattern.permute.xlu1 %v3824_v32  ;;  %369 = vmatmul.f32.vlgmr.msra.gmra.mxu1 %v191_v42  ;;  %v4207_v46 = vpop.permute.xlu1 %1174 }
 0x128   : > { %8294 = vst [vmem:[#allocation59_spill] sm:$0xff] %v4207_v46  ;;  %1665 = vperm.xlu2 %3705, %v3894_v6   ;;  %1661 = vperm.xlu1 %3707, %v3880_v3   ;;  %v4211_v50 = vpop.permute.xlu2 %1323  ;;  %v4221_v34 = vpop.permute.xlu0 %1017  ;;  %v3826_v46 = vmov 16  }
 0x129   : > { %8295 = vst [vmem:[#allocation60_spill] sm:$0xff] %v4211_v50  ;;  %3710 = vset.pattern.permute.xlu0 %v3825_v63 }
 0x12a   : > { %1834 = vperm.xlu0 %3710, %v3880_v3   ;;  %8298 = vst [vmem:[#allocation63_spill] sm:$0xff] %v4221_v34 }
 0x12f   : > { %372 = vmatmul.f32.gmra.mxu1 %v192_v31  ;;  %v4215_v28 = vpop.permute.xlu1 %1186 }
 0x130   : > { %8296 = vst [vmem:[#allocation61_spill] sm:$0xff] %v4215_v28  ;;  %1673 = vperm.xlu2 %3705, %v3891_v5   ;;  %1669 = vperm.xlu1 %3707, %v3877_v2   ;;  %v4219_v32 = vpop.permute.xlu2 %1331  ;;  %v4232_v31 = vpop.permute.xlu0 %1138  ;;  %v195_v28 = vld [vmem:[%s4199_s22 + $0x20] sm:$0xff] }
 0x131   : > { %8297 = vst [vmem:[#allocation62_spill] sm:$0xff] %v4219_v32 }
 0x132   : > { %1854 = vperm.xlu0 %3710, %v3908_v9   ;;  %8301 = vst [vmem:[#allocation66_spill] sm:$0xff] %v4232_v31 }
 0x137   : > { %375 = vmatmul.f32.gmra.mxu1 %v193_v18 }
 0x138   : > { %1685 = vperm.xlu2 %3705, %v3905_v8   ;;  %1681 = vperm.xlu1 %3707, %v3908_v9   ;;  %v4227_v62 = vpop.permute.xlu1 %1307  ;;  %v4229_v42 = vpop.permute.xlu2 %1343 }
 0x139   : > { %8299 = vst [vmem:[#allocation64_spill] sm:$0xff] %v4227_v62  ;;  %v4243_v51 = vpop.permute.xlu0 %1158 }
 0x13a   : > { %8300 = vst [vmem:[#allocation65_spill] sm:$0xff] %v4229_v42  ;;  %1866 = vperm.xlu0 %3710, %v3922_v12  }
 0x13b   : > { %8304 = vst [vmem:[#allocation69_spill] sm:$0xff] %v4243_v51 }
 0x13f   : > { %378 = vmatmul.f32.gmra.mxu1 %v194_v60 }
 0x140   : > { %1697 = vperm.xlu2 %3705, %v3919_v11   ;;  %1693 = vperm.xlu1 %3707, %v3922_v12   ;;  %v4237_v18 = vpop.permute.xlu1 %1319  ;;  %v4239_v34 = vpop.permute.xlu2 %1355 }
 0x141   : > { %8302 = vst [vmem:[#allocation67_spill] sm:$0xff] %v4237_v18  ;;  %v4253_v42 = vpop.permute.xlu0 %1170 }
 0x142   : > { %8303 = vst [vmem:[#allocation68_spill] sm:$0xff] %v4239_v34  ;;  %1878 = vperm.xlu0 %3710, %v3936_v15   ;;  %v196_v34 = vld [vmem:[%s4199_s22 + $0x28] sm:$0xff] }
 0x143   : > { %8307 = vst [vmem:[#allocation72_spill] sm:$0xff] %v4253_v42 }
 0x147   : > { %381 = vmatmul.f32.gmra.mxu1 %v195_v28 }
 0x148   : > { %1709 = vperm.xlu2 %3705, %v3933_v14   ;;  %1705 = vperm.xlu1 %3707, %v3936_v15   ;;  %v4247_v60 = vpop.permute.xlu1 %1327  ;;  %v4249_v38 = vpop.permute.xlu2 %1367 }
 0x149   : > { %8305 = vst [vmem:[#allocation70_spill] sm:$0xff] %v4247_v60  ;;  %v4265_v42 = vpop.permute.xlu0 %1182  ;;  %v7910_v60 = vmov 19  }
 0x14a   : > { %8306 = vst [vmem:[#allocation71_spill] sm:$0xff] %v4249_v38  ;;  %3711 = vset.pattern.permute.xlu0 %v3826_v46  ;;  %v197_v38 = vld [vmem:[%s4199_s22 + $0x30] sm:$0xff] }
 0x14b   : > { %1999 = vperm.xlu0 %3711, %v3883_v4   ;;  %8311 = vst [vmem:[#allocation76_spill] sm:$0xff] %v4265_v42 }
 0x14f   : > { %384 = vmatmul.f32.gmra.mxu1 %v196_v34  ;;  %v198_v34 = vld [vmem:[%s4199_s22 + $0x38] sm:$0xff] }
 0x150   : > { %3709 = vset.pattern.permute.xlu2 %v3825_v63  ;;  %3708 = vset.pattern.permute.xlu1 %v3825_v63  ;;  %v4255_v28 = vpop.permute.xlu1 %1339 }
 0x151   : > { %8308 = vst [vmem:[#allocation73_spill] sm:$0xff] %v4255_v28  ;;  %1830 = vperm.xlu2 %3709, %v3897_v7   ;;  %1826 = vperm.xlu1 %3708, %v3883_v4   ;;  %v4259_v40 = vpop.permute.xlu2 %1488  ;;  %v4279_v42 = vpop.permute.xlu0 %1194 }
 0x152   : > { %8309 = vst [vmem:[#allocation74_spill] sm:$0xff] %v4259_v40 }
 0x153   : > { %2019 = vperm.xlu0 %3711, %v3891_v5   ;;  %8315 = vst [vmem:[#allocation80_spill] sm:$0xff] %v4279_v42 }
 0x157   : > { %387 = vmatmul.f32.gmra.mxu1 %v197_v38 }
 0x158   : > { %v4263_v59 = vpop.permute.xlu1 %1351 }
 0x159   : > { %8310 = vst [vmem:[#allocation75_spill] sm:$0xff] %v4263_v59  ;;  %1842 = vperm.xlu2 %3709, %v3877_v2   ;;  %1838 = vperm.xlu1 %3708, %v3894_v6   ;;  %v4269_v63 = vpop.permute.xlu2 %1496  ;;  %v199_v59 = vld [vmem:[%s4199_s22 + $0x40] sm:$0xff]  ;;  %v4291_v22 = vpop.permute.xlu0 %1315 }
 0x15a   : > { %8312 = vst [vmem:[#allocation77_spill] sm:$0xff] %v4269_v63 }
 0x15b   : > { %2031 = vperm.xlu0 %3711, %v3905_v8   ;;  %8318 = vst [vmem:[#allocation83_spill] sm:$0xff] %v4291_v22 }
 0x15f   : > { %390 = vmatmul.f32.gmra.mxu1 %v198_v34 }
 0x160   : > { %v4273_v28 = vpop.permute.xlu1 %1363 }
 0x161   : > { %8313 = vst [vmem:[#allocation78_spill] sm:$0xff] %v4273_v28  ;;  %1850 = vperm.xlu2 %3709, %v3911_v10   ;;  %1846 = vperm.xlu1 %3708, %v3891_v5   ;;  %v4277_v38 = vpop.permute.xlu2 %1508  ;;  %v4302_v58 = vpop.permute.xlu0 %1335 }
 0x162   : > { %8314 = vst [vmem:[#allocation79_spill] sm:$0xff] %v4277_v38  ;;  %v7877_v38 = vmov 17  }
 0x163   : > { %2043 = vperm.xlu0 %3711, %v3919_v11   ;;  %8321 = vst [vmem:[#allocation86_spill] sm:$0xff] %v4302_v58 }
 0x167   : > { %393 = vmatmul.f32.gmra.mxu1 %v199_v59 }
 0x169   : > { %1862 = vperm.xlu2 %3709, %v3925_v13   ;;  %1858 = vperm.xlu1 %3708, %v3905_v8   ;;  %v4285_v34 = vpop.permute.xlu1 %1484  ;;  %v4287_v28 = vpop.permute.xlu2 %1520 }
 0x16a   : > { %8316 = vst [vmem:[#allocation81_spill] sm:$0xff] %v4285_v34  ;;  %v4315_v58 = vpop.permute.xlu0 %1347 }
 0x16b   : > { %8317 = vst [vmem:[#allocation82_spill] sm:$0xff] %v4287_v28  ;;  %2055 = vperm.xlu0 %3711, %v3933_v14   ;;  %v201_v28 = vld [vmem:[%s4199_s22 + $0x50] sm:$0xff] }
 0x16c   : > { %8324 = vst [vmem:[#allocation89_spill] sm:$0xff] %v4315_v58  ;;  %v226_v58 = vld [vmem:[%s7832_s2 + $0x8] sm:$0xff] }
 0x16f   : > { %396 = vmatmul.f32.gmra.mxu1 %v200_v52 }
 0x171   : > { %1874 = vperm.xlu2 %3709, %v3939_v16   ;;  %1870 = vperm.xlu1 %3708, %v3919_v11   ;;  %v4295_v59 = vpop.permute.xlu1 %1492  ;;  %v4297_v42 = vpop.permute.xlu2 %1532 }
 0x172   : > { %8319 = vst [vmem:[#allocation84_spill] sm:$0xff] %v4295_v59  ;;  %v4340_v29 = vpop.permute.xlu0 %1359 }
 0x173   : > { %8320 = vst [vmem:[#allocation85_spill] sm:$0xff] %v4297_v42  ;;  %3715 = vset.pattern.permute.xlu0 %v7877_v38  ;;  %v202_v42 = vld [vmem:[%s4199_s22 + $0x58] sm:$0xff]  ;;  %v229_v38 = vld [vmem:[%s7832_s2 + $0x20] sm:$0xff] }
 0x174   : > { %2176 = vperm.xlu0 %3715, %v3897_v7   ;;  %495 = vmatpush.msra.mxu2 %v229_v38  ;;  %v203_v38 = vld [vmem:[%s4199_s22 + $0x60] sm:$0xff]  ;;  %8329 = vst [vmem:[#allocation94_spill] sm:$0xff] %v4340_v29 }
 0x177   : > { %399 = vmatmul.f32.gmra.mxu1 %v201_v28 }
 0x179   : > { %1886 = vperm.xlu2 %3709, %v3947_v17   ;;  %1882 = vperm.xlu1 %3708, %v3933_v14   ;;  %v4306_v52 = vpop.permute.xlu1 %1504 }
 0x17a   : > { %8322 = vst [vmem:[#allocation87_spill] sm:$0xff] %v4306_v52  ;;  %v4308_v61 = vpop.permute.xlu2 %1653  ;;  %v4352_v52 = vpop.permute.xlu0 %1480 }
 0x17b   : > { %8323 = vst [vmem:[#allocation88_spill] sm:$0xff] %v4308_v61 }
 0x17c   : > { %2196 = vperm.xlu0 %3715, %v3911_v10   ;;  %8332 = vst [vmem:[#allocation97_spill] sm:$0xff] %v4352_v52 }
 0x17f   : > { %402 = vmatmul.f32.gmra.mxu1 %v202_v42  ;;  %v228_v42 = vld [vmem:[%s7832_s2 + $0x18] sm:$0xff] }
 0x180   : > { %496 = vmatpush.msra.mxu2 %v228_v42 }
 0x181   : > { %3713 = vset.pattern.permute.xlu2 %v3826_v46  ;;  %3712 = vset.pattern.permute.xlu1 %v3826_v46  ;;  %v4317_v28 = vpop.permute.xlu1 %1516  ;;  %v227_v46 = vld [vmem:[%s7832_s2 + $0x10] sm:$0xff] }
 0x182   : > { %8325 = vst [vmem:[#allocation90_spill] sm:$0xff] %v4317_v28  ;;  %2007 = vperm.xlu2 %3713, %v3880_v3   ;;  %2003 = vperm.xlu1 %3712, %v3897_v7   ;;  %v4321_v26 = vpop.permute.xlu2 %1665  ;;  %v4366_v32 = vpop.permute.xlu0 %1500 }
 0x183   : > { %8326 = vst [vmem:[#allocation91_spill] sm:$0xff] %v4321_v26  ;;  %497 = vmatpush.msra.mxu2 %v227_v46 }
 0x184   : > { %2208 = vperm.xlu0 %3715, %v3925_v13   ;;  %8335 = vst [vmem:[#allocation100_spill] sm:$0xff] %v4366_v32 }
 0x185   : > { %498 = vmatpush.msra.mxu2 %v226_v58 }
 0x187   : > { %405 = vmatmul.f32.gmra.mxu1 %v203_v38  ;;  %v204_v38 = vld [vmem:[%s4199_s22 + $0x68] sm:$0xff] }
 0x189   : > { %v4334_v28 = vpop.permute.xlu1 %1528 }
 0x18a   : > { %8327 = vst [vmem:[#allocation92_spill] sm:$0xff] %v4334_v28  ;;  %2015 = vperm.xlu2 %3713, %v3877_v2   ;;  %2011 = vperm.xlu1 %3712, %v3894_v6   ;;  %v4338_v42 = vpop.permute.xlu2 %1673  ;;  %v205_v28 = vld [vmem:[%s4199_s22 + $0x70] sm:$0xff]  ;;  %v4380_v47 = vpop.permute.xlu0 %1512 }
 0x18b   : > { %8328 = vst [vmem:[#allocation93_spill] sm:$0xff] %v4338_v42  ;;  %v206_v42 = vld [vmem:[%s4199_s22 + $0x78] sm:$0xff] }
 0x18c   : > { %2220 = vperm.xlu0 %3715, %v3939_v16   ;;  %8339 = vst [vmem:[#allocation104_spill] sm:$0xff] %v4380_v47 }
 0x18f   : > { %408 = vmatmul.f32.gmra.mxu1 %v204_v38 }
 0x191   : > { %v4344_v46 = vpop.permute.xlu1 %1540 }
 0x192   : > { %8330 = vst [vmem:[#allocation95_spill] sm:$0xff] %v4344_v46  ;;  %2027 = vperm.xlu2 %3713, %v3908_v9   ;;  %2023 = vperm.xlu1 %3712, %v3911_v10   ;;  %v4348_v58 = vpop.permute.xlu2 %1685  ;;  %v7893_v46 = vmov 18  }
 0x193   : > { %8331 = vst [vmem:[#allocation96_spill] sm:$0xff] %v4348_v58  ;;  %v237_v58 = vld [vmem:[%s7832_s2 + $0x60] sm:$0xff] }
 0x194   : > { %2232 = vperm.xlu0 %3715, %v3947_v17  }
 0x197   : > { %411 = vmatmul.f32.gmra.mxu1 %v205_v28  ;;  %v4368_v28 = vperm.slane %v237_v58, 0 }
 0x19a   : > { %2039 = vperm.xlu2 %3713, %v3922_v12   ;;  %2035 = vperm.xlu1 %3712, %v3925_v13   ;;  %v4356_v29 = vpop.permute.xlu1 %1661  ;;  %v4358_v38 = vpop.permute.xlu2 %1697 }
 0x19b   : > { %8333 = vst [vmem:[#allocation98_spill] sm:$0xff] %v4356_v29 }
 0x19c   : > { %8334 = vst [vmem:[#allocation99_spill] sm:$0xff] %v4358_v38  ;;  %3719 = vset.pattern.permute.xlu0 %v7893_v46 }
 0x19d   : > { %2353 = vperm.xlu0 %3719, %v3880_v3  }
 0x19f   : > { %414 = vmatmul.f32.gmra.mxu1 %v206_v42  ;;  %v8340_v42 = vmov 17  }
 0x1a2   : > { %2051 = vperm.xlu2 %3713, %v3936_v15   ;;  %2047 = vperm.xlu1 %3712, %v3939_v16   ;;  %v4372_v38 = vpop.permute.xlu1 %1669  ;;  %v4374_v51 = vpop.permute.xlu2 %1709 }
 0x1a3   : > { %8336 = vst [vmem:[#allocation101_spill] sm:$0xff] %v4372_v38 }
 0x1a4   : > { %8337 = vst [vmem:[#allocation102_spill] sm:$0xff] %v4374_v51  ;;  %v370_v46 = vpop.f32.mrf.mxu1 }
 0x1a5   : > { %2373 = vperm.xlu0 %3719, %v3908_v9   ;;  %v371_v49 = vadd.f32 %v370_v46, %v4368_v28 }
 0x1a7   : > { %v4378_v37 = vmax.f32 %v371_v49, 0.0 }
 0x1a9   : > { %8338 = vst [vmem:[#allocation103_spill] sm:$0xff] %v4378_v37  ;;  %3631 = vmatmul.msk.f32.vlgmr.msra.gmra.mxu2 %vm434_vm1, %v4378_v37 }
 0x1aa   : > { %3714 = vset.pattern.permute.xlu2 %v8340_v42  ;;  %2059 = vperm.xlu1 %3712, %v3947_v17   ;;  %v4386_v58 = vpop.permute.xlu1 %1681  ;;  %v4400_v17 = vpop.permute.xlu0 %1524 }
 0x1ab   : > { %8341 = vst [vmem:[#allocation105_spill] sm:$0xff] %v4386_v58  ;;  %2172 = vperm.xlu2 %3714, %v3883_v4   ;;  %v4389_v51 = vpop.permute.xlu2 %1830 }
 0x1ac   : > { %8342 = vst [vmem:[#allocation106_spill] sm:$0xff] %v4389_v51  ;;  %v373_v38 = vpop.f32.mrf.mxu1 }
 0x1ad   : > { %2385 = vperm.xlu0 %3719, %v3922_v12   ;;  %v374_v49 = vadd.f32 %v373_v38, %v4368_v28  ;;  %8345 = vst [vmem:[#allocation109_spill] sm:$0xff] %v4400_v17 }
 0x1af   : > { %v4393_v46 = vmax.f32 %v374_v49, 0.0 }
 0x1b1   : > { %8343 = vst [vmem:[#allocation107_spill] sm:$0xff] %v4393_v46  ;;  %3632 = vmatmul.msk.f32.gmra.mxu2 %vm434_vm1, %v4393_v46 }
 0x1b2   : > { %3716 = vset.pattern.permute.xlu1 %v8340_v42  ;;  %v4398_v47 = vpop.permute.xlu1 %1693 }
 0x1b3   : > { %8344 = vst [vmem:[#allocation108_spill] sm:$0xff] %v4398_v47  ;;  %2184 = vperm.xlu2 %3714, %v3894_v6   ;;  %2180 = vperm.xlu1 %3716, %v3880_v3   ;;  %v4404_v58 = vpop.permute.xlu2 %1842 }
 0x1b4   : > { %8346 = vst [vmem:[#allocation110_spill] sm:$0xff] %v4404_v58  ;;  %v376_v32 = vpop.f32.mrf.mxu1  ;;  %v4418_v58 = vpop.permute.xlu0 %1536 }
 0x1b5   : > { %2397 = vperm.xlu0 %3719, %v3936_v15   ;;  %v377_v38 = vadd.f32 %v376_v32, %v4368_v28  ;;  %8350 = vst [vmem:[#allocation114_spill] sm:$0xff] %v4418_v58 }
 0x1b7   : > { %v4408_v49 = vmax.f32 %v377_v38, 0.0 }
 0x1b9   : > { %8347 = vst [vmem:[#allocation111_spill] sm:$0xff] %v4408_v49  ;;  %3633 = vmatmul.msk.f32.gmra.mxu2 %vm434_vm1, %v4408_v49 }
 0x1ba   : > { %v4412_v42 = vpop.permute.xlu1 %1705 }
 0x1bb   : > { %8348 = vst [vmem:[#allocation112_spill] sm:$0xff] %v4412_v42  ;;  %2192 = vperm.xlu2 %3714, %v3891_v5   ;;  %2188 = vperm.xlu1 %3716, %v3877_v2   ;;  %v4416_v47 = vpop.permute.xlu2 %1850 }
 0x1bc   : > { %8349 = vst [vmem:[#allocation113_spill] sm:$0xff] %v4416_v47  ;;  %v379_v17 = vpop.f32.mrf.mxu1 }
 0x1bd   : > { %3731 = vset.pattern.permute.xlu0 %v7910_v60  ;;  %v380_v32 = vadd.f32 %v379_v17, %v4368_v28  ;;  %v4435_v17 = vpop.permute.xlu0 %1657 }
 0x1be   : > { %2526 = vperm.xlu0 %3731, %v3880_v3   ;;  %8354 = vst [vmem:[#allocation118_spill] sm:$0xff] %v4435_v17 }
 0x1bf   : > { %v4423_v38 = vmax.f32 %v380_v32, 0.0 }
 0x1c1   : > { %8351 = vst [vmem:[#allocation115_spill] sm:$0xff] %v4423_v38  ;;  %3634 = vmatmul.msk.f32.gmra.mxu2 %vm434_vm1, %v4423_v38 }
 0x1c3   : > { %2204 = vperm.xlu2 %3714, %v3905_v8   ;;  %2200 = vperm.xlu1 %3716, %v3908_v9   ;;  %v4429_v42 = vpop.permute.xlu1 %1826  ;;  %v4431_v47 = vpop.permute.xlu2 %1862 }
 0x1c4   : > { %8352 = vst [vmem:[#allocation116_spill] sm:$0xff] %v4429_v42  ;;  %v382_v58 = vpop.f32.mrf.mxu1 }
 0x1c5   : > { %8353 = vst [vmem:[#allocation117_spill] sm:$0xff] %v4431_v47  ;;  %v383_v60 = vadd.f32 %v382_v58, %v4368_v28 }
 0x1c6   : > { %2546 = vperm.xlu0 %3731, %v3908_v9  }
 0x1c7   : > { %v4437_v3 = vmax.f32 %v383_v60, 0.0  ;;  %v4451_v60 = vpop.permute.xlu0 %1677 }
 0x1c8   : > { %8359 = vst [vmem:[#allocation123_spill] sm:$0xff] %v4451_v60  ;;  %v8364_v60 = vmov 18  }
 0x1c9   : > { %8355 = vst [vmem:[#allocation119_spill] sm:$0xff] %v4437_v3  ;;  %3635 = vmatmul.msk.f32.gmra.mxu2 %vm434_vm1, %v4437_v3 }
 0x1cb   : > { %2216 = vperm.xlu2 %3714, %v3919_v11   ;;  %2212 = vperm.xlu1 %3716, %v3922_v12   ;;  %v4443_v32 = vpop.permute.xlu1 %1838  ;;  %v4445_v44 = vpop.permute.xlu2 %1874 }
 0x1cc   : > { %8356 = vst [vmem:[#allocation120_spill] sm:$0xff] %v4443_v32  ;;  %v385_v47 = vpop.f32.mrf.mxu1  ;;  %v4685_v32 = vld [vmem:[%s3874_s19 + $0x70] sm:$0xff] }
 0x1cd   : > { %8357 = vst [vmem:[#allocation121_spill] sm:$0xff] %v4445_v44  ;;  %v386_v58 = vadd.f32 %v385_v47, %v4368_v28 }
 0x1ce   : > { %2550 = vperm.xlu0 %3731, %v3905_v8   ;;  %8421 = vst [vmem:[#allocation181_spill] sm:$0xff] %v4685_v32 }
 0x1cf   : > { %v4449_v9 = vmax.f32 %v386_v58, 0.0  ;;  %v4467_v58 = vpop.permute.xlu0 %1689 }
 0x1d0   : > { %8363 = vst [vmem:[#allocation127_spill] sm:$0xff] %v4467_v58 }
 0x1d1   : > { %8358 = vst [vmem:[#allocation122_spill] sm:$0xff] %v4449_v9  ;;  %3636 = vmatmul.msk.f32.gmra.mxu2 %vm434_vm1, %v4449_v9 }
 0x1d3   : > { %2228 = vperm.xlu2 %3714, %v3933_v14   ;;  %2224 = vperm.xlu1 %3716, %v3936_v15   ;;  %v4457_v11 = vpop.permute.xlu1 %1846  ;;  %v4459_v24 = vpop.permute.xlu2 %1886 }
 0x1d4   : > { %8360 = vst [vmem:[#allocation124_spill] sm:$0xff] %v4457_v11  ;;  %v388_v44 = vpop.f32.mrf.mxu1  ;;  %v4617_v11 = vld [vmem:[%s3874_s19 + $0x10] sm:$0xff] }
 0x1d5   : > { %8361 = vst [vmem:[#allocation125_spill] sm:$0xff] %v4459_v24  ;;  %v389_v47 = vadd.f32 %v388_v44, %v4368_v28 }
 0x1d6   : > { %2566 = vperm.xlu0 %3731, %v3939_v16  }
 0x1d7   : > { %v4463_v8 = vmax.f32 %v389_v47, 0.0  ;;  %v7923_v47 = vmov 21  }
 0x1d9   : > { %8362 = vst [vmem:[#allocation126_spill] sm:$0xff] %v4463_v8  ;;  %3637 = vmatmul.msk.f32.gmra.mxu2 %vm434_vm1, %v4463_v8 }
 0x1db   : > { %3718 = vset.pattern.permute.xlu2 %v8364_v60  ;;  %3717 = vset.pattern.permute.xlu1 %v8364_v60  ;;  %v4471_v15 = vpop.permute.xlu1 %1858 }
 0x1dc   : > { %8365 = vst [vmem:[#allocation128_spill] sm:$0xff] %v4471_v15  ;;  %2349 = vperm.xlu2 %3718, %v3897_v7   ;;  %v4474_v24 = vpop.permute.xlu2 %2007  ;;  %2345 = vperm.xlu1 %3717, %v3883_v4   ;;  %v391_v16 = vpop.f32.mrf.mxu1 }
 0x1dd   : > { %8366 = vst [vmem:[#allocation129_spill] sm:$0xff] %v4474_v24  ;;  %v392_v44 = vadd.f32 %v391_v16, %v4368_v28  ;;  %v4490_v16 = vpop.permute.xlu0 %1701 }
 0x1de   : > { %3737 = vset.pattern.permute.xlu0 %v7923_v47  ;;  %8370 = vst [vmem:[#allocation133_spill] sm:$0xff] %v4490_v16 }
 0x1df   : > { %v4479_v8 = vmax.f32 %v392_v44, 0.0  ;;  %2868 = vperm.xlu0 %3737, %v3897_v7  }
 0x1e1   : > { %8367 = vst [vmem:[#allocation130_spill] sm:$0xff] %v4479_v8  ;;  %3638 = vmatmul.msk.f32.gmra.mxu2 %vm434_vm1, %v4479_v8 }
 0x1e3   : > { %v4484_v15 = vpop.permute.xlu1 %1870 }
 0x1e4   : > { %8368 = vst [vmem:[#allocation131_spill] sm:$0xff] %v4484_v15  ;;  %2361 = vperm.xlu2 %3718, %v3877_v2   ;;  %v4487_v58 = vpop.permute.xlu2 %2015  ;;  %2357 = vperm.xlu1 %3717, %v3894_v6   ;;  %v394_v24 = vpop.f32.mrf.mxu1 }
 0x1e5   : > { %8369 = vst [vmem:[#allocation132_spill] sm:$0xff] %v4487_v58  ;;  %v395_v47 = vadd.f32 %v394_v24, %v4368_v28  ;;  %v4505_v58 = vpop.permute.xlu0 %1713 }
 0x1e6   : > { %8374 = vst [vmem:[#allocation137_spill] sm:$0xff] %v4505_v58 }
 0x1e7   : > { %v4493_v44 = vmax.f32 %v395_v47, 0.0  ;;  %2888 = vperm.xlu0 %3737, %v3911_v10   ;;  %v8376_v47 = vmov 19  }
 0x1e9   : > { %8371 = vst [vmem:[#allocation134_spill] sm:$0xff] %v4493_v44  ;;  %3639 = vmatmul.msk.f32.gmra.mxu2 %vm434_vm1, %v4493_v44  ;;  %v4600_v44 = vld [vmem:[%s3874_s19] sm:$0xff] }
 0x1eb   : > { %v4498_v8 = vpop.permute.xlu1 %1882 }
 0x1ec   : > { %8372 = vst [vmem:[#allocation135_spill] sm:$0xff] %v4498_v8  ;;  %2369 = vperm.xlu2 %3718, %v3911_v10   ;;  %v4501_v2 = vpop.permute.xlu2 %2027  ;;  %2365 = vperm.xlu1 %3717, %v3891_v5   ;;  %v397_v15 = vpop.f32.mrf.mxu1 }
 0x1ed   : > { %8373 = vst [vmem:[#allocation136_spill] sm:$0xff] %v4501_v2  ;;  %v398_v16 = vadd.f32 %v397_v15, %v4368_v28  ;;  %v4525_v58 = vpop.permute.xlu0 %1834 }
 0x1ee   : > { %8380 = vst [vmem:[#allocation142_spill] sm:$0xff] %v4525_v58 }
 0x1ef   : > { %v4507_v24 = vmax.f32 %v398_v16, 0.0  ;;  %2900 = vperm.xlu0 %3737, %v3925_v13   ;;  %v7935_v16 = vmov 20  }
 0x1f1   : > { %8375 = vst [vmem:[#allocation138_spill] sm:$0xff] %v4507_v24  ;;  %3640 = vmatmul.msk.f32.gmra.mxu2 %vm434_vm1, %v4507_v24  ;;  %v8397_v24 = vmov 20  }
 0x1f4   : > { %3721 = vset.pattern.permute.xlu2 %v8376_v47  ;;  %3720 = vset.pattern.permute.xlu1 %v8376_v47  ;;  %v4514_v8 = vpop.permute.xlu1 %2003  ;;  %v400_v5 = vpop.f32.mrf.mxu1 }
 0x1f5   : > { %8377 = vst [vmem:[#allocation139_spill] sm:$0xff] %v4514_v8  ;;  %v401_v2 = vadd.f32 %v400_v5, %v4368_v28  ;;  %2522 = vperm.xlu2 %3721, %v3897_v7   ;;  %v4518_v15 = vpop.permute.xlu2 %2039  ;;  %2518 = vperm.xlu1 %3720, %v3883_v4  }
 0x1f6   : > { %8378 = vst [vmem:[#allocation140_spill] sm:$0xff] %v4518_v15  ;;  %v4533_v15 = vld [vmem:[%s3874_s19 + $0x20] sm:$0xff] }
 0x1f7   : > { %v4521_v13 = vmax.f32 %v401_v2, 0.0  ;;  %3741 = vset.pattern.permute.xlu0 %v7935_v16  ;;  %v4544_v16 = vpop.permute.xlu0 %1854 }
 0x1f8   : > { %2703 = vperm.xlu0 %3741, %v3894_v6   ;;  %8384 = vst [vmem:[#allocation146_spill] sm:$0xff] %v4544_v16 }
 0x1f9   : > { %8379 = vst [vmem:[#allocation141_spill] sm:$0xff] %v4521_v13  ;;  %3641 = vmatmul.msk.f32.gmra.mxu2 %vm434_vm1, %v4521_v13 }
 0x1fc   : > { %v4529_v8 = vpop.permute.xlu1 %2011  ;;  %v403_v7 = vpop.f32.mrf.mxu1 }
 0x1fd   : > { %8381 = vst [vmem:[#allocation143_spill] sm:$0xff] %v4529_v8  ;;  %v404_v5 = vadd.f32 %v403_v7, %v4368_v28  ;;  %2534 = vperm.xlu2 %3721, %v4533_v15   ;;  %v4536_v4 = vpop.permute.xlu2 %2051  ;;  %2530 = vperm.xlu1 %3720, %v3894_v6   ;;  %v4553_v6 = vld [vmem:[%s3874_s19 + $0x28] sm:$0xff] }
 0x1fe   : > { %8382 = vst [vmem:[#allocation144_spill] sm:$0xff] %v4536_v4 }
 0x1ff   : > { %v4539_v2 = vmax.f32 %v404_v5, 0.0  ;;  %8387 = vst [vmem:[#allocation149_spill] sm:$0xff] %v4553_v6 }
 0x200   : > { %2731 = vperm.xlu0 %3741, %v3922_v12  }
 0x201   : > { %8383 = vst [vmem:[#allocation145_spill] sm:$0xff] %v4539_v2  ;;  %3642 = vmatmul.msk.f32.gmra.mxu2 %vm434_vm1, %v4539_v2 }
 0x204   : > { %v4546_v8 = vpop.permute.xlu1 %2023  ;;  %v406_v7 = vpop.f32.mrf.mxu1 }
 0x205   : > { %8385 = vst [vmem:[#allocation147_spill] sm:$0xff] %v4546_v8  ;;  %v407_v13 = vadd.f32 %v406_v7, %v4368_v28  ;;  %2542 = vperm.xlu2 %3721, %v3911_v10   ;;  %v4550_v4 = vpop.permute.xlu2 %2172  ;;  %2538 = vperm.xlu1 %3720, %v4553_v6   ;;  %v4568_v8 = vpop.permute.xlu0 %1866 }
 0x206   : > { %8386 = vst [vmem:[#allocation148_spill] sm:$0xff] %v4550_v4 }
 0x207   : > { %v4556_v12 = vmax.f32 %v407_v13, 0.0  ;;  %8391 = vst [vmem:[#allocation153_spill] sm:$0xff] %v4568_v8  ;;  %v4571_v13 = vld [vmem:[%s3874_s19 + $0x48] sm:$0xff] }
 0x208   : > { %2747 = vperm.xlu0 %3741, %v3933_v14   ;;  %8392 = vst [vmem:[#allocation154_spill] sm:$0xff] %v4571_v13  ;;  %v4575_v14 = vld [vmem:[%s3874_s19 + $0x40] sm:$0xff] }
 0x209   : > { %8388 = vst [vmem:[#allocation150_spill] sm:$0xff] %v4556_v12  ;;  %3643 = vmatmul.msk.f32.gmra.mxu2 %vm434_vm1, %v4556_v12 }
 0x20c   : > { %v4561_v5 = vpop.permute.xlu1 %2035  ;;  %v409_v7 = vpop.f32.mrf.mxu1 }
 0x20d   : > { %8389 = vst [vmem:[#allocation151_spill] sm:$0xff] %v4561_v5  ;;  %v410_v10 = vadd.f32 %v409_v7, %v4368_v28  ;;  %3723 = vset.pattern.permute.xlu2 %v8364_v60  ;;  %v4565_v4 = vpop.permute.xlu2 %2184  ;;  %3722 = vset.pattern.permute.xlu1 %v8364_v60  ;;  %v7953_v7 = vmov 22  }
 0x20e   : > { %8390 = vst [vmem:[#allocation152_spill] sm:$0xff] %v4565_v4  ;;  %2381 = vperm.xlu2 %3723, %v4571_v13   ;;  %2377 = vperm.xlu1 %3722, %v4575_v14   ;;  %v4582_v4 = vld [vmem:[%s3874_s19 + $0x18] sm:$0xff] }
 0x20f   : > { %v4578_v5 = vmax.f32 %v410_v10, 0.0  ;;  %8394 = vst [vmem:[#allocation156_spill] sm:$0xff] %v4582_v4  ;;  %v4594_v10 = vld [vmem:[%s3874_s19 + $0x58] sm:$0xff] }
 0x210   : > { %3747 = vset.pattern.permute.xlu0 %v7953_v7 }
 0x211   : > { %8393 = vst [vmem:[#allocation155_spill] sm:$0xff] %v4578_v5  ;;  %3049 = vperm.xlu0 %3747, %v4582_v4   ;;  %3644 = vmatmul.msk.f32.gmra.mxu2 %vm434_vm1, %v4578_v5 }
 0x214   : > { %v4587_v8 = vpop.permute.xlu1 %2047  ;;  %v412_v12 = vpop.f32.mrf.mxu1 }
 0x215   : > { %8395 = vst [vmem:[#allocation157_spill] sm:$0xff] %v4587_v8  ;;  %v413_v16 = vadd.f32 %v412_v12, %v4368_v28  ;;  %v4590_v2 = vpop.permute.xlu2 %2192  ;;  %v4603_v8 = vpop.permute.xlu0 %1878 }
 0x216   : > { %8396 = vst [vmem:[#allocation158_spill] sm:$0xff] %v4590_v2  ;;  %3724 = vset.pattern.permute.xlu2 %v8397_v24  ;;  %2389 = vperm.xlu1 %3722, %v4594_v10  }
 0x217   : > { %v4597_v7 = vmax.f32 %v413_v16, 0.0  ;;  %2691 = vperm.xlu2 %3724, %v4600_v44   ;;  %8399 = vst [vmem:[#allocation160_spill] sm:$0xff] %v4603_v8  ;;  %v4621_v8 = vld [vmem:[%s3874_s19 + $0x8] sm:$0xff] }
 0x219   : > { %8398 = vst [vmem:[#allocation159_spill] sm:$0xff] %v4597_v7  ;;  %3081 = vperm.xlu0 %3747, %v4594_v10   ;;  %3645 = vmatmul.msk.f32.gmra.mxu2 %vm434_vm1, %v4597_v7  ;;  %v4625_v7 = vld [vmem:[%s3874_s19 + $0x68] sm:$0xff] }
 0x21a   : > { %8403 = vst [vmem:[#allocation164_spill] sm:$0xff] %v4625_v7 }
 0x21c   : > { %v415_v12 = vpop.f32.mrf.mxu1  ;;  %v4608_v2 = vpop.permute.xlu1 %2059 }
 0x21d   : > { %8400 = vst [vmem:[#allocation161_spill] sm:$0xff] %v4608_v2  ;;  %v416_v5 = vadd.f32 %v415_v12, %v4368_v28  ;;  %v4611_v58 = vpop.permute.xlu2 %2204  ;;  %v4630_v28 = vpop.permute.xlu0 %1999 }
 0x21e   : > { %8401 = vst [vmem:[#allocation162_spill] sm:$0xff] %v4611_v58  ;;  %3725 = vset.pattern.permute.xlu1 %v8397_v24  ;;  %v7974_v58 = vmov 23  }
 0x21f   : > { %v4614_v16 = vmax.f32 %v416_v5, 0.0  ;;  %2699 = vperm.xlu2 %3724, %v4617_v11   ;;  %2695 = vperm.xlu1 %3725, %v4621_v8   ;;  %8404 = vst [vmem:[#allocation165_spill] sm:$0xff] %v4630_v28 }
 0x221   : > { %8402 = vst [vmem:[#allocation163_spill] sm:$0xff] %v4614_v16  ;;  %3089 = vperm.xlu0 %3747, %v4625_v7   ;;  %3646 = vmatmul.msk.f32.gmra.mxu2 %vm434_vm1, %v4614_v16 }
 0x225   : > { %v4632_v5 = vpop.permute.xlu2 %2216  ;;  %v4634_v12 = vpop.permute.xlu1 %2180 }
 0x226   : > { %8405 = vst [vmem:[#allocation166_spill] sm:$0xff] %v4632_v5  ;;  %v4640_v2 = vpop.permute.xlu0 %2019  ;;  %v4649_v5 = vld [vmem:[%s3874_s19 + $0x38] sm:$0xff] }
 0x227   : > { %8406 = vst [vmem:[#allocation167_spill] sm:$0xff] %v4634_v12  ;;  %2711 = vperm.xlu2 %3724, %v4553_v6   ;;  %2707 = vperm.xlu1 %3725, %v4533_v15   ;;  %v4653_v12 = vld [vmem:[%s3874_s19 + $0x30] sm:$0xff] }
 0x228   : > { %8407 = vst [vmem:[#allocation168_spill] sm:$0xff] %v4640_v2 }
 0x229   : > { %3755 = vset.pattern.permute.xlu0 %v7974_v58 }
 0x22a   : > { %3218 = vperm.xlu0 %3755, %v4617_v11  }
 0x22c   : > { %v4642_v48 = vpop.f32.mrf.mxu2 }
 0x22d   : > { %8408 = vst [vmem:[#allocation169_spill] sm:$0xff] %v4642_v48  ;;  %v4644_v16 = vpop.permute.xlu2 %2228  ;;  %v4646_v21 = vpop.permute.xlu1 %2188 }
 0x22e   : > { %8409 = vst [vmem:[#allocation170_spill] sm:$0xff] %v4644_v16  ;;  %v4661_v48 = vpop.permute.xlu0 %2031 }
 0x22f   : > { %8410 = vst [vmem:[#allocation171_spill] sm:$0xff] %v4646_v21  ;;  %2719 = vperm.xlu2 %3724, %v4649_v5   ;;  %2715 = vperm.xlu1 %3725, %v4653_v12   ;;  %v4668_v21 = vld [vmem:[%s3874_s19 + $0x50] sm:$0xff] }
 0x230   : > { %8413 = vst [vmem:[#allocation174_spill] sm:$0xff] %v4661_v48 }
 0x231   : > { %8415 = vst [vmem:[#allocation176_spill] sm:$0xff] %v4668_v21 }
 0x232   : > { %3238 = vperm.xlu0 %3755, %v4649_v5  }
 0x234   : > { %v4657_v58 = vpop.f32.mrf.mxu2 }
 0x235   : > { %8411 = vst [vmem:[#allocation172_spill] sm:$0xff] %v4657_v58  ;;  %v4659_v9 = vpop.permute.xlu1 %2200 }
 0x236   : > { %8412 = vst [vmem:[#allocation173_spill] sm:$0xff] %v4659_v9  ;;  %v4663_v16 = vpop.permute.xlu2 %2349  ;;  %v4679_v48 = vpop.permute.xlu0 %2043 }
 0x237   : > { %8414 = vst [vmem:[#allocation175_spill] sm:$0xff] %v4663_v16  ;;  %3727 = vset.pattern.permute.xlu2 %v8376_v47  ;;  %3726 = vset.pattern.permute.xlu1 %v8376_v47  ;;  %v8420_v16 = vmov 21  }
 0x238   : > { %2558 = vperm.xlu2 %3727, %v4668_v21   ;;  %2554 = vperm.xlu1 %3726, %v4571_v13   ;;  %8419 = vst [vmem:[#allocation180_spill] sm:$0xff] %v4679_v48 }
 0x23a   : > { %3242 = vperm.xlu0 %3755, %v4575_v14  }
 0x23c   : > { %v4673_v58 = vpop.f32.mrf.mxu2 }
 0x23d   : > { %8416 = vst [vmem:[#allocation177_spill] sm:$0xff] %v4673_v58  ;;  %v4675_v9 = vpop.permute.xlu1 %2212 }
 0x23e   : > { %8417 = vst [vmem:[#allocation178_spill] sm:$0xff] %v4675_v9  ;;  %v4677_v2 = vpop.permute.xlu2 %2361 }
 0x23f   : > { %8418 = vst [vmem:[#allocation179_spill] sm:$0xff] %v4677_v2  ;;  %v4697_v2 = vpop.permute.xlu0 %2055 }
 0x240   : > { %3728 = vset.pattern.permute.xlu2 %v8420_v16  ;;  %2562 = vperm.xlu1 %3726, %v4594_v10   ;;  %8425 = vst [vmem:[#allocation185_spill] sm:$0xff] %v4697_v2 }
 0x241   : > { %2864 = vperm.xlu2 %3728, %v4600_v44  }
 0x242   : > { %3266 = vperm.xlu0 %3755, %v4685_v32  }
 0x244   : > { %v4688_v26 = vpop.f32.mrf.mxu2 }
 0x245   : > { %8422 = vst [vmem:[#allocation182_spill] sm:$0xff] %v4688_v26  ;;  %v4690_v63 = vpop.permute.xlu1 %2224 }
 0x246   : > { %8423 = vst [vmem:[#allocation183_spill] sm:$0xff] %v4690_v63  ;;  %v4692_v58 = vpop.permute.xlu2 %2369 }
 0x247   : > { %8424 = vst [vmem:[#allocation184_spill] sm:$0xff] %v4692_v58  ;;  %v4707_v58 = vpop.permute.xlu0 %2176 }
 0x248   : > { %3729 = vset.pattern.permute.xlu1 %v8420_v16  ;;  %8429 = vst [vmem:[#allocation189_spill] sm:$0xff] %v4707_v58 }
 0x249   : > { %2876 = vperm.xlu2 %3728, %v4582_v4   ;;  %2872 = vperm.xlu1 %3729, %v4617_v11  }
 0x24c   : > { %v4699_v9 = vpop.f32.mrf.mxu2 }
 0x24d   : > { %8426 = vst [vmem:[#allocation186_spill] sm:$0xff] %v4699_v9 }
 0x24e   : > { %v4701_v48 = vpop.permute.xlu1 %2345 }
 0x24f   : > { %8427 = vst [vmem:[#allocation187_spill] sm:$0xff] %v4701_v48  ;;  %v4703_v50 = vpop.permute.xlu2 %2522  ;;  %v4718_v48 = vld [vmem:[%s3874_s19 + $0x60] sm:$0xff]  ;;  %v4723_v2 = vpop.permute.xlu0 %2196 }
 0x250   : > { %8428 = vst [vmem:[#allocation188_spill] sm:$0xff] %v4703_v50 }
 0x251   : > { %2884 = vperm.xlu2 %3728, %v4553_v6   ;;  %2880 = vperm.xlu1 %3729, %v4533_v15   ;;  %8433 = vst [vmem:[#allocation193_spill] sm:$0xff] %v4718_v48 }
 0x252   : > { %8435 = vst [vmem:[#allocation195_spill] sm:$0xff] %v4723_v2 }
 0x254   : > { %v4709_v63 = vpop.f32.mrf.mxu2 }
 0x255   : > { %8430 = vst [vmem:[#allocation190_spill] sm:$0xff] %v4709_v63 }
 0x256   : > { %v4711_v26 = vpop.permute.xlu1 %2357 }
 0x257   : > { %8431 = vst [vmem:[#allocation191_spill] sm:$0xff] %v4711_v26  ;;  %v4713_v4 = vpop.permute.xlu2 %2534  ;;  %v4731_v26 = vld [vmem:[%s3874_s19 + $0x78] sm:$0xff] }
 0x258   : > { %8432 = vst [vmem:[#allocation192_spill] sm:$0xff] %v4713_v4 }
 0x259   : > { %3730 = vset.pattern.permute.xlu2 %v8364_v60  ;;  %2892 = vperm.xlu1 %3729, %v4649_v5   ;;  %8438 = vst [vmem:[#allocation198_spill] sm:$0xff] %v4731_v26 }
 0x25a   : > { %2393 = vperm.xlu2 %3730, %v4718_v48   ;;  %v4739_v48 = vpop.permute.xlu0 %2208 }
 0x25b   : > { %8440 = vst [vmem:[#allocation200_spill] sm:$0xff] %v4739_v48 }
 0x25c   : > { %v4721_v50 = vpop.f32.mrf.mxu2 }
 0x25d   : > { %8434 = vst [vmem:[#allocation194_spill] sm:$0xff] %v4721_v50 }
 0x25e   : > { %v4725_v9 = vpop.permute.xlu1 %2365 }
 0x25f   : > { %8436 = vst [vmem:[#allocation196_spill] sm:$0xff] %v4725_v9  ;;  %v4727_v58 = vpop.permute.xlu2 %2542 }
 0x260   : > { %8437 = vst [vmem:[#allocation197_spill] sm:$0xff] %v4727_v58 }
 0x261   : > { %3732 = vset.pattern.permute.xlu1 %v8364_v60 }
 0x262   : > { %2405 = vperm.xlu2 %3730, %v4731_v26   ;;  %2401 = vperm.xlu1 %3732, %v4685_v32   ;;  %v4753_v2 = vpop.permute.xlu0 %2220 }
 0x263   : > { %8444 = vst [vmem:[#allocation204_spill] sm:$0xff] %v4753_v2 }
 0x264   : > { %v4735_v4 = vpop.f32.mrf.mxu2 }
 0x267   : > { %v4737_v63 = vpop.permute.xlu1 %2518 }
 0x268   : > { %8439 = vst [vmem:[#allocation199_spill] sm:$0xff] %v4737_v63  ;;  %v4741_v50 = vpop.permute.xlu2 %2381  ;;  %v8445_v63 = vmov 22  }
 0x269   : > { %8441 = vst [vmem:[#allocation201_spill] sm:$0xff] %v4741_v50 }
 0x26a   : > { %3734 = vset.pattern.permute.xlu2 %v8397_v24  ;;  %3733 = vset.pattern.permute.xlu1 %v8397_v24  ;;  %v4765_v24 = vpop.permute.xlu0 %2232 }
 0x26b   : > { %2727 = vperm.xlu2 %3734, %v4571_v13   ;;  %2723 = vperm.xlu1 %3733, %v4575_v14   ;;  %8448 = vst [vmem:[#allocation207_spill] sm:$0xff] %v4765_v24 }
 0x26c   : > { %v4747_v60 = vpop.f32.mrf.mxu2 }
 0x26f   : > { %v4749_v58 = vpop.permute.xlu1 %2530 }
 0x270   : > { %8442 = vst [vmem:[#allocation202_spill] sm:$0xff] %v4749_v58 }
 0x271   : > { %v4751_v9 = vpop.permute.xlu2 %2691 }
 0x272   : > { %8443 = vst [vmem:[#allocation203_spill] sm:$0xff] %v4751_v9 }
 0x273   : > { %3735 = vset.pattern.permute.xlu2 %v8445_v63  ;;  %2735 = vperm.xlu1 %3733, %v4594_v10  }
 0x274   : > { %3037 = vperm.xlu2 %3735, %v4600_v44   ;;  %v4758_v50 = vpop.f32.mrf.mxu2 }
 0x277   : > { %v4760_v48 = vpop.permute.xlu1 %2538 }
 0x278   : > { %8446 = vst [vmem:[#allocation205_spill] sm:$0xff] %v4760_v48 }
 0x279   : > { %v4762_v13 = vpop.permute.xlu2 %2699 }
 0x27a   : > { %8447 = vst [vmem:[#allocation206_spill] sm:$0xff] %v4762_v13  ;;  %v4779_v13 = vpop.permute.xlu0 %2353 }
 0x27b   : > { %3736 = vset.pattern.permute.xlu1 %v8445_v63  ;;  %8451 = vst [vmem:[#allocation210_spill] sm:$0xff] %v4779_v13 }
 0x27c   : > { %3045 = vperm.xlu2 %3735, %v4617_v11   ;;  %3041 = vperm.xlu1 %3736, %v4621_v8   ;;  %v4769_v58 = vpop.f32.mrf.mxu2 }
 0x280   : > { %v4771_v9 = vpop.permute.xlu1 %2377 }
 0x281   : > { %8449 = vst [vmem:[#allocation208_spill] sm:$0xff] %v4771_v9  ;;  %v4773_v2 = vpop.permute.xlu2 %2711 }
 0x282   : > { %8450 = vst [vmem:[#allocation209_spill] sm:$0xff] %v4773_v2  ;;  %v4787_v9 = vpop.permute.xlu0 %2373 }
 0x283   : > { %8454 = vst [vmem:[#allocation213_spill] sm:$0xff] %v4787_v9 }
 0x284   : > { %3057 = vperm.xlu2 %3735, %v4553_v6   ;;  %3053 = vperm.xlu1 %3736, %v4533_v15   ;;  %v4777_v48 = vpop.f32.mrf.mxu2 }
 0x288   : > { %v4781_v63 = vpop.permute.xlu1 %2389 }
 0x289   : > { %8452 = vst [vmem:[#allocation211_spill] sm:$0xff] %v4781_v63  ;;  %v4783_v24 = vpop.permute.xlu2 %2719 }
 0x28a   : > { %8453 = vst [vmem:[#allocation212_spill] sm:$0xff] %v4783_v24 }
 0x28c   : > { %3065 = vperm.xlu2 %3735, %v4649_v5   ;;  %3061 = vperm.xlu1 %3736, %v4653_v12   ;;  %v536_v11 = vpop.f32.mrf.mxu2  ;;  %v4799_v5 = vpop.permute.xlu0 %2385 }
 0x28d   : > { %8458 = vst [vmem:[#allocation217_spill] sm:$0xff] %v4799_v5 }
 0x291   : > { %v4789_v2 = vpop.permute.xlu1 %2695 }
 0x292   : > { %8455 = vst [vmem:[#allocation214_spill] sm:$0xff] %v4789_v2  ;;  %v4791_v6 = vpop.permute.xlu2 %2558  ;;  %v851_v2 = vadd.f32 %v4051_v39, %v4378_v37 }
 0x293   : > { %8456 = vst [vmem:[#allocation215_spill] sm:$0xff] %v4791_v6 }
 0x294   : > { %3739 = vset.pattern.permute.xlu2 %v8376_v47  ;;  %3738 = vset.pattern.permute.xlu1 %v8376_v47  ;;  %v539_v13 = vpop.f32.mrf.mxu2  ;;  %v678_v47 = vadd.f32 %v4040_v36, %v4378_v37  ;;  %v4827_v39 = vsel %vm434_vm1, %v851_v2, -inf  ;;  %v1025_v2 = vadd.f32 %v4113_v0, %v4393_v46 }
 0x295   : > { %2574 = vperm.xlu2 %3739, %v4685_v32   ;;  %2570 = vperm.xlu1 %3738, %v4625_v7   ;;  %v4818_v32 = vpop.permute.xlu0 %2397 }
 0x296   : > { %8462 = vst [vmem:[#allocation221_spill] sm:$0xff] %v4818_v32  ;;  %v4824_v36 = vsel %vm434_vm1, %v678_v47, -inf }
 0x299   : > { %v4797_v63 = vpop.permute.xlu1 %2707 }
 0x29a   : > { %8457 = vst [vmem:[#allocation216_spill] sm:$0xff] %v4797_v63  ;;  %v1024_v63 = vadd.f32 %v4160_v1, %v4378_v37  ;;  %v1543_v1 = vadd.f32 %v4352_v52, %v4378_v37  ;;  %v1371_v52 = vadd.f32 %v4191_v54, %v4393_v46  ;;  %v1199_v54 = vadd.f32 %v4165_v45, %v4408_v49 }
 0x29b   : > { %v4801_v24 = vpop.permute.xlu2 %2864 }
 0x29c   : > { %8459 = vst [vmem:[#allocation218_spill] sm:$0xff] %v4801_v24  ;;  %v542_v9 = vpop.f32.mrf.mxu2  ;;  %v1197_v24 = vadd.f32 %v4133_v35, %v4378_v37  ;;  %v1890_v35 = vadd.f32 %v4389_v51, %v4393_v46  ;;  %v4840_v47 = vsel %vm434_vm1, %v1024_v63, -inf  ;;  %v1198_v51 = vadd.f32 %v4232_v31, %v4393_v46 }
 0x29d   : > { %3740 = vset.pattern.permute.xlu2 %v8420_v16  ;;  %2578 = vperm.xlu1 %3738, %v4731_v26   ;;  %v1544_v63 = vadd.f32 %v4285_v34, %v4393_v46  ;;  %v1026_v31 = vadd.f32 %v4086_v53, %v4408_v49  ;;  %v1372_v53 = vadd.f32 %v4291_v22, %v4408_v49  ;;  %v4891_v45 = vsel %vm434_vm1, %v1371_v52, -inf }
 0x29e   : > { %2896 = vperm.xlu2 %3740, %v4575_v14  }
 0x29f   : > { %v4899_v22 = vsel %vm434_vm1, %v1544_v63, -inf  ;;  %v4916_v63 = vsel %vm434_vm1, %v1199_v54, -inf  ;;  %v682_v54 = vadd.f32 %v3981_v20, %v4437_v3 }
 0x2a0   : > { %8467 = vst [vmem:[#allocation226_spill] sm:$0xff] %v4899_v22  ;;  %v3786_v22 = vld [vmem:[%s4199_s22] sm:$0xff] }
 0x2a1   : > { %v4806_v6 = vpop.permute.xlu1 %2715 }
 0x2a2   : > { %8460 = vst [vmem:[#allocation219_spill] sm:$0xff] %v4806_v6  ;;  %v1370_v6 = vadd.f32 %v4227_v62, %v4378_v37  ;;  %v679_v62 = vadd.f32 %v4055_v41, %v4393_v46  ;;  %v680_v41 = vadd.f32 %v4002_v23, %v4408_v49  ;;  %v4867_v23 = vsel %vm434_vm1, %v1543_v1, -inf }
 0x2a3   : > { %v4814_v5 = vpop.permute.xlu2 %2876  ;;  %8463 = vst [vmem:[#allocation222_spill] sm:$0xff] %v4867_v23  ;;  %v4885_v1 = vsel %vm434_vm1, %v1025_v2, -inf }
 0x2a4   : > { %8461 = vst [vmem:[#allocation220_spill] sm:$0xff] %v4814_v5  ;;  %v545_v26 = vpop.f32.mrf.mxu2 }
 0x2a5   : > { %3742 = vset.pattern.permute.xlu1 %v8420_v16  ;;  %549 = vmatpush.msra.mxu3 %v545_v26  ;;  %v852_v26 = vadd.f32 %v4024_v30, %v4393_v46  ;;  %v4854_v30 = vsel %vm434_vm1, %v1370_v6, -inf  ;;  %v4870_v6 = vsel %vm434_vm1, %v1890_v35, -inf  ;;  %v4888_v35 = vsel %vm434_vm1, %v1198_v51, -inf  ;;  %v8509_v16 = vld [vmem:[#allocation21_spill] sm:$0xff] }
 0x2a6   : > { %2908 = vperm.xlu2 %3740, %v4594_v10   ;;  %2904 = vperm.xlu1 %3742, %v4668_v21   ;;  %v4847_v10 = vsel %vm434_vm1, %v1197_v24, -inf  ;;  %v853_v24 = vadd.f32 %v4117_v19, %v4408_v49  ;;  %8464 = vst [vmem:[#allocation223_spill] sm:$0xff] %v4870_v6  ;;  %v2062_v51 = vadd.f32 %v4630_v28, %v4378_v37  ;;  %v8511_v21 = vld [vmem:[#allocation39_spill] sm:$0xff] }
 0x2a7   : > { %550 = vmatpush.msra.mxu3 %v542_v9  ;;  %v1716_v9 = vadd.f32 %v4308_v61, %v4378_v37  ;;  %v4875_v61 = vsel %vm434_vm1, %v679_v62, -inf  ;;  %v1545_v62 = vadd.f32 %v4259_v40, %v4408_v49  ;;  %v4918_v40 = vpop.permute.xlu0 %2526  ;;  %v855_v28 = vadd.f32 %v4033_v33, %v4437_v3 }
 0x2a8   : > { %v4910_v52 = vsel %vm434_vm1, %v853_v24, -inf  ;;  %8469 = vst [vmem:[#allocation228_spill] sm:$0xff] %v4918_v40  ;;  %v1027_v24 = vadd.f32 %v4122_v27, %v4423_v38  ;;  %v4953_v33 = vsel %vm434_vm1, %v2062_v51, -inf }
 0x2a9   : > { %551 = vmatpush.msra.mxu3 %v539_v13  ;;  %v4878_v13 = vsel %vm434_vm1, %v852_v26, -inf  ;;  %v4896_v26 = vsel %vm434_vm1, %v680_v41, -inf  ;;  %v4904_v2 = vsel %vm434_vm1, %v1716_v9, -inf  ;;  %v4913_v41 = vsel %vm434_vm1, %v1026_v31, -inf }
 0x2aa   : > { %v4872_v34 = vpop.permute.xlu1 %2554  ;;  %8468 = vst [vmem:[#allocation227_spill] sm:$0xff] %v4904_v2  ;;  %v681_v9 = vadd.f32 %v4011_v25, %v4423_v38  ;;  %v4929_v31 = vsel %vm434_vm1, %v1372_v53, -inf  ;;  %v1200_v25 = vadd.f32 %v4142_v56, %v4423_v38  ;;  %v1373_v53 = vadd.f32 %v4237_v18, %v4423_v38 }
 0x2ab   : > { %8465 = vst [vmem:[#allocation224_spill] sm:$0xff] %v4872_v34  ;;  %v4882_v19 = vpop.permute.xlu2 %2884  ;;  %552 = vmatpush.msra.mxu3 %v536_v11  ;;  %v1717_v11 = vadd.f32 %v4435_v17, %v4393_v46  ;;  %v8470_v17 = vmov 23   ;;  %v1201_v18 = vadd.f32 %v4175_v55, %v4437_v3  ;;  %v4971_v51 = vsel %vm434_vm1, %v1027_v24, -inf }
 0x2ac   : > { %8466 = vst [vmem:[#allocation225_spill] sm:$0xff] %v4882_v19  ;;  %v4979_v55 = vsel %vm434_vm1, %v855_v28, -inf  ;;  %v4990_v24 = vsel %vm434_vm1, %v1373_v53, -inf  ;;  %v8484_v19 = vld [vmem:[#allocation3_spill] sm:$0xff] }
 0x2ad   : > { %553 = vmatpush.msra.mxu3 %v4777_v48  ;;  %v854_v48 = vadd.f32 %v4062_v43, %v4423_v38  ;;  %v4940_v43 = vsel %vm434_vm1, %v1545_v62, -inf  ;;  %v4950_v20 = vsel %vm434_vm1, %v1717_v11, -inf  ;;  %v1889_v62 = vadd.f32 %v4429_v42, %v4378_v37  ;;  %8474 = vst [vmem:[#allocation232_spill] sm:$0xff] %v4971_v51  ;;  %v8475_v42 = vld [vmem:[#allocation60_spill] sm:$0xff]  ;;  %v8498_v37 = vld [vmem:[#allocation190_spill] sm:$0xff] }
 0x2ae   : > { %3744 = vset.pattern.permute.xlu2 %v8470_v17  ;;  %3743 = vset.pattern.permute.xlu1 %v8470_v17  ;;  %8471 = vst [vmem:[#allocation229_spill] sm:$0xff] %v4940_v43  ;;  %v1374_v56 = vadd.f32 %v8475_v42, %v4437_v3  ;;  %v5009_v53 = vsel %vm434_vm1, %v1201_v18, -inf  ;;  %v8486_v18 = vld [vmem:[#allocation22_spill] sm:$0xff] }
 0x2af   : > { %3214 = vperm.xlu2 %3744, %v4621_v8   ;;  %3210 = vperm.xlu1 %3743, %v4600_v44   ;;  %v1546_v8 = vadd.f32 %v4295_v59, %v4423_v38  ;;  %v1718_v44 = vadd.f32 %v4356_v29, %v4408_v49  ;;  %8472 = vst [vmem:[#allocation230_spill] sm:$0xff] %v4950_v20  ;;  %v4965_v29 = vsel %vm434_vm1, %v681_v9, -inf  ;;  %v4968_v11 = vsel %vm434_vm1, %v854_v48, -inf  ;;  %v8477_v9 = vld [vmem:[#allocation77_spill] sm:$0xff] }
 0x2b0   : > { %554 = vmatpush.msra.mxu3 %v4769_v58  ;;  %v1028_v58 = vadd.f32 %v4097_v57, %v4437_v3  ;;  %v4976_v57 = vsel %vm434_vm1, %v682_v54, -inf  ;;  %v1547_v27 = vadd.f32 %v8477_v9, %v4437_v3  ;;  %8479 = vst [vmem:[#allocation235_spill] sm:$0xff] %v4990_v24  ;;  %v8480_v54 = vld [vmem:[#allocation91_spill] sm:$0xff]  ;;  %v8482_v9 = vld [vmem:[#allocation120_spill] sm:$0xff]  ;;  %v5019_v34 = vsel %vm434_vm1, %v1374_v56, -inf }
 0x2b1   : > { %v4993_v42 = vsel %vm434_vm1, %v1546_v8, -inf  ;;  %v1719_v28 = vadd.f32 %v8480_v54, %v4423_v38  ;;  %v4998_v0 = vsel %vm434_vm1, %v1718_v44, -inf  ;;  %v8483_v8 = vld [vmem:[#allocation122_spill] sm:$0xff] }
 0x2b2   : > { %555 = vmatpush.msra.mxu3 %v4758_v50  ;;  %v4962_v59 = vpop.permute.xlu1 %2562  ;;  %v4982_v50 = vsel %vm434_vm1, %v1200_v25, -inf  ;;  %v5001_v25 = vsel %vm434_vm1, %v1889_v62, -inf  ;;  %v683_v54 = vadd.f32 %v8484_v19, %v8483_v8  ;;  %v8488_v19 = vld [vmem:[#allocation46_spill] sm:$0xff]  ;;  %v5030_v44 = vsel %vm434_vm1, %v1547_v27, -inf  ;;  %v8490_v62 = vld [vmem:[#allocation124_spill] sm:$0xff] }
 0x2b3   : > { %8473 = vst [vmem:[#allocation231_spill] sm:$0xff] %v4962_v59  ;;  %v5006_v59 = vsel %vm434_vm1, %v1028_v58, -inf  ;;  %v8485_v58 = vld [vmem:[#allocation156_spill] sm:$0xff]  ;;  %v1894_v56 = vadd.f32 %v8490_v62, %v8483_v8 }
 0x2b4   : > { %8476 = vst [vmem:[#allocation233_spill] sm:$0xff] %v4982_v50  ;;  %556 = vmatpush.msra.mxu3 %v4747_v60  ;;  %v4987_v48 = vpop.permute.xlu2 %2393  ;;  %v1892_v60 = vadd.f32 %v8482_v9, %v4423_v38  ;;  %v856_v9 = vadd.f32 %v8486_v18, %v8483_v8  ;;  %v8494_v18 = vld [vmem:[#allocation100_spill] sm:$0xff]  ;;  %v5067_v62 = vsel %vm434_vm1, %v683_v54, -inf  ;;  %v8510_v38 = vld [vmem:[#allocation15_spill] sm:$0xff] }
 0x2b5   : > { %8478 = vst [vmem:[#allocation234_spill] sm:$0xff] %v4987_v48  ;;  %v1202_v48 = vadd.f32 %v8488_v19, %v8483_v8  ;;  %v1548_v32 = vadd.f32 %v8494_v18, %v8483_v8  ;;  %v8500_v18 = vld [vmem:[#allocation142_spill] sm:$0xff] }
 0x2b6   : > { %8481 = vst [vmem:[#allocation236_spill] sm:$0xff] %v5001_v25  ;;  %557 = vmatpush.msra.mxu3 %v4735_v4  ;;  %v8487_v4 = vld [vmem:[#allocation52_spill] sm:$0xff]  ;;  %v5034_v25 = vpop.permute.xlu0 %2546  ;;  %v5044_v19 = vsel %vm434_vm1, %v1892_v60, -inf  ;;  %v5058_v60 = vsel %vm434_vm1, %v1719_v28, -inf  ;;  %v5062_v27 = vadd.f32 %v8500_v18, %v4408_v49  ;;  %v5079_v28 = vsel %vm434_vm1, %v1894_v56, -inf }
 0x2b7   : > { %3226 = vperm.xlu2 %3744, %v4533_v15   ;;  %3222 = vperm.xlu1 %3743, %v8485_v58   ;;  %v1029_v5 = vadd.f32 %v8487_v4, %v8483_v8  ;;  %8489 = vst [vmem:[#allocation156_spill] sm:$0xff] %v5030_v44  ;;  %v8492_v15 = vld [vmem:[#allocation194_spill] sm:$0xff]  ;;  %v8495_v4 = vld [vmem:[#allocation101_spill] sm:$0xff]  ;;  %v5088_v54 = vsel %vm434_vm1, %v1548_v32, -inf  ;;  %v8515_v44 = vld [vmem:[#allocation87_spill] sm:$0xff] }
 0x2b8   : > { %8491 = vst [vmem:[#allocation237_spill] sm:$0xff] %v5034_v25  ;;  %558 = vmatpush.msra.mxu3 %v8492_v15  ;;  %v8493_v58 = vld [vmem:[#allocation70_spill] sm:$0xff]  ;;  %v1720_v17 = vadd.f32 %v8495_v4, %v4437_v3  ;;  %v5070_v15 = vsel %vm434_vm1, %v856_v9, -inf  ;;  %v5076_v4 = vsel %vm434_vm1, %v1202_v48, -inf }
 0x2b9   : > { %v1375_v40 = vadd.f32 %v8493_v58, %v8483_v8  ;;  %8496 = vst [vmem:[#allocation194_spill] sm:$0xff] %v5044_v19  ;;  %v8497_v58 = vld [vmem:[#allocation168_spill] sm:$0xff] }
 0x2ba   : > { %v2067_v25 = vadd.f32 %v8497_v58, %v8483_v8  ;;  %559 = vmatpush.msra.mxu3 %v8498_v37  ;;  %8499 = vst [vmem:[#allocation190_spill] sm:$0xff] %v5058_v60  ;;  %v5073_v37 = vsel %vm434_vm1, %v1029_v5, -inf  ;;  %v8504_v58 = vld [vmem:[#allocation186_spill] sm:$0xff]  ;;  %v5091_v9 = vsel %vm434_vm1, %v1720_v17, -inf  ;;  %v8517_v17 = vld [vmem:[#allocation93_spill] sm:$0xff] }
 0x2bb   : > { %8501 = vst [vmem:[#allocation238_spill] sm:$0xff] %v5062_v27  ;;  %v5064_v19 = vpop.permute.xlu1 %2872  ;;  %v8508_v5 = vld [vmem:[#allocation126_spill] sm:$0xff] }
 0x2bc   : > { %8502 = vst [vmem:[#allocation239_spill] sm:$0xff] %v5064_v19  ;;  %560 = vmatpush.msra.mxu3 %v8504_v58  ;;  %v5082_v18 = vpop.permute.xlu2 %2405  ;;  %v5085_v19 = vsel %vm434_vm1, %v1375_v40, -inf  ;;  %v684_v48 = vadd.f32 %v8509_v16, %v8508_v5  ;;  %v857_v56 = vadd.f32 %v8510_v38, %v8508_v5  ;;  %v1030_v58 = vadd.f32 %v8511_v21, %v8508_v5  ;;  %v8513_v40 = vld [vmem:[#allocation182_spill] sm:$0xff] }
 0x2bd   : > { %8503 = vst [vmem:[#allocation240_spill] sm:$0xff] %v5079_v28  ;;  %v8514_v60 = vld [vmem:[#allocation62_spill] sm:$0xff]  ;;  %v1549_v38 = vadd.f32 %v8515_v44, %v8508_v5  ;;  %v5111_v23 = vsel %vm434_vm1, %v2067_v25, -inf  ;;  %v1721_v21 = vadd.f32 %v8517_v17, %v8483_v8  ;;  %v8518_v44 = vld [vmem:[#allocation177_spill] sm:$0xff] }
 0x2be   : > { %8505 = vst [vmem:[#allocation186_spill] sm:$0xff] %v5082_v18  ;;  %v8512_v18 = vld [vmem:[#allocation69_spill] sm:$0xff]  ;;  %561 = vmatpush.msra.mxu3 %v8513_v40  ;;  %v1376_v16 = vadd.f32 %v8514_v60, %v8508_v5  ;;  %v5131_v40 = vsel %vm434_vm1, %v684_v48, -inf  ;;  %v5134_v32 = vsel %vm434_vm1, %v857_v56, -inf  ;;  %v5137_v17 = vsel %vm434_vm1, %v1030_v58, -inf  ;;  %v5144_v28 = vpop.permute.xlu0 %2550 }
 0x2bf   : > { %8506 = vst [vmem:[#allocation241_spill] sm:$0xff] %v5088_v54  ;;  %v1203_v27 = vadd.f32 %v8512_v18, %v8508_v5  ;;  %3234 = vperm.xlu2 %3744, %v4653_v12   ;;  %v8516_v18 = vld [vmem:[#allocation149_spill] sm:$0xff]  ;;  %v8522_v12 = vld [vmem:[#allocation172_spill] sm:$0xff]  ;;  %v5153_v58 = vsel %vm434_vm1, %v1549_v38, -inf  ;;  %v5164_v2 = vsel %vm434_vm1, %v1721_v21, -inf }
 0x2c0   : > { %8507 = vst [vmem:[#allocation242_spill] sm:$0xff] %v5091_v9  ;;  %3230 = vperm.xlu1 %3743, %v8516_v18   ;;  %562 = vmatpush.msra.mxu3 %v8518_v44  ;;  %v8520_v60 = vld [vmem:[#allocation129_spill] sm:$0xff]  ;;  %v8523_v18 = vld [vmem:[#allocation130_spill] sm:$0xff]  ;;  %v5150_v56 = vsel %vm434_vm1, %v1376_v16, -inf  ;;  %v8533_v54 = vld [vmem:[#allocation132_spill] sm:$0xff] }
 0x2c1   : > { %8519 = vst [vmem:[#allocation182_spill] sm:$0xff] %v5134_v32  ;;  %v5140_v44 = vsel %vm434_vm1, %v1203_v27, -inf  ;;  %v2064_v25 = vadd.f32 %v8520_v60, %v4408_v49  ;;  %v8524_v48 = vld [vmem:[#allocation9_spill] sm:$0xff]  ;;  %v8527_v27 = vld [vmem:[#allocation38_spill] sm:$0xff]  ;;  %v8528_v60 = vld [vmem:[#allocation32_spill] sm:$0xff] }
 0x2c2   : > { %8521 = vst [vmem:[#allocation149_spill] sm:$0xff] %v5144_v28  ;;  %563 = vmatpush.msra.mxu3 %v8522_v12  ;;  %v685_v6 = vadd.f32 %v8524_v48, %v8523_v18  ;;  %v858_v9 = vadd.f32 %v8527_v27, %v8523_v18  ;;  %v1031_v28 = vadd.f32 %v8528_v60, %v8523_v18  ;;  %v8529_v49 = vld [vmem:[#allocation56_spill] sm:$0xff]  ;;  %v8531_v48 = vld [vmem:[#allocation169_spill] sm:$0xff]  ;;  %v8535_v16 = vld [vmem:[#allocation123_spill] sm:$0xff] }
 0x2c3   : > { %8525 = vst [vmem:[#allocation177_spill] sm:$0xff] %v5153_v58  ;;  %v5155_v8 = vpop.permute.xlu1 %2880  ;;  %v1204_v12 = vadd.f32 %v8529_v49, %v8523_v18  ;;  %v2066_v49 = vadd.f32 %v8533_v54, %v4437_v3  ;;  %v1722_v32 = vadd.f32 %v8535_v16, %v8508_v5  ;;  %v5187_v27 = vsel %vm434_vm1, %v2064_v25, -inf  ;;  %v8545_v54 = vld [vmem:[#allocation193_spill] sm:$0xff] }
 0x2c4   : > { %8526 = vst [vmem:[#allocation172_spill] sm:$0xff] %v5155_v8  ;;  %564 = vmatpush.msra.mxu3 %v8531_v48  ;;  %v8532_v8 = vld [vmem:[#allocation86_spill] sm:$0xff]  ;;  %v5199_v38 = vsel %vm434_vm1, %v858_v9, -inf  ;;  %v5202_v48 = vsel %vm434_vm1, %v1031_v28, -inf }
 0x2c5   : > { %8530 = vst [vmem:[#allocation130_spill] sm:$0xff] %v5164_v2  ;;  %v1377_v60 = vadd.f32 %v8532_v8, %v8523_v18  ;;  %565 = vmatmul.f32.vlgmr.msra.gmra.mxu3 %v3786_v22  ;;  %v5178_v21 = vpop.permute.xlu2 %2727  ;;  %v5190_v8 = vsel %vm434_vm1, %v685_v6, -inf  ;;  %v5205_v25 = vsel %vm434_vm1, %v1204_v12, -inf  ;;  %v8542_v6 = vld [vmem:[#allocation79_spill] sm:$0xff]  ;;  %v8543_v22 = vld [vmem:[#allocation134_spill] sm:$0xff]  ;;  %v2082_v20 = vsel %vm434_vm1, %v2066_v49, -inf }
 0x2c6   : > { %8534 = vst [vmem:[#allocation169_spill] sm:$0xff] %v5178_v21  ;;  %v8538_v21 = vmov 20   ;;  %v1550_v16 = vadd.f32 %v8542_v6, %v8523_v18  ;;  %v8548_v28 = vld [vmem:[#allocation110_spill] sm:$0xff] }
 0x2c7   : > { %8536 = vst [vmem:[#allocation243_spill] sm:$0xff] %v5187_v27  ;;  %3746 = vset.pattern.permute.xlu2 %v8538_v21  ;;  %v8544_v27 = vld [vmem:[#allocation174_spill] sm:$0xff]  ;;  %v5216_v2 = vsel %vm434_vm1, %v1377_v60, -inf  ;;  %v5220_v12 = vadd.f32 %v8548_v28, %v4437_v3  ;;  %v8551_v28 = vld [vmem:[#allocation48_spill] sm:$0xff] }
 0x2c8   : > { %8537 = vst [vmem:[#allocation244_spill] sm:$0xff] %v5190_v8  ;;  %3745 = vset.pattern.permute.xlu1 %v8538_v21  ;;  %v2070_v58 = vadd.f32 %v8544_v27, %v8543_v22  ;;  %2743 = vperm.xlu2 %3746, %v4625_v7   ;;  %v8546_v21 = vld [vmem:[#allocation4_spill] sm:$0xff]  ;;  %v8549_v27 = vld [vmem:[#allocation25_spill] sm:$0xff]  ;;  %v1205_v3 = vadd.f32 %v8551_v28, %v8543_v22  ;;  %v5242_v8 = vsel %vm434_vm1, %v1550_v16, -inf }
 0x2c9   : > { %8539 = vst [vmem:[#allocation245_spill] sm:$0xff] %v5199_v38  ;;  %2739 = vperm.xlu1 %3745, %v8545_v54   ;;  %v686_v9 = vadd.f32 %v8546_v21, %v8543_v22  ;;  %v859_v43 = vadd.f32 %v8549_v27, %v8543_v22  ;;  %v8550_v54 = vld [vmem:[#allocation55_spill] sm:$0xff]  ;;  %v5247_v38 = vsel %vm434_vm1, %v1722_v32, -inf  ;;  %v2083_v21 = vmax.f32 %v4953_v33, %v2082_v20  ;;  %v8555_v28 = vld [vmem:[#allocation189_spill] sm:$0xff]  ;;  %v8558_v20 = vld [vmem:[#allocation104_spill] sm:$0xff] }
 0x2ca   : > { %8540 = vst [vmem:[#allocation246_spill] sm:$0xff] %v5202_v48  ;;  %v1032_v7 = vadd.f32 %v8550_v54, %v8543_v22  ;;  %v8554_v54 = vld [vmem:[#allocation105_spill] sm:$0xff]  ;;  %v2236_v48 = vadd.f32 %v8555_v28, %v4393_v46  ;;  %v2090_v49 = vsel %vm434_vm1, %v2070_v58, -inf  ;;  %v1551_v33 = vadd.f32 %v8558_v20, %v8543_v22  ;;  %v8560_v28 = vld [vmem:[#allocation138_spill] sm:$0xff]  ;;  %v8561_v58 = vld [vmem:[#allocation24_spill] sm:$0xff] }
 0x2cb   : > { %8541 = vst [vmem:[#allocation247_spill] sm:$0xff] %v5205_v25  ;;  %v5237_v6 = vpop.permute.xlu1 %2892  ;;  %v1723_v60 = vadd.f32 %v8554_v54, %v8523_v18  ;;  %v706_v27 = vsel %vm434_vm1, %v686_v9, -inf  ;;  %v879_v16 = vsel %vm434_vm1, %v859_v43, -inf  ;;  %v8557_v32 = vld [vmem:[#allocation73_spill] sm:$0xff]  ;;  %v687_v50 = vadd.f32 %v8561_v58, %v8560_v28  ;;  %v8564_v58 = vld [vmem:[#allocation42_spill] sm:$0xff] }
 0x2cc   : > { %8547 = vst [vmem:[#allocation248_spill] sm:$0xff] %v5216_v2  ;;  %v3787_v2 = vld [vmem:[%s4199_s22 + $0x8] sm:$0xff]  ;;  %v1052_v54 = vsel %vm434_vm1, %v1032_v7, -inf  ;;  %v1378_v24 = vadd.f32 %v8557_v32, %v8543_v22  ;;  %v5272_v7 = vmax.f32 %v2083_v21, %v2090_v49  ;;  %v8562_v9 = vmax.f32 %v4824_v36, %v4976_v57  ;;  %v8563_v20 = vld [vmem:[#allocation17_spill] sm:$0xff]  ;;  %v8568_v21 = vld [vmem:[#allocation198_spill] sm:$0xff] }
 0x2cd   : > { %8552 = vst [vmem:[#allocation249_spill] sm:$0xff] %v5237_v6  ;;  %v5253_v6 = vpop.permute.xlu0 %2566  ;;  %568 = vmatmul.f32.gmra.mxu3 %v3787_v2  ;;  %v1033_v51 = vadd.f32 %v8564_v58, %v8560_v28  ;;  %v8566_v2 = vld [vmem:[#allocation136_spill] sm:$0xff]  ;;  %v8567_v43 = vmov 22   ;;  %v8569_v36 = vmax.f32 %v4827_v39, %v4979_v55  ;;  %v1571_v58 = vsel %vm434_vm1, %v1551_v33, -inf }
 0x2ce   : > { %8553 = vst [vmem:[#allocation250_spill] sm:$0xff] %v5242_v8  ;;  %v5263_v25 = vpop.permute.xlu2 %3037  ;;  %v5277_v32 = vmax.f32 %v8562_v9, %v706_v27  ;;  %v2069_v8 = vadd.f32 %v8566_v2, %v8523_v18  ;;  %v8570_v27 = vmax.f32 %v4840_v47, %v5006_v59  ;;  %v1398_v2 = vsel %vm434_vm1, %v1378_v24, -inf  ;;  %v8572_v39 = vld [vmem:[#allocation96_spill] sm:$0xff] }
 0x2cf   : > { %8556 = vst [vmem:[#allocation251_spill] sm:$0xff] %v5253_v6  ;;  %v1225_v6 = vsel %vm434_vm1, %v1205_v3, -inf  ;;  %v5284_v3 = vsel %vm434_vm1, %v2236_v48, -inf  ;;  %v5293_v57 = vmax.f32 %v8569_v36, %v879_v16  ;;  %v8571_v48 = vmax.f32 %v4847_v10, %v5009_v53  ;;  %v8573_v59 = vld [vmem:[#allocation72_spill] sm:$0xff]  ;;  %v8576_v53 = vld [vmem:[#allocation139_spill] sm:$0xff]  ;;  %v8577_v36 = vld [vmem:[#allocation90_spill] sm:$0xff] }
 0x2d0   : > { %8559 = vst [vmem:[#allocation252_spill] sm:$0xff] %v5263_v25  ;;  %v860_v25 = vadd.f32 %v8563_v20, %v8560_v28  ;;  %3748 = vset.pattern.permute.xlu2 %v8567_v43  ;;  %v5298_v49 = vmax.f32 %v8570_v27, %v1052_v54  ;;  %v1724_v55 = vadd.f32 %v8572_v39, %v8543_v22  ;;  %v708_v16 = vsel %vm434_vm1, %v687_v50, -inf }
 0x2d1   : > { %8565 = vst [vmem:[#allocation253_spill] sm:$0xff] %v5284_v3  ;;  %2751 = vperm.xlu1 %3745, %v8568_v21   ;;  %3069 = vperm.xlu2 %3748, %v4575_v14   ;;  %v5304_v9 = vmax.f32 %v8571_v48, %v1225_v6  ;;  %v1206_v47 = vadd.f32 %v8573_v59, %v8560_v28  ;;  %v8574_v14 = vld [vmem:[#allocation65_spill] sm:$0xff]  ;;  %v5316_v10 = vsel %vm434_vm1, %v1723_v60, -inf  ;;  %v1054_v33 = vsel %vm434_vm1, %v1033_v51, -inf  ;;  %v8578_v48 = vld [vmem:[#allocation195_spill] sm:$0xff] }
 0x2d2   : > { %v1379_v54 = vadd.f32 %v8574_v14, %v8560_v28  ;;  %8575 = vst [vmem:[#allocation198_spill] sm:$0xff] %v5316_v10  ;;  %v2063_v24 = vadd.f32 %v8576_v53, %v4393_v46  ;;  %v881_v6 = vsel %vm434_vm1, %v860_v25, -inf  ;;  %v1552_v27 = vadd.f32 %v8577_v36, %v8560_v28  ;;  %v8581_v53 = vld [vmem:[#allocation222_spill] sm:$0xff]  ;;  %v8582_v25 = vld [vmem:[#allocation156_spill] sm:$0xff]  ;;  %v8587_v3 = vld [vmem:[#allocation113_spill] sm:$0xff] }
 0x2d3   : > { %v5325_v50 = vsel %vm434_vm1, %v2069_v8, -inf  ;;  %v2241_v39 = vadd.f32 %v8578_v48, %v8508_v5  ;;  %v8580_v60 = vmax.f32 %v4854_v30, %v5019_v34  ;;  %v8583_v20 = vmax.f32 %v8581_v53, %v8582_v25  ;;  %v3788_v46 = vld [vmem:[%s4199_s22 + $0x10] sm:$0xff]  ;;  %v8589_v34 = vld [vmem:[#allocation238_spill] sm:$0xff]  ;;  %v8615_v48 = vld [vmem:[#allocation227_spill] sm:$0xff] }
 0x2d4   : > { %v5329_v14 = vpop.permute.xlu1 %2401  ;;  %v8585_v8 = vmax.f32 %v4875_v61, %v5067_v62  ;;  %v5351_v30 = vadd.f32 %v8587_v3, %v8508_v5  ;;  %v8593_v61 = vmax.f32 %v4878_v13, %v5070_v15  ;;  %v8594_v62 = vmax.f32 %v4885_v1, %v5073_v37  ;;  %v8597_v3 = vld [vmem:[#allocation41_spill] sm:$0xff]  ;;  %v8599_v37 = vld [vmem:[#allocation34_spill] sm:$0xff] }
 0x2d5   : > { %8579 = vst [vmem:[#allocation254_spill] sm:$0xff] %v5329_v14  ;;  %v5334_v59 = vmax.f32 %v8580_v60, %v1398_v2  ;;  %v5339_v51 = vmax.f32 %v8583_v20, %v1571_v58  ;;  %571 = vmatmul.f32.gmra.mxu3 %v3788_v46  ;;  %v5355_v2 = vsel %vm434_vm1, %v8589_v34, -inf  ;;  %v5357_v20 = vpop.permute.xlu0 %2868  ;;  %v1227_v53 = vsel %vm434_vm1, %v1206_v47, -inf  ;;  %v8596_v34 = vld [vmem:[#allocation11_spill] sm:$0xff] }
 0x2d6   : > { %v5345_v36 = vmax.f32 %v8585_v8, %v708_v16  ;;  %8588 = vst [vmem:[#allocation156_spill] sm:$0xff] %v5351_v30  ;;  %v5359_v58 = vpop.permute.xlu2 %3045  ;;  %v5364_v46 = vmax.f32 %v8593_v61, %v881_v6  ;;  %v5369_v16 = vmax.f32 %v8594_v62, %v1054_v33  ;;  %v1400_v60 = vsel %vm434_vm1, %v1379_v54, -inf  ;;  %v8595_v8 = vld [vmem:[#allocation141_spill] sm:$0xff]  ;;  %v8598_v6 = vld [vmem:[#allocation200_spill] sm:$0xff]  ;;  %v8600_v54 = vld [vmem:[#allocation59_spill] sm:$0xff] }
 0x2d7   : > { %8584 = vst [vmem:[#allocation222_spill] sm:$0xff] %v5339_v51  ;;  %v5374_v25 = vsel %vm434_vm1, %v2063_v24, -inf  ;;  %v688_v14 = vadd.f32 %v8596_v34, %v8595_v8  ;;  %v861_v13 = vadd.f32 %v8597_v3, %v8595_v8  ;;  %v1573_v15 = vsel %vm434_vm1, %v1552_v27, -inf  ;;  %v8602_v62 = vld [vmem:[#allocation140_spill] sm:$0xff]  ;;  %v8604_v34 = vld [vmem:[#allocation154_spill] sm:$0xff] }
 0x2d8   : > { %8590 = vst [vmem:[#allocation238_spill] sm:$0xff] %v5355_v2  ;;  %v2244_v1 = vadd.f32 %v8598_v6, %v8560_v28  ;;  %v1034_v47 = vadd.f32 %v8599_v37, %v8595_v8  ;;  %v1207_v24 = vadd.f32 %v8600_v54, %v8595_v8  ;;  %v1744_v33 = vsel %vm434_vm1, %v1724_v55, -inf  ;;  %v8603_v27 = vld [vmem:[#allocation176_spill] sm:$0xff]  ;;  %v8606_v37 = vld [vmem:[#allocation89_spill] sm:$0xff] }
 0x2d9   : > { %8591 = vst [vmem:[#allocation255_spill] sm:$0xff] %v5357_v20  ;;  %3749 = vset.pattern.permute.xlu1 %v8567_v43  ;;  %v5390_v61 = vsel %vm434_vm1, %v2241_v39, -inf  ;;  %v2072_v3 = vadd.f32 %v8602_v62, %v8595_v8  ;;  %3077 = vperm.xlu2 %3748, %v8603_v27   ;;  %v8605_v6 = vmax.f32 %v4888_v35, %v5076_v4  ;;  %v8608_v20 = vld [vmem:[#allocation226_spill] sm:$0xff]  ;;  %v8609_v2 = vld [vmem:[#allocation241_spill] sm:$0xff]  ;;  %v8612_v35 = vld [vmem:[#allocation127_spill] sm:$0xff]  ;;  %v883_v39 = vsel %vm434_vm1, %v861_v13, -inf }
 0x2da   : > { %8592 = vst [vmem:[#allocation256_spill] sm:$0xff] %v5359_v58  ;;  %3073 = vperm.xlu1 %3749, %v8604_v34   ;;  %v1380_v54 = vadd.f32 %v8606_v37, %v8595_v8  ;;  %v8607_v55 = vmax.f32 %v4891_v45, %v5085_v19  ;;  %v8610_v34 = vmax.f32 %v8608_v20, %v8609_v2  ;;  %v710_v37 = vsel %vm434_vm1, %v688_v14, -inf  ;;  %v8621_v14 = vld [vmem:[#allocation145_spill] sm:$0xff]  ;;  %v8622_v13 = vld [vmem:[#allocation180_spill] sm:$0xff] }
 0x2db   : > { %8601 = vst [vmem:[#allocation141_spill] sm:$0xff] %v5390_v61  ;;  %v5399_v58 = vmax.f32 %v8605_v6, %v1227_v53  ;;  %v1725_v4 = vadd.f32 %v8612_v35, %v8560_v28  ;;  %v8613_v53 = vld [vmem:[#allocation115_spill] sm:$0xff]  ;;  %v8616_v61 = vld [vmem:[#allocation242_spill] sm:$0xff]  ;;  %v1056_v2 = vsel %vm434_vm1, %v1034_v47, -inf  ;;  %v1229_v20 = vsel %vm434_vm1, %v1207_v24, -inf  ;;  %v3789_v35 = vld [vmem:[%s4199_s22 + $0x18] sm:$0xff] }
 0x2dc   : > { %v5408_v62 = vmax.f32 %v8607_v55, %v1400_v60  ;;  %v5413_v30 = vmax.f32 %v8610_v34, %v1573_v15  ;;  %v8614_v6 = vld [vmem:[#allocation143_spill] sm:$0xff]  ;;  %v8617_v19 = vmax.f32 %v8615_v48, %v8616_v61  ;;  %v5427_v60 = vsel %vm434_vm1, %v2244_v1, -inf  ;;  %v8620_v15 = vld [vmem:[#allocation82_spill] sm:$0xff] }
 0x2dd   : > { %v2065_v10 = vadd.f32 %v8614_v6, %v8613_v53  ;;  %8619 = vst [vmem:[#allocation226_spill] sm:$0xff] %v5427_v60  ;;  %v1553_v55 = vadd.f32 %v8620_v15, %v8595_v8  ;;  %v5434_v34 = vsel %vm434_vm1, %v2072_v3, -inf  ;;  %v2073_v6 = vadd.f32 %v8622_v13, %v8621_v14  ;;  %574 = vmatmul.f32.gmra.mxu3 %v3789_v35  ;;  %v5439_v48 = vpop.permute.xlu1 %2723  ;;  %v8624_v1 = vld [vmem:[#allocation6_spill] sm:$0xff]  ;;  %v8627_v3 = vld [vmem:[#allocation28_spill] sm:$0xff] }
 0x2de   : > { %8611 = vst [vmem:[#allocation176_spill] sm:$0xff] %v5413_v30  ;;  %v5424_v45 = vmax.f32 %v8617_v19, %v1744_v33  ;;  %v689_v33 = vadd.f32 %v8624_v1, %v8621_v14  ;;  %v1402_v47 = vsel %vm434_vm1, %v1380_v54, -inf  ;;  %v5444_v61 = vpop.permute.xlu2 %3057  ;;  %v8626_v24 = vmax.f32 %v4896_v26, %v5131_v40  ;;  %v8628_v13 = vld [vmem:[#allocation182_spill] sm:$0xff] }
 0x2df   : > { %8623 = vst [vmem:[#allocation241_spill] sm:$0xff] %v5439_v48  ;;  %v862_v15 = vadd.f32 %v8627_v3, %v8621_v14  ;;  %v8629_v35 = vmax.f32 %v4910_v52, %v8628_v13  ;;  %v8630_v48 = vld [vmem:[#allocation146_spill] sm:$0xff]  ;;  %v2081_v54 = vsel %vm434_vm1, %v2065_v10, -inf  ;;  %v8633_v26 = vmax.f32 %v4913_v41, %v5137_v17 }
 0x2e0   : > { %8618 = vst [vmem:[#allocation154_spill] sm:$0xff] %v5424_v45  ;;  %v5449_v19 = vmax.f32 %v8626_v24, %v710_v37  ;;  %v5460_v1 = vadd.f32 %v8630_v48, %v8523_v18  ;;  %v8634_v37 = vmax.f32 %v4916_v63, %v5140_v44  ;;  %v8636_v13 = vld [vmem:[#allocation58_spill] sm:$0xff]  ;;  %v8637_v10 = vmax.f32 %v4929_v31, %v5150_v56  ;;  %v8639_v44 = vld [vmem:[#allocation51_spill] sm:$0xff]  ;;  %v8645_v48 = vld [vmem:[#allocation229_spill] sm:$0xff] }
 0x2e1   : > { %8625 = vst [vmem:[#allocation227_spill] sm:$0xff] %v5444_v61  ;;  %v5456_v45 = vmax.f32 %v8629_v35, %v883_v39  ;;  %v8632_v61 = vld [vmem:[#allocation147_spill] sm:$0xff]  ;;  %v5468_v40 = vmax.f32 %v8633_v26, %v1056_v2  ;;  %v5475_v39 = vpop.permute.xlu0 %2888  ;;  %v1035_v24 = vadd.f32 %v8636_v13, %v8621_v14  ;;  %v1746_v41 = vsel %vm434_vm1, %v1725_v4, -inf  ;;  %v8642_v4 = vld [vmem:[#allocation193_spill] sm:$0xff] }
 0x2e2   : > { %8631 = vst [vmem:[#allocation242_spill] sm:$0xff] %v5460_v1  ;;  %v2068_v60 = vadd.f32 %v8632_v61, %v8508_v5  ;;  %v5473_v52 = vmax.f32 %v8634_v37, %v1229_v20  ;;  %v5482_v35 = vmax.f32 %v8637_v10, %v1402_v47  ;;  %v1575_v61 = vsel %vm434_vm1, %v1553_v55, -inf  ;;  %v8640_v26 = vld [vmem:[#allocation75_spill] sm:$0xff]  ;;  %v8641_v55 = vld [vmem:[#allocation164_spill] sm:$0xff]  ;;  %v8643_v47 = vld [vmem:[#allocation109_spill] sm:$0xff] }
 0x2e3   : > { %8635 = vst [vmem:[#allocation182_spill] sm:$0xff] %v5475_v39  ;;  %v2096_v17 = vsel %vm434_vm1, %v2073_v6, -inf  ;;  %v8638_v2 = vmov 21   ;;  %v712_v63 = vsel %vm434_vm1, %v689_v33, -inf  ;;  %v1208_v20 = vadd.f32 %v8639_v44, %v8621_v14  ;;  %v8644_v33 = vld [vmem:[#allocation108_spill] sm:$0xff]  ;;  %v8646_v44 = vld [vmem:[#allocation177_spill] sm:$0xff] }
 0x2e4   : > { %3751 = vset.pattern.permute.xlu2 %v8638_v2  ;;  %3750 = vset.pattern.permute.xlu1 %v8638_v2  ;;  %v1381_v31 = vadd.f32 %v8640_v26, %v8621_v14  ;;  %v2089_v56 = vmax.f32 %v2081_v54, %v5325_v50  ;;  %v885_v6 = vsel %vm434_vm1, %v862_v15, -inf  ;;  %v1554_v37 = vadd.f32 %v8643_v47, %v8621_v14  ;;  %v8649_v50 = vld [vmem:[#allocation230_spill] sm:$0xff]  ;;  %v8676_v5 = vld [vmem:[#allocation247_spill] sm:$0xff] }
 0x2e5   : > { %2916 = vperm.xlu2 %3751, %v8641_v55   ;;  %2912 = vperm.xlu1 %3750, %v8642_v4   ;;  %v1726_v10 = vadd.f32 %v8644_v33, %v8595_v8  ;;  %v2086_v2 = vsel %vm434_vm1, %v2068_v60, -inf  ;;  %v8647_v26 = vmax.f32 %v8645_v48, %v8646_v44  ;;  %v8650_v54 = vld [vmem:[#allocation130_spill] sm:$0xff]  ;;  %v5515_v15 = vsel %vm434_vm1, %v5220_v12, -inf  ;;  %v8654_v33 = vld [vmem:[#allocation244_spill] sm:$0xff]  ;;  %v5532_v12 = vpop.permute.xlu1 %2735 }
 0x2e6   : > { %v8651_v55 = vmax.f32 %v8649_v50, %v8650_v54  ;;  %8653 = vst [vmem:[#allocation229_spill] sm:$0xff] %v5515_v15  ;;  %v5517_v47 = vmax.f32 %v2089_v56, %v2096_v17  ;;  %v8655_v39 = vmax.f32 %v4965_v29, %v8654_v33  ;;  %v1058_v48 = vsel %vm434_vm1, %v1035_v24, -inf  ;;  %v3790_v54 = vld [vmem:[%s4199_s22 + $0x20] sm:$0xff]  ;;  %v8661_v17 = vld [vmem:[#allocation245_spill] sm:$0xff]  ;;  %v8663_v24 = vld [vmem:[#allocation243_spill] sm:$0xff]  ;;  %v5542_v33 = vpop.permute.xlu2 %3065 }
 0x2e7   : > { %v5506_v13 = vmax.f32 %v8647_v26, %v1575_v61  ;;  %v8656_v61 = vld [vmem:[#allocation128_spill] sm:$0xff]  ;;  %v8658_v26 = vld [vmem:[#allocation103_spill] sm:$0xff]  ;;  %577 = vmatmul.f32.gmra.mxu3 %v3790_v54  ;;  %8660 = vst [vmem:[#allocation230_spill] sm:$0xff] %v5532_v12  ;;  %v8662_v56 = vmax.f32 %v4968_v11, %v8661_v17  ;;  %v1231_v29 = vsel %vm434_vm1, %v1208_v20, -inf  ;;  %v1577_v12 = vsel %vm434_vm1, %v1554_v37, -inf  ;;  %v8668_v11 = vld [vmem:[#allocation45_spill] sm:$0xff] }
 0x2e8   : > { %v5511_v3 = vmax.f32 %v8651_v55, %v1746_v41  ;;  %v5522_v60 = vmax.f32 %v8655_v39, %v712_v63  ;;  %v5527_v44 = vadd.f32 %v8656_v61, %v8543_v22  ;;  %v8659_v41 = vld [vmem:[#allocation148_spill] sm:$0xff]  ;;  %v1404_v39 = vsel %vm434_vm1, %v1381_v31, -inf  ;;  %8664 = vst [vmem:[#allocation130_spill] sm:$0xff] %v5542_v33  ;;  %v8665_v61 = vld [vmem:[#allocation150_spill] sm:$0xff]  ;;  %v8666_v15 = vld [vmem:[#allocation27_spill] sm:$0xff] }
 0x2e9   : > { %8648 = vst [vmem:[#allocation164_spill] sm:$0xff] %v5506_v13  ;;  %v2235_v50 = vadd.f32 %v8659_v41, %v8658_v26  ;;  %v5537_v55 = vmax.f32 %v8662_v56, %v885_v6  ;;  %v2087_v63 = vmax.f32 %v8663_v24, %v2086_v2  ;;  %v690_v41 = vadd.f32 %v8666_v15, %v8665_v61  ;;  %v8667_v54 = vld [vmem:[#allocation20_spill] sm:$0xff]  ;;  %v8670_v56 = vld [vmem:[#allocation246_spill] sm:$0xff] }
 0x2ea   : > { %8652 = vst [vmem:[#allocation193_spill] sm:$0xff] %v5511_v3  ;;  %v1036_v6 = vadd.f32 %v8668_v11, %v8665_v61  ;;  %v8669_v17 = vld [vmem:[#allocation232_spill] sm:$0xff]  ;;  %v8678_v11 = vld [vmem:[#allocation235_spill] sm:$0xff] }
 0x2eb   : > { %8657 = vst [vmem:[#allocation177_spill] sm:$0xff] %v5527_v44  ;;  %v863_v44 = vadd.f32 %v8667_v54, %v8665_v61  ;;  %v8671_v20 = vmax.f32 %v8669_v17, %v8670_v56  ;;  %v8672_v31 = vld [vmem:[#allocation76_spill] sm:$0xff]  ;;  %v8675_v54 = vld [vmem:[#allocation233_spill] sm:$0xff] }
 0x2ec   : > { %v1209_v2 = vadd.f32 %v8672_v31, %v8665_v61  ;;  %v8673_v24 = vld [vmem:[#allocation68_spill] sm:$0xff]  ;;  %v8677_v37 = vmax.f32 %v8675_v54, %v8676_v5 }
 0x2ed   : > { %v5554_v1 = vmax.f32 %v8671_v20, %v1058_v48  ;;  %v1382_v33 = vadd.f32 %v8673_v24, %v8665_v61  ;;  %v8674_v15 = vld [vmem:[#allocation204_spill] sm:$0xff]  ;;  %v5575_v20 = vsel %vm434_vm1, %v2235_v50, -inf  ;;  %v8683_v24 = vld [vmem:[#allocation151_spill] sm:$0xff]  ;;  %2924 = vperm.xlu2 %3751, %v8568_v21   ;;  %v8689_v50 = vld [vmem:[#allocation181_spill] sm:$0xff] }
 0x2ee   : > { %v2247_v26 = vadd.f32 %v8674_v15, %v8665_v61  ;;  %v5565_v3 = vmax.f32 %v8677_v37, %v1231_v29  ;;  %v8679_v13 = vld [vmem:[#allocation248_spill] sm:$0xff]  ;;  %8682 = vst [vmem:[#allocation244_spill] sm:$0xff] %v5575_v20  ;;  %v2071_v31 = vadd.f32 %v8683_v24, %v8560_v28  ;;  %v8684_v15 = vld [vmem:[#allocation250_spill] sm:$0xff]  ;;  %v8687_v29 = vld [vmem:[#allocation99_spill] sm:$0xff]  ;;  %2920 = vperm.xlu1 %3750, %v8689_v50   ;;  %v8713_v28 = vmov 23  }
 0x2ef   : > { %v8680_v30 = vmax.f32 %v8678_v11, %v8679_v13  ;;  %v8681_v48 = vld [vmem:[#allocation92_spill] sm:$0xff]  ;;  %v8685_v22 = vmax.f32 %v4993_v42, %v8684_v15  ;;  %v1727_v54 = vadd.f32 %v8687_v29, %v8621_v14  ;;  %v5589_v13 = vpop.permute.xlu0 %2900  ;;  %v5597_v42 = vsel %vm434_vm1, %v863_v44, -inf  ;;  %v8690_v15 = vld [vmem:[#allocation155_spill] sm:$0xff]  ;;  %v8693_v44 = vld [vmem:[#allocation13_spill] sm:$0xff] }
 0x2f0   : > { %v1555_v56 = vadd.f32 %v8681_v48, %v8665_v61  ;;  %8688 = vst [vmem:[#allocation243_spill] sm:$0xff] %v5589_v13  ;;  %v5609_v21 = vsel %vm434_vm1, %v1382_v33, -inf  ;;  %v691_v37 = vadd.f32 %v8693_v44, %v8690_v15  ;;  %v3791_v24 = vld [vmem:[%s4199_s22 + $0x28] sm:$0xff]  ;;  %v8697_v44 = vld [vmem:[#allocation152_spill] sm:$0xff]  ;;  %v8706_v13 = vld [vmem:[#allocation210_spill] sm:$0xff] }
 0x2f1   : > { %v5570_v17 = vmax.f32 %v8680_v30, %v1404_v39  ;;  %v5582_v5 = vmax.f32 %v8685_v22, %v1577_v12  ;;  %v5587_v30 = vmax.f32 %v2087_v63, %v5434_v34  ;;  %v5594_v39 = vsel %vm434_vm1, %v690_v41, -inf  ;;  %v8691_v12 = vld [vmem:[#allocation144_spill] sm:$0xff]  ;;  %580 = vmatmul.f32.gmra.mxu3 %v3791_v24 }
 0x2f2   : > { %v1748_v22 = vsel %vm434_vm1, %v1726_v10, -inf  ;;  %v2075_v11 = vadd.f32 %v8691_v12, %v8690_v15  ;;  %v5603_v34 = vsel %vm434_vm1, %v1036_v6, -inf  ;;  %v5606_v63 = vsel %vm434_vm1, %v1209_v2, -inf  ;;  %v8694_v10 = vld [vmem:[#allocation44_spill] sm:$0xff]  ;;  %v8696_v2 = vld [vmem:[#allocation37_spill] sm:$0xff] }
 0x2f3   : > { %8686 = vst [vmem:[#allocation245_spill] sm:$0xff] %v5582_v5  ;;  %v5612_v41 = vsel %vm434_vm1, %v2247_v26, -inf  ;;  %v864_v50 = vadd.f32 %v8694_v10, %v8690_v15  ;;  %v5619_v12 = vsel %vm434_vm1, %v1555_v56, -inf  ;;  %v2092_v6 = vsel %vm434_vm1, %v2071_v31, -inf  ;;  %v5631_v10 = vpop.permute.xlu1 %3041 }
 0x2f4   : > { %8692 = vst [vmem:[#allocation232_spill] sm:$0xff] %v5612_v41  ;;  %v715_v33 = vmax.f32 %v5277_v32, %v5594_v39  ;;  %v1037_v29 = vadd.f32 %v8696_v2, %v8690_v15  ;;  %v2238_v48 = vadd.f32 %v8697_v44, %v8613_v53  ;;  %v5640_v24 = vsel %vm434_vm1, %v2075_v11, -inf  ;;  %v5642_v39 = vpop.permute.xlu2 %2574  ;;  %v8700_v44 = vld [vmem:[#allocation133_spill] sm:$0xff]  ;;  %v8705_v11 = vld [vmem:[#allocation111_spill] sm:$0xff] }
 0x2f5   : > { %8695 = vst [vmem:[#allocation246_spill] sm:$0xff] %v5619_v12  ;;  %v5648_v2 = vadd.f32 %v8700_v44, %v8665_v61  ;;  %v8702_v56 = vmax.f32 %v4998_v0, %v5247_v38  ;;  %v8704_v32 = vmax.f32 %v5374_v25, %v5111_v23  ;;  %v716_v26 = vsel %vm434_vm1, %v691_v37, -inf  ;;  %v8707_v53 = vld [vmem:[#allocation157_spill] sm:$0xff]  ;;  %3753 = vset.pattern.permute.xlu2 %v8713_v28 }
 0x2f6   : > { %8698 = vst [vmem:[#allocation233_spill] sm:$0xff] %v5631_v10  ;;  %v5666_v44 = vsel %vm434_vm1, %v864_v50, -inf  ;;  %v2074_v0 = vadd.f32 %v8707_v53, %v8665_v61  ;;  %v5671_v38 = vsel %vm434_vm1, %v1037_v29, -inf  ;;  %v8708_v23 = vld [vmem:[#allocation61_spill] sm:$0xff]  ;;  %v8711_v50 = vld [vmem:[#allocation163_spill] sm:$0xff]  ;;  %3752 = vset.pattern.permute.xlu1 %v8713_v28  ;;  %3250 = vperm.xlu2 %3753, %v8603_v27   ;;  %v717_v37 = vmax.f32 %v5345_v36, %v716_v26 }
 0x2f7   : > { %8699 = vst [vmem:[#allocation247_spill] sm:$0xff] %v5642_v39  ;;  %v5653_v10 = vmax.f32 %v8702_v56, %v1748_v22  ;;  %v5658_v31 = vmax.f32 %v8704_v32, %v2092_v6  ;;  %v5662_v39 = vadd.f32 %v8706_v13, %v8705_v11  ;;  %v1210_v25 = vadd.f32 %v8708_v23, %v8690_v15  ;;  %v8709_v22 = vld [vmem:[#allocation94_spill] sm:$0xff]  ;;  %v8712_v32 = vld [vmem:[#allocation161_spill] sm:$0xff]  ;;  %v8716_v23 = vld [vmem:[#allocation159_spill] sm:$0xff] }
 0x2f8   : > { %8701 = vst [vmem:[#allocation235_spill] sm:$0xff] %v5648_v2  ;;  %v1383_v6 = vadd.f32 %v8709_v22, %v8690_v15  ;;  %v5678_v56 = vsel %vm434_vm1, %v2238_v48, -inf  ;;  %v2077_v13 = vadd.f32 %v8712_v32, %v8711_v50  ;;  %v8714_v29 = vld [vmem:[#allocation85_spill] sm:$0xff]  ;;  %v3792_v48 = vld [vmem:[%s3874_s19 + $0x48] sm:$0xff]  ;;  %v5698_v41 = vsel %vm434_vm1, %v1727_v54, -inf  ;;  %v8723_v54 = vld [vmem:[#allocation8_spill] sm:$0xff] }
 0x2f9   : > { %8703 = vst [vmem:[#allocation248_spill] sm:$0xff] %v5653_v10  ;;  %v5688_v53 = vadd.f32 %v8714_v29, %v8690_v15  ;;  %v8717_v22 = vld [vmem:[#allocation185_spill] sm:$0xff]  ;;  %3246 = vperm.xlu1 %3752, %v3792_v48   ;;  %v8720_v29 = vld [vmem:[#allocation31_spill] sm:$0xff]  ;;  %v2098_v26 = vsel %vm434_vm1, %v2074_v0, -inf  ;;  %v3793_v48 = vld [vmem:[%s4199_s22 + $0x30] sm:$0xff]  ;;  %v692_v32 = vadd.f32 %v8723_v54, %v8716_v23 }
 0x2fa   : > { %8710 = vst [vmem:[#allocation250_spill] sm:$0xff] %v5678_v56  ;;  %v2076_v61 = vadd.f32 %v8717_v22, %v8716_v23  ;;  %v5700_v56 = vpop.permute.xlu0 %2703  ;;  %v693_v10 = vadd.f32 %v8720_v29, %v8711_v50  ;;  %v8721_v2 = vld [vmem:[#allocation23_spill] sm:$0xff]  ;;  %583 = vmatmul.f32.gmra.mxu3 %v3793_v48  ;;  %v5717_v29 = vsel %vm434_vm1, %v1210_v25, -inf  ;;  %v8728_v48 = vld [vmem:[#allocation54_spill] sm:$0xff]  ;;  %v722_v25 = vmax.f32 %v715_v33, %v717_v37 }
 0x2fb   : > { %8715 = vst [vmem:[#allocation181_spill] sm:$0xff] %v5688_v53  ;;  %v866_v22 = vadd.f32 %v8721_v2, %v8711_v50  ;;  %v8722_v27 = vld [vmem:[#allocation47_spill] sm:$0xff]  ;;  %v2104_v2 = vsel %vm434_vm1, %v2077_v13, -inf  ;;  %v5720_v12 = vpop.permute.xlu1 %3053  ;;  %v1211_v28 = vadd.f32 %v8728_v48, %v8716_v23  ;;  %v8729_v54 = vld [vmem:[#allocation122_spill] sm:$0xff] }
 0x2fc   : > { %8718 = vst [vmem:[#allocation163_spill] sm:$0xff] %v5698_v41  ;;  %v1039_v20 = vadd.f32 %v8722_v27, %v8711_v50  ;;  %v8726_v27 = vld [vmem:[#allocation30_spill] sm:$0xff]  ;;  %v8727_v0 = vld [vmem:[#allocation63_spill] sm:$0xff]  ;;  %v5734_v5 = vpop.permute.xlu2 %2896  ;;  %v2105_v53 = vmax.f32 %v5517_v47, %v2104_v2 }
 0x2fd   : > { %8719 = vst [vmem:[#allocation159_spill] sm:$0xff] %v5700_v56  ;;  %v8724_v56 = vld [vmem:[#allocation80_spill] sm:$0xff]  ;;  %v865_v36 = vadd.f32 %v8726_v27, %v8716_v23  ;;  %v1038_v51 = vadd.f32 %v8727_v0, %v8716_v23  ;;  %v8730_v15 = vld [vmem:[#allocation158_spill] sm:$0xff]  ;;  %v8731_v11 = vld [vmem:[#allocation71_spill] sm:$0xff]  ;;  %v720_v27 = vsel %vm434_vm1, %v693_v10, -inf  ;;  %v893_v0 = vsel %vm434_vm1, %v866_v22, -inf }
 0x2fe   : > { %v1212_v41 = vadd.f32 %v8724_v56, %v8711_v50  ;;  %8725 = vst [vmem:[#allocation257_spill] sm:$0xff] %v5720_v12  ;;  %v2240_v14 = vadd.f32 %v8730_v15, %v8729_v54  ;;  %v2102_v56 = vsel %vm434_vm1, %v2076_v61, -inf  ;;  %v1385_v13 = vadd.f32 %v8731_v11, %v8711_v50  ;;  %v8733_v33 = vld [vmem:[#allocation78_spill] sm:$0xff]  ;;  %3754 = vset.pattern.permute.xlu2 %v8567_v43 }
 0x2ff   : > { %v2099_v12 = vmax.f32 %v5272_v7, %v2098_v26  ;;  %8732 = vst [vmem:[#allocation122_spill] sm:$0xff] %v5734_v5  ;;  %v1066_v48 = vsel %vm434_vm1, %v1039_v20, -inf  ;;  %v718_v15 = vsel %vm434_vm1, %v692_v32, -inf  ;;  %v1384_v37 = vadd.f32 %v8733_v33, %v8716_v23  ;;  %v3794_v20 = vld [vmem:[%s3874_s19 + $0x58] sm:$0xff]  ;;  %3085 = vperm.xlu2 %3754, %v8642_v4  }
 0x300   : > { %v1239_v61 = vsel %vm434_vm1, %v1212_v41, -inf  ;;  %v2103_v11 = vmax.f32 %v5587_v30, %v2102_v56  ;;  %v891_v7 = vsel %vm434_vm1, %v865_v36, -inf  ;;  %v1064_v10 = vsel %vm434_vm1, %v1038_v51, -inf  ;;  %v3795_v26 = vld [vmem:[%s4199_s22 + $0x38] sm:$0xff] }
 0x301   : > { %v1237_v22 = vsel %vm434_vm1, %v1211_v28, -inf  ;;  %3254 = vperm.xlu1 %3752, %v3794_v20   ;;  %v721_v47 = vmax.f32 %v5522_v60, %v720_v27  ;;  %v894_v41 = vmax.f32 %v5537_v55, %v893_v0  ;;  %v1067_v2 = vmax.f32 %v5554_v1, %v1066_v48  ;;  %v8738_v27 = vld [vmem:[#allocation95_spill] sm:$0xff] }
 0x302   : > { %v1412_v32 = vsel %vm434_vm1, %v1385_v13, -inf  ;;  %v719_v30 = vmax.f32 %v5449_v19, %v718_v15  ;;  %v1236_v51 = vmax.f32 %v5399_v58, %v5717_v29  ;;  %v1240_v28 = vmax.f32 %v5565_v3, %v1239_v61  ;;  %586 = vmatmul.f32.gmra.mxu3 %v3795_v26  ;;  %v8735_v15 = vld [vmem:[#allocation213_spill] sm:$0xff]  ;;  %v5769_v29 = vpop.permute.xlu0 %2731  ;;  %v8750_v26 = vld [vmem:[#allocation134_spill] sm:$0xff] }
 0x303   : > { %v1408_v56 = vsel %vm434_vm1, %v1383_v6, -inf  ;;  %v2107_v36 = vmax.f32 %v2103_v11, %v2105_v53  ;;  %v892_v60 = vmax.f32 %v5456_v45, %v891_v7  ;;  %v1065_v1 = vmax.f32 %v5468_v40, %v1064_v10  ;;  %8736 = vst [vmem:[#allocation258_spill] sm:$0xff] %v5769_v29  ;;  %v5771_v3 = vpop.permute.xlu1 %3061 }
 0x304   : > { %v1410_v55 = vsel %vm434_vm1, %v1384_v37, -inf  ;;  %v8734_v4 = vmax.f32 %v5658_v31, %v5640_v24  ;;  %v2415_v58 = vadd.f32 %v8735_v15, %v8523_v18  ;;  %8737 = vst [vmem:[#allocation259_spill] sm:$0xff] %v5771_v3  ;;  %v1238_v53 = vmax.f32 %v5473_v52, %v1237_v22  ;;  %v5777_v48 = vpop.permute.xlu2 %2908  ;;  %v8781_v15 = vld [vmem:[#allocation198_spill] sm:$0xff] }
 0x305   : > { %v1413_v11 = vmax.f32 %v5570_v17, %v1412_v32  ;;  %v723_v45 = vmax.f32 %v719_v30, %v721_v47  ;;  %v896_v6 = vmax.f32 %v892_v60, %v894_v41  ;;  %v1069_v40 = vmax.f32 %v1065_v1, %v1067_v2  ;;  %8739 = vst [vmem:[#allocation260_spill] sm:$0xff] %v5777_v48  ;;  %v8747_v41 = vld [vmem:[#allocation253_spill] sm:$0xff]  ;;  %v8751_v60 = vld [vmem:[#allocation162_spill] sm:$0xff] }
 0x306   : > { %v2106_v19 = vmax.f32 %v2099_v12, %v8734_v4  ;;  %v1558_v0 = vadd.f32 %v8738_v27, %v8711_v50  ;;  %v8740_v12 = vmax.f32 %v5364_v46, %v5666_v44  ;;  %v8741_v31 = vmax.f32 %v5293_v57, %v5597_v42  ;;  %v8744_v57 = vld [vmem:[#allocation114_spill] sm:$0xff]  ;;  %v5808_v32 = vld [vmem:[%s3874_s19 + $0x78] sm:$0xff] }
 0x307   : > { %v1242_v13 = vmax.f32 %v1238_v53, %v1240_v28  ;;  %v1409_v52 = vmax.f32 %v5408_v62, %v1408_v56  ;;  %v1411_v17 = vmax.f32 %v5482_v35, %v1410_v55  ;;  %v2257_v61 = vsel %vm434_vm1, %v2240_v14, -inf  ;;  %v8745_v62 = vld [vmem:[#allocation217_spill] sm:$0xff]  ;;  %3097 = vperm.xlu2 %3754, %v5808_v32   ;;  %v3798_v28 = vld [vmem:[%s4199_s22 + $0x40] sm:$0xff]  ;;  %v8752_v55 = vld [vmem:[#allocation207_spill] sm:$0xff] }
 0x308   : > { %v895_v24 = vmax.f32 %v8741_v31, %v8740_v12  ;;  %v2108_v37 = vmax.f32 %v2106_v19, %v2107_v36  ;;  %v8742_v7 = vmax.f32 %v5369_v16, %v5671_v38  ;;  %v8743_v10 = vmax.f32 %v5298_v49, %v5603_v34  ;;  %v8749_v56 = vld [vmem:[#allocation181_spill] sm:$0xff] }
 0x309   : > { %v1557_v42 = vadd.f32 %v8744_v57, %v8716_v23  ;;  %v2434_v44 = vsel %vm434_vm1, %v2415_v58, -inf  ;;  %v2418_v35 = vadd.f32 %v8745_v62, %v8595_v8  ;;  %v8746_v14 = vmax.f32 %v5304_v9, %v5606_v63  ;;  %3756 = vset.pattern.permute.xlu1 %v8567_v43  ;;  %v3797_v9 = vld [vmem:[%s3874_s19 + $0x70] sm:$0xff]  ;;  %v8753_v58 = vld [vmem:[#allocation245_spill] sm:$0xff]  ;;  %v8780_v62 = vld [vmem:[#allocation190_spill] sm:$0xff] }
 0x30a   : > { %v1068_v46 = vmax.f32 %v8743_v10, %v8742_v7  ;;  %v1415_v20 = vmax.f32 %v1411_v17, %v1413_v11  ;;  %v724_v16 = vmax.f32 %v722_v25, %v723_v45  ;;  %v897_v49 = vmax.f32 %v895_v24, %v896_v6  ;;  %3093 = vperm.xlu1 %3756, %v3797_v9   ;;  %v5829_v31 = vpop.permute.xlu0 %2747  ;;  %v8759_v17 = vld [vmem:[#allocation164_spill] sm:$0xff]  ;;  %v8760_v10 = vld [vmem:[#allocation145_spill] sm:$0xff] }
 0x30b   : > { %v1241_v22 = vmax.f32 %v8746_v14, %v1236_v51  ;;  %v1585_v38 = vsel %vm434_vm1, %v1558_v0, -inf  ;;  %v2426_v47 = vsel %vm434_vm1, %v5662_v39, -inf  ;;  %v2258_v2 = vmax.f32 %v8747_v41, %v2257_v61  ;;  %589 = vmatmul.f32.gmra.mxu3 %v3798_v28  ;;  %v8756_v0 = vld [vmem:[#allocation167_spill] sm:$0xff]  ;;  %8757 = vst [vmem:[#allocation181_spill] sm:$0xff] %v5829_v31  ;;  %v8789_v57 = vld [vmem:[#allocation193_spill] sm:$0xff] }
 0x30c   : > { %v1070_v34 = vmax.f32 %v1068_v46, %v1069_v40  ;;  %v8748_v43 = vmax.f32 %v5334_v59, %v5609_v21  ;;  %v2433_v30 = vmax.f32 %v2426_v47, %v2434_v44  ;;  %v2109_v51 = vrot.slane %v2108_v37, 4  ;;  %v5825_v21 = vpop.permute.xlu1 %2570  ;;  %v8755_v40 = vld [vmem:[#allocation111_spill] sm:$0xff]  ;;  %v8761_v46 = vld [vmem:[#allocation166_spill] sm:$0xff] }
 0x30d   : > { %v1243_v63 = vmax.f32 %v1241_v22, %v1242_v13  ;;  %v1581_v39 = vsel %vm434_vm1, %v8749_v56, -inf  ;;  %v1583_v36 = vsel %vm434_vm1, %v1557_v42, -inf  ;;  %v2243_v1 = vadd.f32 %v8751_v60, %v8750_v26  ;;  %8754 = vst [vmem:[#allocation253_spill] sm:$0xff] %v5825_v21  ;;  %v8758_v13 = vld [vmem:[#allocation176_spill] sm:$0xff]  ;;  %v8762_v44 = vld [vmem:[#allocation155_spill] sm:$0xff]  ;;  %v8764_v22 = vld [vmem:[#allocation226_spill] sm:$0xff] }
 0x30e   : > { %v1414_v25 = vmax.f32 %v8748_v43, %v1409_v52  ;;  %v2250_v4 = vadd.f32 %v8752_v55, %v8711_v50  ;;  %v1586_v53 = vmax.f32 %v8753_v58, %v1585_v38  ;;  %v2440_v59 = vsel %vm434_vm1, %v2418_v35, -inf  ;;  %v8763_v35 = vld [vmem:[#allocation221_spill] sm:$0xff]  ;;  %v5840_v38 = vpop.permute.xlu2 %3214 }
 0x30f   : > { %v725_v11 = vrot.slane %v724_v16, 4  ;;  %v898_v45 = vrot.slane %v897_v49, 4  ;;  %v1071_v6 = vrot.slane %v1070_v34, 4  ;;  %v2237_v12 = vadd.f32 %v8756_v0, %v8755_v40  ;;  %8765 = vst [vmem:[#allocation134_spill] sm:$0xff] %v5840_v38 }
 0x310   : > { %v1416_v19 = vmax.f32 %v1414_v25, %v1415_v20  ;;  %v1244_v24 = vrot.slane %v1243_v63, 4  ;;  %v1582_v52 = vmax.f32 %v8758_v13, %v1581_v39  ;;  %v1584_v61 = vmax.f32 %v8759_v17, %v1583_v36  ;;  %v8767_v39 = vld [vmem:[#allocation222_spill] sm:$0xff] }
 0x311   : > { %v2110_v7 = vmax.f32 %v2108_v37, %v2109_v51  ;;  %v2246_v42 = vadd.f32 %v8761_v46, %v8760_v10  ;;  %v2421_v14 = vadd.f32 %v8763_v35, %v8762_v44  ;;  %v5838_v20 = vmax.f32 %v2258_v2, %v8764_v22  ;;  %v8768_v36 = vld [vmem:[#allocation246_spill] sm:$0xff]  ;;  %v8775_v22 = vld [vmem:[#allocation141_spill] sm:$0xff] }
 0x312   : > { %v5843_v47 = vsel %vm434_vm1, %v2243_v1, -inf  ;;  %v5845_v41 = vmax.f32 %v2440_v59, %v2433_v30  ;;  %v1417_v9 = vrot.slane %v1416_v19, 4  ;;  %v1588_v43 = vmax.f32 %v1584_v61, %v1586_v53  ;;  %v8774_v61 = vld [vmem:[#allocation102_spill] sm:$0xff]  ;;  %v8778_v35 = vld [vmem:[#allocation173_spill] sm:$0xff]  ;;  %v5891_v46 = vpop.permute.xlu0 %3049 }
 0x313   : > { %v5848_v37 = vsel %vm434_vm1, %v2250_v4, -inf  ;;  %v726_v25 = vmax.f32 %v724_v16, %v725_v11  ;;  %v899_v51 = vmax.f32 %v897_v49, %v898_v45  ;;  %v1072_v28 = vmax.f32 %v1070_v34, %v1071_v6  ;;  %v8770_v4 = vld [vmem:[#allocation137_spill] sm:$0xff]  ;;  %v8771_v34 = vld [vmem:[#allocation119_spill] sm:$0xff]  ;;  %8783 = vst [vmem:[#allocation111_spill] sm:$0xff] %v5891_v46 }
 0x314   : > { %v5851_v2 = vsel %vm434_vm1, %v2237_v12, -inf  ;;  %v8766_v56 = vmov 23   ;;  %v1245_v30 = vmax.f32 %v1243_v63, %v1244_v24  ;;  %v8769_v1 = vmax.f32 %v8767_v39, %v8768_v36  ;;  %v8772_v11 = vld [vmem:[#allocation171_spill] sm:$0xff]  ;;  %v3801_v12 = vld [vmem:[%s3874_s19 + $0x60] sm:$0xff]  ;;  %v5879_v36 = vpop.permute.xlu1 %2578 }
 0x315   : > { %3758 = vset.pattern.permute.xlu2 %v8766_v56  ;;  %3757 = vset.pattern.permute.xlu1 %v8766_v56  ;;  %v1731_v53 = vadd.f32 %v8770_v4, %v8711_v50  ;;  %v2111_v59 = vrot.slane %v2110_v7, 2  ;;  %v5861_v16 = vsel %vm434_vm1, %v2246_v42, -inf  ;;  %v5864_v49 = vsel %vm434_vm1, %v2421_v14, -inf  ;;  %v3799_v6 = vld [vmem:[%s4199_s22 + $0x48] sm:$0xff]  ;;  %v8776_v56 = vld [vmem:[#allocation170_spill] sm:$0xff]  ;;  %8777 = vst [vmem:[#allocation245_spill] sm:$0xff] %v5879_v36 }
 0x316   : > { %v1587_v58 = vmax.f32 %v8769_v1, %v1582_v52  ;;  %v2239_v45 = vadd.f32 %v8772_v11, %v8771_v34  ;;  %592 = vmatmul.f32.gmra.mxu3 %v3799_v6  ;;  %v3800_v63 = vld [vmem:[%s3874_s19 + $0x68] sm:$0xff]  ;;  %3258 = vperm.xlu1 %3757, %v3801_v12   ;;  %v1418_v24 = vmax.f32 %v1416_v19, %v1417_v9  ;;  %v8773_v52 = vld [vmem:[#allocation112_spill] sm:$0xff]  ;;  %v727_v1 = vrot.slane %v726_v25, 2 }
 0x317   : > { %3262 = vperm.xlu2 %3758, %v3800_v63   ;;  %v1729_v17 = vadd.f32 %v8773_v52, %v8762_v44  ;;  %v1730_v42 = vadd.f32 %v8774_v61, %v8716_v23  ;;  %v2260_v14 = vmax.f32 %v5851_v2, %v8775_v22  ;;  %v2249_v39 = vadd.f32 %v8776_v56, %v8716_v23  ;;  %v8779_v22 = vld [vmem:[#allocation163_spill] sm:$0xff]  ;;  %v8785_v4 = vld [vmem:[#allocation244_spill] sm:$0xff] }
 0x318   : > { %v1589_v13 = vmax.f32 %v1587_v58, %v1588_v43  ;;  %v900_v6 = vrot.slane %v899_v51, 2  ;;  %v1073_v9 = vrot.slane %v1072_v28, 2  ;;  %v1246_v43 = vrot.slane %v1245_v30, 2  ;;  %v8787_v61 = vld [vmem:[#allocation228_spill] sm:$0xff] }
 0x319   : > { %v1758_v58 = vsel %vm434_vm1, %v1731_v53, -inf  ;;  %v2112_v63 = vmax.f32 %v2110_v7, %v2111_v59  ;;  %v2255_v12 = vsel %vm434_vm1, %v2239_v45, -inf  ;;  %v2242_v2 = vadd.f32 %v8778_v35, %v8523_v18  ;;  %v5898_v59 = vpop.permute.xlu2 %3226 }
 0x31a   : > { %v8782_v55 = vmax.f32 %v8780_v62, %v8781_v15  ;;  %v1419_v60 = vrot.slane %v1418_v24, 2  ;;  %v1590_v19 = vrot.slane %v1589_v13, 4  ;;  %v1754_v11 = vsel %vm434_vm1, %v1729_v17, -inf  ;;  %8784 = vst [vmem:[#allocation176_spill] sm:$0xff] %v5898_v59 }
 0x31b   : > { %v1756_v53 = vsel %vm434_vm1, %v1730_v42, -inf  ;;  %v5896_v7 = vsel %vm434_vm1, %v2249_v39, -inf  ;;  %v728_v45 = vmax.f32 %v726_v25, %v727_v1  ;;  %v901_v35 = vmax.f32 %v899_v51, %v900_v6  ;;  %v8788_v42 = vld [vmem:[#allocation178_spill] sm:$0xff]  ;;  %v3802_v39 = vld [vmem:[%s4199_s22 + $0x50] sm:$0xff] }
 0x31c   : > { %v1751_v56 = vmax.f32 %v8782_v55, %v8779_v22  ;;  %v2256_v15 = vmax.f32 %v8785_v4, %v2255_v12  ;;  %v1074_v62 = vmax.f32 %v1072_v28, %v1073_v9  ;;  %v1247_v55 = vmax.f32 %v1245_v30, %v1246_v43  ;;  %v8786_v22 = vld [vmem:[#allocation235_spill] sm:$0xff]  ;;  %v8790_v25 = vld [vmem:[#allocation248_spill] sm:$0xff]  ;;  %v8791_v9 = vld [vmem:[#allocation154_spill] sm:$0xff] }
 0x31d   : > { %v1752_v27 = vsel %vm434_vm1, %v8786_v22, -inf  ;;  %v2583_v17 = vadd.f32 %v8787_v61, %v8755_v40  ;;  %v2245_v52 = vadd.f32 %v8788_v42, %v8595_v8  ;;  %v1755_v33 = vmax.f32 %v8789_v57, %v1754_v11  ;;  %v8792_v22 = vld [vmem:[#allocation107_spill] sm:$0xff]  ;;  %v5916_v57 = vpop.permute.xlu1 %2904 }
 0x31e   : > { %v1759_v0 = vmax.f32 %v1751_v56, %v1758_v58  ;;  %595 = vmatmul.f32.gmra.mxu3 %v3802_v39  ;;  %v1757_v51 = vmax.f32 %v8790_v25, %v1756_v53  ;;  %v2113_v56 = vrot.slane %v2112_v63, 1  ;;  %v2261_v4 = vsel %vm434_vm1, %v2242_v2, -inf  ;;  %3270 = vperm.xlu1 %3757, %v5808_v32   ;;  %v8793_v39 = vld [vmem:[#allocation175_spill] sm:$0xff]  ;;  %8794 = vst [vmem:[#allocation164_spill] sm:$0xff] %v5916_v57  ;;  %v8795_v25 = vld [vmem:[#allocation250_spill] sm:$0xff] }
 0x31f   : > { %v1420_v28 = vmax.f32 %v1418_v24, %v1419_v60  ;;  %v1591_v30 = vmax.f32 %v1589_v13, %v1590_v19  ;;  %v729_v1 = vrot.slane %v728_v45, 1  ;;  %v902_v6 = vrot.slane %v901_v35, 1  ;;  %v8796_v60 = vld [vmem:[#allocation183_spill] sm:$0xff] }
 0x320   : > { %v1753_v43 = vmax.f32 %v8791_v9, %v1752_v27  ;;  %v1761_v58 = vmax.f32 %v1757_v51, %v1759_v0  ;;  %v2264_v12 = vmax.f32 %v2256_v15, %v5843_v47  ;;  %v2409_v61 = vadd.f32 %v8793_v39, %v8792_v22  ;;  %v8797_v0 = vld [vmem:[#allocation237_spill] sm:$0xff] }
 0x321   : > { %v1075_v11 = vrot.slane %v1074_v62, 1  ;;  %v1248_v53 = vrot.slane %v1247_v55, 1  ;;  %v2262_v2 = vmax.f32 %v8795_v25, %v2261_v4  ;;  %v2267_v32 = vsel %vm434_vm1, %v2245_v52, -inf  ;;  %v8801_v25 = vld [vmem:[#allocation232_spill] sm:$0xff] }
 0x322   : > { %v2248_v24 = vadd.f32 %v8796_v60, %v8762_v44  ;;  %v1760_v13 = vmax.f32 %v1753_v43, %v1755_v33  ;;  %v2599_v27 = vsel %vm434_vm1, %v2583_v17, -inf  ;;  %v2588_v47 = vadd.f32 %v8797_v0, %v8523_v18  ;;  %v5932_v60 = vpop.permute.xlu0 %3081 }
 0x323   : > { %v1421_v19 = vrot.slane %v1420_v28, 1  ;;  %v1592_v15 = vrot.slane %v1591_v30, 2  ;;  %v5925_v51 = vmax.f32 %v2112_v63, %v2113_v56  ;;  %v5927_v9 = vmax.f32 %v728_v45, %v729_v1  ;;  %8802 = vst [vmem:[#allocation222_spill] sm:$0xff] %v5932_v60  ;;  %v8805_v63 = vld [vmem:[#allocation149_spill] sm:$0xff]  ;;  %v5943_v56 = vpop.permute.xlu2 %3234 }
 0x324   : > { %v5929_v39 = vmax.f32 %v901_v35, %v902_v6  ;;  %v1762_v4 = vmax.f32 %v1760_v13, %v1761_v58  ;;  %v2268_v52 = vmax.f32 %v2260_v14, %v2267_v32  ;;  %v2272_v42 = vmax.f32 %v2264_v12, %v8801_v25  ;;  %8806 = vst [vmem:[#allocation141_spill] sm:$0xff] %v5943_v56  ;;  %v3803_v14 = vld [vmem:[%s4199_s22 + $0x58] sm:$0xff]  ;;  %v8813_v25 = vld [vmem:[#allocation126_spill] sm:$0xff]  ;;  %v8819_v12 = vld [vmem:[#allocation103_spill] sm:$0xff] }
 0x325   : > { %8798 = vst [vmem:[#allocation145_spill] sm:$0xff] %v5925_v51  ;;  %v5934_v33 = vmax.f32 %v1074_v62, %v1075_v11  ;;  %v5936_v17 = vmax.f32 %v1247_v55, %v1248_v53  ;;  %v2270_v43 = vmax.f32 %v2262_v2, %v5861_v16  ;;  %v2425_v0 = vsel %vm434_vm1, %v2409_v61, -inf  ;;  %v8807_v62 = vld [vmem:[#allocation179_spill] sm:$0xff] }
 0x326   : > { %8799 = vst [vmem:[#allocation155_spill] sm:$0xff] %v5927_v9  ;;  %v2589_v45 = vadd.f32 %v8805_v63, %v8750_v26  ;;  %v2273_v35 = vsel %vm434_vm1, %v2248_v24, -inf  ;;  %598 = vmatmul.f32.gmra.mxu3 %v3803_v14  ;;  %v2607_v1 = vsel %vm434_vm1, %v2588_v47, -inf  ;;  %v2412_v6 = vadd.f32 %v8807_v62, %v8771_v34  ;;  %v8816_v14 = vld [vmem:[#allocation131_spill] sm:$0xff]  ;;  %v8821_v63 = vld [vmem:[#allocation156_spill] sm:$0xff] }
 0x327   : > { %8800 = vst [vmem:[#allocation226_spill] sm:$0xff] %v5929_v39  ;;  %v5949_v55 = vmax.f32 %v1420_v28, %v1421_v19  ;;  %v1593_v58 = vmax.f32 %v1591_v30, %v1592_v15  ;;  %v1763_v11 = vrot.slane %v1762_v4, 4  ;;  %v8809_v53 = vmax.f32 %v5864_v49, %v5845_v41  ;;  %v5964_v19 = vpop.permute.xlu1 %3210  ;;  %v8817_v15 = vld [vmem:[#allocation150_spill] sm:$0xff]  ;;  %v8818_v49 = vld [vmem:[#allocation121_spill] sm:$0xff]  ;;  %v8820_v61 = vld [vmem:[#allocation203_spill] sm:$0xff] }
 0x328   : > { %8803 = vst [vmem:[#allocation246_spill] sm:$0xff] %v5934_v33  ;;  %v2276_v32 = vmax.f32 %v2268_v52, %v5896_v7  ;;  %v2274_v24 = vmax.f32 %v5838_v20, %v2273_v35  ;;  %v2278_v30 = vmax.f32 %v2270_v43, %v5848_v37  ;;  %v2606_v13 = vmax.f32 %v2599_v27, %v2607_v1  ;;  %v8812_v20 = vld [vmem:[#allocation117_spill] sm:$0xff]  ;;  %v8814_v35 = vld [vmem:[#allocation184_spill] sm:$0xff] }
 0x329   : > { %8804 = vst [vmem:[#allocation119_spill] sm:$0xff] %v5936_v17  ;;  %v5957_v2 = vmax.f32 %v8809_v53, %v2425_v0  ;;  %v2609_v47 = vsel %vm434_vm1, %v2589_v45, -inf  ;;  %v5968_v41 = vsel %vm434_vm1, %v2412_v6, -inf  ;;  %v1594_v7 = vrot.slane %v1593_v58, 1  ;;  %v8811_v0 = vld [vmem:[#allocation138_spill] sm:$0xff]  ;;  %v8815_v43 = vld [vmem:[#allocation153_spill] sm:$0xff] }
 0x32a   : > { %8808 = vst [vmem:[#allocation163_spill] sm:$0xff] %v5949_v55  ;;  %v1898_v52 = vadd.f32 %v8812_v20, %v8811_v0  ;;  %v2414_v37 = vadd.f32 %v8814_v35, %v8813_v25  ;;  %v1764_v27 = vmax.f32 %v1762_v4, %v1763_v11  ;;  %v1899_v45 = vadd.f32 %v8815_v43, %v8595_v8  ;;  %v3804_v11 = vld [vmem:[%s4199_s22 + $0x60] sm:$0xff]  ;;  %v8831_v33 = vld [vmem:[#allocation236_spill] sm:$0xff] }
 0x32b   : > { %8810 = vst [vmem:[#allocation190_spill] sm:$0xff] %v5964_v19  ;;  %v1900_v1 = vadd.f32 %v8816_v14, %v8760_v10  ;;  %v2280_v53 = vmax.f32 %v2276_v32, %v2278_v30  ;;  %v5979_v16 = vmax.f32 %v2606_v13, %v2609_v47  ;;  %v2279_v6 = vmax.f32 %v2272_v42, %v2274_v24  ;;  %v8822_v32 = vld [vmem:[#allocation242_spill] sm:$0xff]  ;;  %v8823_v42 = vld [vmem:[#allocation251_spill] sm:$0xff]  ;;  %v5998_v13 = vpop.permute.xlu0 %3089 }
 0x32c   : > { %v5983_v28 = vadd.f32 %v8818_v49, %v8817_v15  ;;  %v2754_v51 = vadd.f32 %v8820_v61, %v8819_v12  ;;  %v2764_v4 = vadd.f32 %v5769_v29, %v8595_v8  ;;  %v5992_v35 = vsel %vm434_vm1, %v8821_v63, -inf  ;;  %8824 = vst [vmem:[#allocation198_spill] sm:$0xff] %v5998_v13  ;;  %v8826_v61 = vld [vmem:[#allocation160_spill] sm:$0xff]  ;;  %v8827_v29 = vld [vmem:[#allocation177_spill] sm:$0xff]  ;;  %v8828_v63 = vld [vmem:[#allocation206_spill] sm:$0xff] }
 0x32d   : > { %v1915_v30 = vsel %vm434_vm1, %v8822_v32, -inf  ;;  %v2593_v24 = vadd.f32 %v8823_v42, %v8817_v15  ;;  %v6000_v47 = vmax.f32 %v1593_v58, %v1594_v7  ;;  %v1902_v62 = vadd.f32 %v8826_v61, %v8762_v44  ;;  %v6011_v32 = vpop.permute.xlu2 %2743  ;;  %v8830_v42 = vld [vmem:[#allocation229_spill] sm:$0xff]  ;;  %v8832_v7 = vld [vmem:[#allocation187_spill] sm:$0xff]  ;;  %v8833_v61 = vld [vmem:[#allocation238_spill] sm:$0xff] }
 0x32e   : > { %601 = vmatmul.f32.gmra.mxu3 %v3804_v11  ;;  %v1917_v11 = vsel %vm434_vm1, %v8827_v29, -inf  ;;  %v6007_v55 = vsel %vm434_vm1, %v2414_v37, -inf  ;;  %v2756_v49 = vadd.f32 %v8828_v63, %v8755_v40  ;;  %8829 = vst [vmem:[#allocation235_spill] sm:$0xff] %v6011_v32  ;;  %v1765_v17 = vrot.slane %v1764_v27, 2  ;;  %v8834_v29 = vld [vmem:[#allocation194_spill] sm:$0xff]  ;;  %v8835_v63 = vld [vmem:[#allocation212_spill] sm:$0xff] }
 0x32f   : > { %8825 = vst [vmem:[#allocation244_spill] sm:$0xff] %v6000_v47  ;;  %v1910_v14 = vmax.f32 %v8831_v33, %v8830_v42  ;;  %v2281_v58 = vmax.f32 %v2279_v6, %v2280_v53  ;;  %v2408_v43 = vadd.f32 %v8832_v7, %v8819_v12  ;;  %v1914_v39 = vmax.f32 %v8833_v61, %v5992_v35  ;;  %v6024_v57 = vpop.permute.xlu1 %3222  ;;  %v8838_v6 = vld [vmem:[#allocation159_spill] sm:$0xff]  ;;  %v8839_v42 = vld [vmem:[#allocation214_spill] sm:$0xff] }
 0x330   : > { %v1916_v9 = vmax.f32 %v8834_v29, %v1915_v30  ;;  %v2770_v37 = vsel %vm434_vm1, %v2754_v51, -inf  ;;  %v2786_v20 = vsel %vm434_vm1, %v2764_v4, -inf  ;;  %v2761_v38 = vadd.f32 %v8835_v63, %v8523_v18  ;;  %8836 = vst [vmem:[#allocation193_spill] sm:$0xff] %v6024_v57  ;;  %v8837_v51 = vld [vmem:[#allocation115_spill] sm:$0xff]  ;;  %v8845_v57 = vld [vmem:[#allocation240_spill] sm:$0xff] }
 0x331   : > { %v6026_v48 = vmax.f32 %v1910_v14, %v1917_v11  ;;  %v2617_v53 = vsel %vm434_vm1, %v2593_v24, -inf  ;;  %v1919_v35 = vsel %vm434_vm1, %v1898_v52, -inf  ;;  %v2757_v4 = vadd.f32 %v8838_v6, %v8837_v51  ;;  %v8840_v33 = vld [vmem:[#allocation135_spill] sm:$0xff]  ;;  %v8841_v52 = vld [vmem:[#allocation209_spill] sm:$0xff] }
 0x332   : > { %v2772_v30 = vsel %vm434_vm1, %v2756_v49, -inf  ;;  %v2755_v29 = vadd.f32 %v8839_v42, %v8792_v22  ;;  %v1766_v14 = vmax.f32 %v1764_v27, %v1765_v17  ;;  %v2282_v11 = vrot.slane %v2281_v58, 4  ;;  %v3805_v49 = vld [vmem:[%s4199_s22 + $0x68] sm:$0xff]  ;;  %v8842_v42 = vld [vmem:[#allocation125_spill] sm:$0xff] }
 0x333   : > { %v2424_v63 = vsel %vm434_vm1, %v2408_v43, -inf  ;;  %v2775_v7 = vmax.f32 %v2770_v37, %v2786_v20  ;;  %v1903_v24 = vadd.f32 %v8840_v33, %v8716_v23  ;;  %v2768_v61 = vadd.f32 %v5829_v31, %v8716_v23  ;;  %v8843_v20 = vld [vmem:[#allocation188_spill] sm:$0xff]  ;;  %v8844_v33 = vld [vmem:[#allocation223_spill] sm:$0xff] }
 0x334   : > { %v2759_v47 = vadd.f32 %v8841_v52, %v8729_v54  ;;  %v2780_v6 = vsel %vm434_vm1, %v2761_v38, -inf  ;;  %v1904_v17 = vadd.f32 %v8842_v42, %v8711_v50  ;;  %v2608_v27 = vmax.f32 %v2617_v53, %v5979_v16  ;;  %v6059_v16 = vpop.permute.xlu0 %3218 }
 0x335   : > { %v2582_v43 = vadd.f32 %v8843_v20, %v8792_v22  ;;  %v2779_v37 = vmax.f32 %v2772_v30, %v2775_v7  ;;  %v8846_v59 = vmax.f32 %v8844_v33, %v8845_v57  ;;  %v2773_v3 = vsel %vm434_vm1, %v2757_v4, -inf  ;;  %8847 = vst [vmem:[#allocation248_spill] sm:$0xff] %v6059_v16 }
 0x336   : > { %604 = vmatmul.f32.gmra.mxu3 %v3805_v49  ;;  %v2771_v52 = vsel %vm434_vm1, %v2755_v29, -inf  ;;  %v1767_v38 = vrot.slane %v1766_v14, 1  ;;  %v1923_v49 = vsel %vm434_vm1, %v1900_v1, -inf  ;;  %v2283_v56 = vmax.f32 %v2281_v58, %v2282_v11  ;;  %v8853_v11 = vld [vmem:[#allocation255_spill] sm:$0xff] }
 0x337   : > { %v1920_v31 = vmax.f32 %v8846_v59, %v1919_v35  ;;  %v2429_v42 = vmax.f32 %v2424_v63, %v5968_v41  ;;  %v2781_v19 = vmax.f32 %v2773_v3, %v2780_v6  ;;  %v1921_v53 = vsel %vm434_vm1, %v1899_v45, -inf  ;;  %v8848_v59 = vld [vmem:[#allocation216_spill] sm:$0xff]  ;;  %v6066_v35 = vpop.permute.xlu2 %3069  ;;  %v6068_v4 = vpop.permute.xlu1 %3230  ;;  %v8851_v45 = vld [vmem:[#allocation191_spill] sm:$0xff] }
 0x338   : > { %v2794_v7 = vsel %vm434_vm1, %v2768_v61, -inf  ;;  %v2776_v57 = vsel %vm434_vm1, %v2759_v47, -inf  ;;  %v2758_v33 = vadd.f32 %v8848_v59, %v8771_v34  ;;  %8849 = vst [vmem:[#allocation154_spill] sm:$0xff] %v6066_v35  ;;  %v1931_v1 = vsel %vm434_vm1, %v1904_v17, -inf  ;;  %v8852_v47 = vld [vmem:[#allocation219_spill] sm:$0xff] }
 0x339   : > { %8850 = vst [vmem:[#allocation107_spill] sm:$0xff] %v6068_v4  ;;  %v2598_v3 = vsel %vm434_vm1, %v2582_v43, -inf  ;;  %v2787_v41 = vmax.f32 %v2779_v37, %v2794_v7  ;;  %v2777_v63 = vmax.f32 %v2771_v52, %v2776_v57  ;;  %v1924_v58 = vmax.f32 %v1916_v9, %v1923_v49  ;;  %v8854_v9 = vld [vmem:[#allocation169_spill] sm:$0xff]  ;;  %v3806_v37 = vld [vmem:[%s4199_s22 + $0x70] sm:$0xff] }
 0x33a   : > { %v2411_v61 = vadd.f32 %v8851_v45, %v8837_v51  ;;  %v2760_v6 = vadd.f32 %v8852_v47, %v8813_v25  ;;  %v1927_v30 = vsel %vm434_vm1, %v1902_v62, -inf  ;;  %v1929_v29 = vsel %vm434_vm1, %v1903_v24, -inf }
 0x33b   : > { %v2928_v59 = vadd.f32 %v8853_v11, %v8792_v22  ;;  %v2785_v20 = vmax.f32 %v2781_v19, %v2787_v41  ;;  %v1922_v17 = vmax.f32 %v1914_v39, %v1921_v53  ;;  %v1932_v35 = vmax.f32 %v1924_v58, %v1931_v1  ;;  %v8856_v53 = vld [vmem:[#allocation241_spill] sm:$0xff]  ;;  %v8857_v1 = vld [vmem:[#allocation196_spill] sm:$0xff] }
 0x33c   : > { %v2774_v43 = vsel %vm434_vm1, %v2758_v33, -inf  ;;  %v2763_v52 = vadd.f32 %v8854_v9, %v8811_v0  ;;  %v6084_v49 = vmax.f32 %v1766_v14, %v1767_v38  ;;  %v1925_v62 = vsel %vm434_vm1, %v5983_v28, -inf }
 0x33d   : > { %v2284_v7 = vrot.slane %v2283_v56, 2  ;;  %v2783_v24 = vmax.f32 %v2777_v63, %v2785_v20  ;;  %v1928_v57 = vmax.f32 %v1920_v31, %v1927_v30  ;;  %v1930_v47 = vmax.f32 %v1922_v17, %v1929_v29  ;;  %v8859_v63 = vld [vmem:[#allocation230_spill] sm:$0xff] }
 0x33e   : > { %607 = vmatmul.f32.gmra.mxu3 %v3806_v37  ;;  %8855 = vst [vmem:[#allocation250_spill] sm:$0xff] %v6084_v49  ;;  %v6088_v11 = vmax.f32 %v2598_v3, %v2608_v27  ;;  %v2427_v39 = vsel %vm434_vm1, %v2411_v61, -inf  ;;  %v2778_v19 = vsel %vm434_vm1, %v2760_v6, -inf  ;;  %v2762_v33 = vadd.f32 %v8856_v53, %v8750_v26  ;;  %v8860_v6 = vld [vmem:[#allocation201_spill] sm:$0xff] }
 0x33f   : > { %v2413_v14 = vadd.f32 %v8857_v1, %v8729_v54  ;;  %v2789_v38 = vmax.f32 %v2774_v43, %v2783_v24  ;;  %v1926_v41 = vmax.f32 %v6026_v48, %v1925_v62  ;;  %v1934_v28 = vmax.f32 %v1930_v47, %v1932_v35  ;;  %v6108_v17 = vpop.permute.xlu1 %2739  ;;  %v8866_v24 = vld [vmem:[#allocation182_spill] sm:$0xff] }
 0x340   : > { %v8858_v31 = vmax.f32 %v5957_v2, %v6007_v55  ;;  %v6101_v27 = vsel %vm434_vm1, %v2928_v59, -inf  ;;  %v2784_v3 = vsel %vm434_vm1, %v2763_v52, -inf  ;;  %v2765_v58 = vadd.f32 %v8859_v63, %v8760_v10  ;;  %8861 = vst [vmem:[#allocation232_spill] sm:$0xff] %v6108_v17  ;;  %v8862_v55 = vld [vmem:[#allocation192_spill] sm:$0xff] }
 0x341   : > { %v2285_v61 = vmax.f32 %v2283_v56, %v2284_v7  ;;  %v2417_v30 = vadd.f32 %v8860_v6, %v8811_v0  ;;  %v2793_v29 = vmax.f32 %v2778_v19, %v2789_v38  ;;  %v1933_v48 = vmax.f32 %v1926_v41, %v1928_v57  ;;  %v6117_v56 = vpop.permute.xlu2 %3077  ;;  %v8865_v52 = vld [vmem:[#allocation208_spill] sm:$0xff]  ;;  %v3807_v41 = vld [vmem:[%s4199_s22 + $0x78] sm:$0xff] }
 0x342   : > { %v2437_v20 = vmax.f32 %v2429_v42, %v8858_v31  ;;  %v2585_v2 = vadd.f32 %v8862_v55, %v8771_v34  ;;  %v6112_v42 = vpop.permute.xlu0 %3238  ;;  %v2782_v59 = vsel %vm434_vm1, %v2762_v33, -inf  ;;  %v2767_v47 = vadd.f32 %v6011_v32, %v8762_v44  ;;  %8864 = vst [vmem:[#allocation126_spill] sm:$0xff] %v6117_v56  ;;  %v8961_v6 = vld [vmem:[#allocation88_spill] sm:$0xff] }
 0x343   : > { %8863 = vst [vmem:[#allocation138_spill] sm:$0xff] %v6112_v42  ;;  %v2430_v43 = vsel %vm434_vm1, %v2413_v14, -inf  ;;  %v2416_v37 = vadd.f32 %v8865_v52, %v8750_v26  ;;  %v2791_v62 = vmax.f32 %v2784_v3, %v2793_v29  ;;  %v1935_v7 = vmax.f32 %v1933_v48, %v1934_v28  ;;  %v8868_v14 = vld [vmem:[#allocation199_spill] sm:$0xff] }
 0x344   : > { %v2443_v35 = vmax.f32 %v2427_v39, %v2437_v20  ;;  %v2933_v57 = vadd.f32 %v8866_v24, %v8813_v25  ;;  %v8867_v39 = vld [vmem:[#allocation197_spill] sm:$0xff]  ;;  %v2788_v33 = vsel %vm434_vm1, %v2765_v58, -inf  ;;  %v2766_v38 = vadd.f32 %v6108_v17, %v8817_v15  ;;  %v8869_v28 = vld [vmem:[#allocation211_spill] sm:$0xff]  ;;  %v8870_v17 = vld [vmem:[#allocation234_spill] sm:$0xff] }
 0x345   : > { %v2587_v19 = vadd.f32 %v8867_v39, %v8813_v25  ;;  %v2581_v31 = vadd.f32 %v8868_v14, %v8819_v12  ;;  %v2438_v20 = vsel %vm434_vm1, %v2417_v30, -inf  ;;  %v2419_v3 = vadd.f32 %v8869_v28, %v8760_v10 }
 0x346   : > { %610 = vmatmul.f32.gmra.mxu3 %v3807_v41  ;;  %v2798_v29 = vmax.f32 %v2791_v62, %v2782_v59  ;;  %v2286_v48 = vrot.slane %v2285_v61, 1  ;;  %v2601_v24 = vsel %vm434_vm1, %v2585_v2, -inf  ;;  %v2445_v32 = vmax.f32 %v2430_v43, %v2443_v35  ;;  %v8871_v2 = vld [vmem:[#allocation186_spill] sm:$0xff] }
 0x347   : > { %v2792_v58 = vsel %vm434_vm1, %v2767_v47, -inf  ;;  %v2436_v63 = vsel %vm434_vm1, %v2416_v37, -inf  ;;  %v2420_v41 = vadd.f32 %v8870_v17, %v8817_v15  ;;  %v1936_v53 = vrot.slane %v1935_v7, 4  ;;  %v6147_v37 = vpop.permute.xlu1 %2751 }
 0x348   : > { %v2795_v9 = vmax.f32 %v2788_v33, %v2798_v29  ;;  %v2951_v39 = vsel %vm434_vm1, %v2933_v57, -inf  ;;  %v2605_v30 = vsel %vm434_vm1, %v2587_v19, -inf  ;;  %v2452_v55 = vmax.f32 %v2445_v32, %v2438_v20  ;;  %8872 = vst [vmem:[#allocation150_spill] sm:$0xff] %v6147_v37  ;;  %v8873_v33 = vld [vmem:[#allocation243_spill] sm:$0xff]  ;;  %v8874_v57 = vld [vmem:[#allocation202_spill] sm:$0xff] }
 0x349   : > { %v2790_v59 = vsel %vm434_vm1, %v2766_v38, -inf  ;;  %v2597_v62 = vsel %vm434_vm1, %v2581_v31, -inf  ;;  %v2442_v35 = vsel %vm434_vm1, %v2419_v3, -inf  ;;  %v2423_v47 = vadd.f32 %v8871_v2, %v8711_v50  ;;  %v8875_v31 = vld [vmem:[#allocation254_spill] sm:$0xff] }
 0x34a   : > { %v2797_v43 = vmax.f32 %v2792_v58, %v2795_v9  ;;  %v2936_v29 = vadd.f32 %v8873_v33, %v8811_v0  ;;  %v2584_v14 = vadd.f32 %v8874_v57, %v8837_v51  ;;  %v2451_v19 = vmax.f32 %v2436_v63, %v2452_v55  ;;  %v6160_v28 = vpop.permute.xlu0 %3242  ;;  %v6162_v33 = vpop.permute.xlu2 %2916 }
 0x34b   : > { %v2769_v32 = vadd.f32 %v6147_v37, %v8711_v50  ;;  %v2444_v38 = vsel %vm434_vm1, %v2420_v41, -inf  ;;  %v2422_v20 = vadd.f32 %v8875_v31, %v8716_v23  ;;  %v1937_v2 = vmax.f32 %v1935_v7, %v1936_v53  ;;  %8877 = vst [vmem:[#allocation156_spill] sm:$0xff] %v6160_v28  ;;  %v8879_v37 = vld [vmem:[#allocation205_spill] sm:$0xff] }
 0x34c   : > { %v2799_v3 = vmax.f32 %v2790_v59, %v2797_v43  ;;  %v6158_v9 = vmax.f32 %v2285_v61, %v2286_v48  ;;  %v2602_v58 = vmax.f32 %v2597_v62, %v2601_v24  ;;  %v2441_v17 = vmax.f32 %v2442_v35, %v2451_v19  ;;  %8878 = vst [vmem:[#allocation242_spill] sm:$0xff] %v6162_v33  ;;  %v8880_v48 = vld [vmem:[#allocation215_spill] sm:$0xff]  ;;  %v8881_v62 = vld [vmem:[#allocation218_spill] sm:$0xff]  ;;  %v6179_v35 = vpop.f32.mrf.mxu3 }
 0x34d   : > { %v2796_v63 = vsel %vm434_vm1, %v2769_v32, -inf  ;;  %v2950_v55 = vmax.f32 %v6101_v27, %v2951_v39  ;;  %v2586_v41 = vadd.f32 %v8879_v37, %v8729_v54  ;;  %v2450_v57 = vsel %vm434_vm1, %v2423_v47, -inf  ;;  %v8883_v32 = vld [vmem:[#allocation224_spill] sm:$0xff] }
 0x34e   : > { %8876 = vst [vmem:[#allocation103_spill] sm:$0xff] %v6158_v9  ;;  %v6169_v31 = vmax.f32 %v2796_v63, %v2799_v3  ;;  %v2614_v53 = vmax.f32 %v2605_v30, %v6088_v11  ;;  %v2957_v61 = vsel %vm434_vm1, %v2936_v29, -inf  ;;  %v2600_v7 = vsel %vm434_vm1, %v2584_v14, -inf  ;;  %v8882_v30 = vld [vmem:[#allocation220_spill] sm:$0xff] }
 0x34f   : > { %v2449_v24 = vmax.f32 %v2441_v17, %v2444_v38  ;;  %v2591_v59 = vadd.f32 %v8880_v48, %v8595_v8  ;;  %v2927_v27 = vadd.f32 %v8881_v62, %v8819_v12  ;;  %v2448_v39 = vsel %vm434_vm1, %v2422_v20, -inf }
 0x350   : > { %v1938_v47 = vrot.slane %v1937_v2, 2  ;;  %v2612_v43 = vmax.f32 %v2602_v58, %v2614_v53  ;;  %v3103_v11 = vadd.f32 %v5891_v46, %v8837_v51  ;;  %v2930_v29 = vadd.f32 %v8882_v30, %v8837_v51 }
 0x351   : > { %v2453_v14 = vmax.f32 %v2449_v24, %v2450_v57  ;;  %v2603_v17 = vsel %vm434_vm1, %v2586_v41, -inf  ;;  %v3280_v19 = vadd.f32 %v6112_v42, %v8523_v18  ;;  %v2590_v38 = vadd.f32 %v8883_v32, %v8811_v0  ;;  %v233_v41 = vld [vmem:[%s7832_s2 + $0x40] sm:$0xff] }
 0x352   : > { %v2952_v58 = vmax.f32 %v2957_v61, %v2950_v55  ;;  %v2616_v63 = vmax.f32 %v2600_v7, %v2612_v43  ;;  %v2613_v46 = vsel %vm434_vm1, %v2591_v59, -inf  ;;  %v2943_v30 = vsel %vm434_vm1, %v2927_v27, -inf  ;;  %v8884_v61 = vld [vmem:[#allocation225_spill] sm:$0xff]  ;;  %v6205_v59 = vpop.permute.xlu1 %3073  ;;  %3422 = vmatpush.msrb.mxu0 %v233_v41  ;;  %3658 = vmatpush.msrb.mxu2 %v233_v41  ;;  %v6217_v9 = vpop.permute.xlu2 %2924  ;;  %v8890_v41 = vld [vmem:[#allocation247_spill] sm:$0xff] }
 0x353   : > { %v2454_v53 = vmax.f32 %v2448_v39, %v2453_v14  ;;  %v3275_v57 = vadd.f32 %v6059_v16, %v8755_v40  ;;  %v1939_v24 = vmax.f32 %v1937_v2, %v1938_v47  ;;  %v6200_v20 = vsel %vm434_vm1, %v3103_v11, -inf  ;;  %8885 = vst [vmem:[#allocation177_spill] sm:$0xff] %v6205_v59  ;;  %v8886_v47 = vld [vmem:[#allocation231_spill] sm:$0xff] }
 0x354   : > { %v2622_v42 = vmax.f32 %v2603_v17, %v2616_v63  ;;  %v2946_v55 = vsel %vm434_vm1, %v2930_v29, -inf  ;;  %v2932_v7 = vadd.f32 %v8884_v61, %v8729_v54  ;;  %v3299_v27 = vsel %vm434_vm1, %v3280_v19, -inf  ;;  %v6213_v29 = vpop.permute.xlu0 %3266  ;;  %v8888_v17 = vld [vmem:[#allocation239_spill] sm:$0xff]  ;;  %8889 = vst [vmem:[#allocation236_spill] sm:$0xff] %v6217_v9  ;;  %v6224_v16 = vpop.f32.mrf.mxu3 }
 0x355   : > { %v2611_v39 = vsel %vm434_vm1, %v2590_v38, -inf  ;;  %v3281_v2 = vadd.f32 %v6160_v28, %v8750_v26  ;;  %v2592_v43 = vadd.f32 %v8886_v47, %v8760_v10  ;;  %v2948_v14 = vmax.f32 %v2943_v30, %v2952_v58  ;;  %8887 = vst [vmem:[#allocation229_spill] sm:$0xff] %v6213_v29  ;;  %v8891_v47 = vld [vmem:[#allocation172_spill] sm:$0xff] }
 0x356   : > { %v2618_v11 = vmax.f32 %v2613_v46, %v2622_v42  ;;  %v2929_v63 = vadd.f32 %v8888_v17, %v8755_v40  ;;  %v2455_v3 = vrot.slane %v2454_v53, 4  ;;  %v3111_v19 = vadd.f32 %v5932_v60, %v8760_v10 }
 0x357   : > { %v3291_v38 = vsel %vm434_vm1, %v3275_v57, -inf  ;;  %v2595_v28 = vadd.f32 %v8890_v41, %v8716_v23  ;;  %v1940_v46 = vrot.slane %v1939_v24, 1  ;;  %v2954_v42 = vmax.f32 %v2946_v55, %v2948_v14  ;;  %v8892_v55 = vld [vmem:[#allocation249_spill] sm:$0xff] }
 0x358   : > { %v3298_v30 = vmax.f32 %v3291_v38, %v3299_v27  ;;  %v2620_v58 = vmax.f32 %v2611_v39, %v2618_v11  ;;  %v2949_v61 = vsel %vm434_vm1, %v2932_v7, -inf  ;;  %v3301_v17 = vsel %vm434_vm1, %v3281_v2, -inf  ;;  %v8893_v2 = vld [vmem:[#allocation130_spill] sm:$0xff] }
 0x359   : > { %v2615_v62 = vsel %vm434_vm1, %v2592_v43, -inf  ;;  %v3287_v60 = vadd.f32 %v6213_v29, %v8716_v23  ;;  %v2594_v57 = vadd.f32 %v5825_v21, %v8762_v44  ;;  %v2945_v41 = vsel %vm434_vm1, %v2929_v63, -inf }
 0x35a   : > { %v2931_v48 = vadd.f32 %v8891_v47, %v8771_v34  ;;  %v2934_v27 = vadd.f32 %v8892_v55, %v8523_v18  ;;  %v2456_v39 = vmax.f32 %v2454_v53, %v2455_v3  ;;  %v2956_v7 = vmax.f32 %v2949_v61, %v2954_v42 }
 0x35b   : > { %v3107_v11 = vadd.f32 %v8893_v2, %v8523_v18  ;;  %v2621_v43 = vsel %vm434_vm1, %v2595_v28, -inf  ;;  %v2596_v14 = vadd.f32 %v5879_v36, %v8711_v50  ;;  %v3134_v38 = vsel %vm434_vm1, %v3111_v19, -inf  ;;  %v6256_v2 = vpop.permute.xlu1 %2912 }
 0x35c   : > { %v3113_v63 = vadd.f32 %v5998_v13, %v8762_v44  ;;  %v2625_v29 = vmax.f32 %v2615_v62, %v2620_v58  ;;  %v6246_v47 = vmax.f32 %v1939_v24, %v1940_v46  ;;  %v6248_v21 = vmax.f32 %v3301_v17, %v3298_v30  ;;  %8895 = vst [vmem:[#allocation194_spill] sm:$0xff] %v6256_v2  ;;  %v8896_v62 = vld [vmem:[#allocation252_spill] sm:$0xff]  ;;  %v6264_v30 = vpop.f32.mrf.mxu3  ;;  %v6272_v13 = vpop.permute.xlu2 %3250 }
 0x35d   : > { %v6251_v3 = vsel %vm434_vm1, %v3287_v60, -inf  ;;  %v2962_v53 = vmax.f32 %v2945_v41, %v2956_v7  ;;  %v2619_v18 = vsel %vm434_vm1, %v2594_v57, -inf  ;;  %v2947_v28 = vsel %vm434_vm1, %v2931_v48, -inf  ;;  %v8897_v17 = vld [vmem:[#allocation256_spill] sm:$0xff]  ;;  %v8898_v48 = vld [vmem:[#allocation227_spill] sm:$0xff]  ;;  %v8899_v57 = vld [vmem:[#allocation233_spill] sm:$0xff] }
 0x35e   : > { %8894 = vst [vmem:[#allocation238_spill] sm:$0xff] %v6246_v47  ;;  %v2953_v61 = vsel %vm434_vm1, %v2934_v27, -inf  ;;  %v2457_v42 = vrot.slane %v2456_v39, 2  ;;  %v2624_v19 = vmax.f32 %v2621_v43, %v2625_v29  ;;  %v3100_v24 = vadd.f32 %v8896_v62, %v8819_v12  ;;  %v8900_v27 = vld [vmem:[#allocation257_spill] sm:$0xff] }
 0x35f   : > { %v3102_v46 = vadd.f32 %v8897_v17, %v8755_v40  ;;  %v3126_v60 = vsel %vm434_vm1, %v3107_v11, -inf  ;;  %v2623_v41 = vsel %vm434_vm1, %v2596_v14, -inf  ;;  %v3105_v58 = vadd.f32 %v8898_v48, %v8729_v54  ;;  %8901 = vst [vmem:[#allocation115_spill] sm:$0xff] %v6272_v13 }
 0x360   : > { %v3101_v29 = vadd.f32 %v8899_v57, %v8792_v22  ;;  %v3104_v7 = vadd.f32 %v8900_v27, %v8771_v34  ;;  %v2626_v43 = vmax.f32 %v2619_v18, %v2624_v19  ;;  %v6275_v40 = vsel %vm434_vm1, %v3113_v63, -inf }
 0x361   : > { %8902 = vst [vmem:[#allocation223_spill] sm:$0xff] %v6275_v40  ;;  %v2960_v11 = vmax.f32 %v2947_v28, %v2962_v53  ;;  %v2935_v14 = vadd.f32 %v5734_v5, %v8750_v26  ;;  %v3306_v48 = vmax.f32 %v6251_v3, %v6248_v21  ;;  %v6282_v62 = vmax.f32 %v2456_v39, %v2457_v42  ;;  %v8904_v53 = vld [vmem:[#allocation190_spill] sm:$0xff]  ;;  %v8906_v42 = vld [vmem:[#allocation259_spill] sm:$0xff] }
 0x362   : > { %v3127_v57 = vmax.f32 %v6200_v20, %v3126_v60  ;;  %v2627_v27 = vmax.f32 %v2623_v41, %v2626_v43  ;;  %v6286_v19 = vsel %vm434_vm1, %v3100_v24, -inf  ;;  %v6289_v63 = vsel %vm434_vm1, %v3102_v46, -inf  ;;  %v8905_v20 = vld [vmem:[#allocation141_spill] sm:$0xff]  ;;  %v8907_v46 = vld [vmem:[#allocation176_spill] sm:$0xff] }
 0x363   : > { %8903 = vst [vmem:[#allocation240_spill] sm:$0xff] %v6282_v62  ;;  %v2958_v18 = vmax.f32 %v2953_v61, %v2960_v11  ;;  %v3273_v28 = vadd.f32 %v8904_v53, %v8819_v12  ;;  %v6294_v17 = vsel %vm434_vm1, %v3105_v58, -inf  ;;  %v6297_v21 = vsel %vm434_vm1, %v3101_v29, -inf  ;;  %v8908_v58 = vld [vmem:[#allocation260_spill] sm:$0xff] }
 0x364   : > { %v6300_v39 = vsel %vm434_vm1, %v3104_v7, -inf  ;;  %v3279_v3 = vadd.f32 %v8905_v20, %v8813_v25  ;;  %v2955_v61 = vsel %vm434_vm1, %v2935_v14, -inf  ;;  %v3106_v24 = vadd.f32 %v8906_v42, %v8813_v25  ;;  %v8909_v25 = vld [vmem:[#allocation164_spill] sm:$0xff] }
 0x365   : > { %v3277_v12 = vadd.f32 %v8907_v46, %v8771_v34  ;;  %v2801_v60 = vrot.slane %v6169_v31, 4  ;;  %v2938_v29 = vadd.f32 %v8908_v58, %v8760_v10  ;;  %v2628_v7 = vrot.slane %v2627_v27, 4  ;;  %v6322_v46 = vpop.f32.mrf.mxu3 }
 0x366   : > { %v6313_v43 = vmax.f32 %v3127_v57, %v3134_v38  ;;  %v3123_v11 = vmax.f32 %v6297_v21, %v6294_v17  ;;  %v3121_v14 = vmax.f32 %v6286_v19, %v6300_v39  ;;  %v2937_v20 = vadd.f32 %v8909_v25, %v8595_v8  ;;  %v3808_v17 = vld [vmem:[%s7832_s2 + $0x60] sm:$0xff]  ;;  %v6332_v19 = vpop.permute.xlu1 %2920  ;;  %v8911_v39 = vld [vmem:[#allocation193_spill] sm:$0xff] }
 0x367   : > { %v3289_v34 = vsel %vm434_vm1, %v3273_v28, -inf  ;;  %v2966_v41 = vmax.f32 %v2958_v18, %v2955_v61  ;;  %v3297_v53 = vsel %vm434_vm1, %v3279_v3, -inf  ;;  %v3278_v38 = vadd.f32 %v6068_v4, %v8729_v54  ;;  %8910 = vst [vmem:[#allocation261_spill] sm:$0xff] %v6332_v19  ;;  %v8912_v54 = vld [vmem:[#allocation134_spill] sm:$0xff] }
 0x368   : > { %v6330_v57 = vperm.slane %v3808_v17, 1  ;;  %v3124_v21 = vsel %vm434_vm1, %v3106_v24, -inf  ;;  %v3293_v28 = vsel %vm434_vm1, %v3277_v12, -inf  ;;  %v3276_v18 = vadd.f32 %v8911_v39, %v8837_v51  ;;  %v6342_v17 = vpop.permute.xlu2 %3085  ;;  %v8914_v24 = vld [vmem:[#allocation154_spill] sm:$0xff] }
 0x369   : > { %v2802_v3 = vmax.f32 %v6169_v31, %v2801_v60  ;;  %v2961_v61 = vsel %vm434_vm1, %v2938_v29, -inf  ;;  %v3274_v4 = vadd.f32 %v8912_v54, %v8792_v22  ;;  %v2629_v62 = vmax.f32 %v2627_v27, %v2628_v7  ;;  %8913 = vst [vmem:[#allocation262_spill] sm:$0xff] %v6342_v17  ;;  %v232_v29 = vld [vmem:[%s7832_s2 + $0x38] sm:$0xff] }
 0x36a   : > { %v3294_v42 = vmax.f32 %v3289_v34, %v3293_v28  ;;  %v2959_v58 = vsel %vm434_vm1, %v2937_v20, -inf  ;;  %v3314_v25 = vmax.f32 %v3306_v48, %v3297_v53  ;;  %v3108_v12 = vadd.f32 %v8914_v24, %v8750_v26  ;;  %3423 = vmatpush.msrb.mxu0 %v232_v29  ;;  %3659 = vmatpush.msrb.mxu2 %v232_v29 }
 0x36b   : > { %v2940_v51 = vadd.f32 %v6162_v33, %v8762_v44  ;;  %v3295_v31 = vsel %vm434_vm1, %v3278_v38, -inf  ;;  %v3110_v60 = vadd.f32 %v6117_v56, %v8595_v8  ;;  %v2942_v22 = vadd.f32 %v6217_v9, %v8711_v50 }
 0x36c   : > { %v6356_v27 = vadd.f32 %v6179_v35, %v6330_v57  ;;  %v2970_v20 = vmax.f32 %v2961_v61, %v2966_v41  ;;  %v3292_v48 = vsel %vm434_vm1, %v3276_v18, -inf  ;;  %v2803_v53 = vrot.slane %v2802_v3, 2 }
 0x36d   : > { %v3109_v26 = vadd.f32 %v6205_v59, %v8811_v0  ;;  %v3125_v7 = vmax.f32 %v6289_v63, %v3124_v21  ;;  %v3290_v34 = vsel %vm434_vm1, %v3274_v4, -inf  ;;  %v2630_v38 = vrot.slane %v2629_v62, 2  ;;  %v578_v39 = vpop.f32.mrf.mxu3  ;;  %v8916_v63 = vld [vmem:[#allocation14_spill] sm:$0xff] }
 0x36e   : > { %8915 = vst [vmem:[#allocation263_spill] sm:$0xff] %v6356_v27  ;;  %v3304_v28 = vmax.f32 %v3294_v42, %v3314_v25  ;;  %v2964_v35 = vmax.f32 %v2959_v58, %v2970_v20  ;;  %v3128_v41 = vsel %vm434_vm1, %v3108_v12, -inf  ;;  %v3296_v18 = vmax.f32 %v3290_v34, %v3295_v31  ;;  %v8926_v34 = vld [vmem:[#allocation64_spill] sm:$0xff] }
 0x36f   : > { %v2965_v61 = vsel %vm434_vm1, %v2940_v51, -inf  ;;  %v3132_v56 = vsel %vm434_vm1, %v3110_v60, -inf  ;;  %v2969_v59 = vsel %vm434_vm1, %v2942_v22, -inf  ;;  %v731_v21 = vadd.f32 %v8916_v63, %v6356_v27  ;;  %v6383_v60 = vpop.permute.xlu1 %3246  ;;  %v8921_v22 = vld [vmem:[#allocation16_spill] sm:$0xff] }
 0x370   : > { %v3312_v54 = vmax.f32 %v3304_v28, %v3292_v48  ;;  %v2804_v4 = vmax.f32 %v2802_v3, %v2803_v53  ;;  %v3130_v42 = vsel %vm434_vm1, %v3109_v26, -inf  ;;  %v3283_v58 = vadd.f32 %v6272_v13, %v8595_v8  ;;  %8920 = vst [vmem:[#allocation266_spill] sm:$0xff] %v6383_v60  ;;  %v8922_v8 = vld [vmem:[#allocation49_spill] sm:$0xff] }
 0x371   : > { %v6377_v25 = vadd.f32 %v6224_v16, %v6330_v57  ;;  %v6379_v12 = vmax.f32 %v2629_v62, %v2630_v38  ;;  %v6381_v51 = vmax.f32 %v3121_v14, %v3128_v41  ;;  %v2971_v31 = vmax.f32 %v2964_v35, %v2965_v61  ;;  %v8923_v16 = vld [vmem:[#allocation40_spill] sm:$0xff]  ;;  %v6397_v14 = vpop.permute.xlu2 %3097  ;;  %v8927_v28 = vld [vmem:[#allocation97_spill] sm:$0xff] }
 0x372   : > { %v904_v20 = vadd.f32 %v8921_v22, %v6356_v27  ;;  %v6387_v3 = vmax.f32 %v3296_v18, %v3312_v54  ;;  %v6389_v48 = vmax.f32 %v3125_v7, %v3132_v56  ;;  %v1077_v53 = vadd.f32 %v8922_v8, %v6356_v27  ;;  %8925 = vst [vmem:[#allocation49_spill] sm:$0xff] %v6397_v14  ;;  %v8928_v7 = vld [vmem:[#allocation18_spill] sm:$0xff] }
 0x373   : > { %8917 = vst [vmem:[#allocation14_spill] sm:$0xff] %v6377_v25  ;;  %v1250_v26 = vadd.f32 %v8923_v16, %v6356_v27  ;;  %v2968_v62 = vmax.f32 %v2969_v59, %v2971_v31  ;;  %v6395_v29 = vmax.f32 %v3123_v11, %v3130_v42  ;;  %v1423_v38 = vadd.f32 %v8926_v34, %v6356_v27  ;;  %v8929_v11 = vld [vmem:[#allocation10_spill] sm:$0xff]  ;;  %v8930_v42 = vld [vmem:[#allocation33_spill] sm:$0xff] }
 0x374   : > { %8918 = vst [vmem:[#allocation264_spill] sm:$0xff] %v6379_v12  ;;  %v1596_v54 = vadd.f32 %v8927_v28, %v6356_v27  ;;  %v2805_v35 = vrot.slane %v2804_v4, 1  ;;  %v6404_v56 = vsel %vm434_vm1, %v3283_v58, -inf  ;;  %v732_v41 = vadd.f32 %v8928_v7, %v6377_v25 }
 0x375   : > { %8919 = vst [vmem:[#allocation265_spill] sm:$0xff] %v6381_v51  ;;  %v6409_v18 = vsel %vm434_vm1, %v731_v21, -inf  ;;  %v2939_v59 = vadd.f32 %v6256_v2, %v8817_v15  ;;  %v905_v61 = vadd.f32 %v8929_v11, %v6377_v25  ;;  %v6416_v63 = vsel %vm434_vm1, %v904_v20, -inf  ;;  %v581_v21 = vpop.f32.mrf.mxu3 }
 0x376   : > { %8924 = vst [vmem:[#allocation16_spill] sm:$0xff] %v6395_v29  ;;  %v1078_v31 = vadd.f32 %v8930_v42, %v6377_v25  ;;  %v3112_v58 = vadd.f32 %v6342_v17, %v8817_v15  ;;  %v6424_v22 = vadd.f32 %v6264_v30, %v6330_v57  ;;  %v6427_v8 = vsel %vm434_vm1, %v1077_v53, -inf  ;;  %v8935_v42 = vld [vmem:[#allocation57_spill] sm:$0xff]  ;;  %v8943_v17 = vld [vmem:[#allocation50_spill] sm:$0xff] }
 0x377   : > { %v6430_v16 = vsel %vm434_vm1, %v1250_v26, -inf  ;;  %v3302_v34 = vmax.f32 %v6404_v56, %v6387_v3  ;;  %v6437_v28 = vsel %vm434_vm1, %v1423_v38, -inf  ;;  %v6440_v7 = vsel %vm434_vm1, %v1596_v54, -inf  ;;  %v8934_v26 = vld [vmem:[#allocation66_spill] sm:$0xff] }
 0x378   : > { %8931 = vst [vmem:[#allocation40_spill] sm:$0xff] %v6424_v22  ;;  %v6442_v30 = vmax.f32 %v2804_v4, %v2805_v35  ;;  %v6445_v53 = vsel %vm434_vm1, %v732_v41, -inf  ;;  %v1251_v11 = vadd.f32 %v8934_v26, %v6377_v25  ;;  %v1424_v20 = vadd.f32 %v8935_v42, %v6377_v25  ;;  %v8936_v4 = vld [vmem:[#allocation81_spill] sm:$0xff] }
 0x379   : > { %8932 = vst [vmem:[#allocation64_spill] sm:$0xff] %v6440_v7  ;;  %v2963_v13 = vsel %vm434_vm1, %v2939_v59, -inf  ;;  %v6453_v3 = vsel %vm434_vm1, %v905_v61, -inf  ;;  %v6456_v38 = vsel %vm434_vm1, %v1078_v31, -inf  ;;  %v1597_v54 = vadd.f32 %v8936_v4, %v6377_v25  ;;  %v8938_v41 = vld [vmem:[#allocation5_spill] sm:$0xff]  ;;  %v8939_v59 = vld [vmem:[#allocation35_spill] sm:$0xff]  ;;  %v6475_v4 = vpop.permute.xlu1 %3254 }
 0x37a   : > { %8933 = vst [vmem:[#allocation97_spill] sm:$0xff] %v6442_v30  ;;  %v6461_v35 = vsel %vm434_vm1, %v3112_v58, -inf  ;;  %v2941_v56 = vadd.f32 %v6332_v19, %v8716_v23  ;;  %v733_v26 = vadd.f32 %v8938_v41, %v6424_v22  ;;  %v906_v42 = vadd.f32 %v8939_v59, %v6424_v22  ;;  %v8942_v58 = vld [vmem:[#allocation26_spill] sm:$0xff] }
 0x37b   : > { %8937 = vst [vmem:[#allocation18_spill] sm:$0xff] %v6461_v35  ;;  %v3115_v61 = vadd.f32 %v6397_v14, %v8711_v50  ;;  %v6473_v31 = vadd.f32 %v6322_v46, %v6330_v57  ;;  %v1079_v12 = vadd.f32 %v8942_v58, %v6424_v22  ;;  %v1252_v24 = vadd.f32 %v8943_v17, %v6424_v22  ;;  %v6489_v46 = vpop.permute.xlu2 %3262  ;;  %v8946_v58 = vld [vmem:[#allocation83_spill] sm:$0xff]  ;;  %v8947_v17 = vld [vmem:[#allocation74_spill] sm:$0xff]  ;;  %v8972_v35 = vld [vmem:[#allocation52_spill] sm:$0xff] }
 0x37c   : > { %8941 = vst [vmem:[#allocation33_spill] sm:$0xff] %v6475_v4  ;;  %v2972_v9 = vmax.f32 %v2968_v62, %v2963_v13  ;;  %v3282_v41 = vadd.f32 %v6383_v60, %v8811_v0  ;;  %v6484_v59 = vsel %vm434_vm1, %v1251_v11, -inf  ;;  %v6487_v14 = vsel %vm434_vm1, %v1424_v20, -inf }
 0x37d   : > { %8940 = vst [vmem:[#allocation10_spill] sm:$0xff] %v6473_v31  ;;  %v6492_v19 = vadd.f32 %v578_v39, %v6330_v57  ;;  %v1425_v33 = vadd.f32 %v8946_v58, %v6424_v22  ;;  %v1598_v13 = vadd.f32 %v8947_v17, %v6424_v22  ;;  %v6499_v62 = vsel %vm434_vm1, %v1597_v54, -inf  ;;  %v584_v11 = vpop.f32.mrf.mxu3  ;;  %v8949_v17 = vld [vmem:[#allocation7_spill] sm:$0xff] }
 0x37e   : > { %8944 = vst [vmem:[#allocation66_spill] sm:$0xff] %v6489_v46  ;;  %v2967_v20 = vsel %vm434_vm1, %v2941_v56, -inf  ;;  %v6505_v60 = vsel %vm434_vm1, %v733_v26, -inf  ;;  %v6508_v39 = vsel %vm434_vm1, %v906_v42, -inf  ;;  %v6511_v58 = vsel %vm434_vm1, %v3115_v61, -inf  ;;  %v8950_v42 = vld [vmem:[#allocation19_spill] sm:$0xff] }
 0x37f   : > { %8945 = vst [vmem:[#allocation57_spill] sm:$0xff] %v6492_v19  ;;  %v734_v2 = vadd.f32 %v8949_v17, %v6473_v31  ;;  %v6516_v54 = vsel %vm434_vm1, %v1079_v12, -inf  ;;  %v6519_v0 = vsel %vm434_vm1, %v1252_v24, -inf  ;;  %v3303_v56 = vsel %vm434_vm1, %v3282_v41, -inf  ;;  %v8951_v61 = vld [vmem:[#allocation36_spill] sm:$0xff]  ;;  %v8953_v17 = vld [vmem:[#allocation2_spill] sm:$0xff] }
 0x380   : > { %8948 = vst [vmem:[#allocation81_spill] sm:$0xff] %v6499_v62  ;;  %v3286_v26 = vadd.f32 %v6489_v46, %v8762_v44  ;;  %v907_v5 = vadd.f32 %v8950_v42, %v6473_v31  ;;  %v1080_v55 = vadd.f32 %v8951_v61, %v6473_v31  ;;  %v6528_v36 = vmax.f32 %v2967_v20, %v2972_v9  ;;  %v8955_v41 = vld [vmem:[#allocation12_spill] sm:$0xff]  ;;  %v8956_v46 = vld [vmem:[#allocation43_spill] sm:$0xff] }
 0x381   : > { %v735_v12 = vadd.f32 %v8953_v17, %v6492_v19  ;;  %v6533_v32 = vsel %vm434_vm1, %v1425_v33, -inf  ;;  %v6536_v24 = vsel %vm434_vm1, %v1598_v13, -inf  ;;  %v908_v42 = vadd.f32 %v8955_v41, %v6492_v19  ;;  %v8957_v9 = vld [vmem:[#allocation67_spill] sm:$0xff]  ;;  %v8960_v13 = vld [vmem:[#allocation84_spill] sm:$0xff] }
 0x382   : > { %8952 = vst [vmem:[#allocation5_spill] sm:$0xff] %v6528_v36  ;;  %v1253_v61 = vadd.f32 %v8956_v46, %v6473_v31  ;;  %v1426_v20 = vadd.f32 %v8957_v9, %v6473_v31  ;;  %v6546_v37 = vmax.f32 %v3302_v34, %v3303_v56  ;;  %v6549_v33 = vsel %vm434_vm1, %v734_v2, -inf  ;;  %v8963_v46 = vld [vmem:[#allocation29_spill] sm:$0xff]  ;;  %v6569_v56 = vpop.permute.xlu1 %3093 }
 0x383   : > { %8954 = vst [vmem:[#allocation35_spill] sm:$0xff] %v6536_v24  ;;  %v1599_v17 = vadd.f32 %v8960_v13, %v6473_v31  ;;  %v1769_v44 = vadd.f32 %v8961_v6, %v6356_v27  ;;  %v6556_v52 = vsel %vm434_vm1, %v3286_v26, -inf  ;;  %v6559_v41 = vsel %vm434_vm1, %v907_v5, -inf  ;;  %v8966_v6 = vld [vmem:[#allocation53_spill] sm:$0xff]  ;;  %v8967_v5 = vld [vmem:[#allocation60_spill] sm:$0xff] }
 0x384   : > { %8958 = vst [vmem:[#allocation26_spill] sm:$0xff] %v6546_v37  ;;  %v1081_v9 = vadd.f32 %v8963_v46, %v6492_v19  ;;  %v6564_v34 = vsel %vm434_vm1, %v1080_v55, -inf  ;;  %v6567_v2 = vadd.f32 %v581_v21, %v6330_v57  ;;  %v6572_v13 = vsel %vm434_vm1, %v735_v12, -inf  ;;  %v8968_v36 = vld [vmem:[#allocation77_spill] sm:$0xff] }
 0x385   : > { %8959 = vst [vmem:[#allocation50_spill] sm:$0xff] %v6549_v33  ;;  %v1254_v26 = vadd.f32 %v8966_v6, %v6492_v19  ;;  %v1427_v45 = vadd.f32 %v8967_v5, %v6492_v19  ;;  %v587_v1 = vpop.f32.mrf.mxu3  ;;  %v6579_v46 = vsel %vm434_vm1, %v908_v42, -inf  ;;  %v6582_v55 = vsel %vm434_vm1, %v1253_v61, -inf  ;;  %v231_v6 = vld [vmem:[%s7832_s2 + $0x30] sm:$0xff]  ;;  %v8969_v42 = vld [vmem:[#allocation118_spill] sm:$0xff]  ;;  %v9013_v33 = vld [vmem:[#allocation73_spill] sm:$0xff] }
 0x386   : > { %8962 = vst [vmem:[#allocation83_spill] sm:$0xff] %v6556_v52  ;;  %v6585_v21 = vsel %vm434_vm1, %v1426_v20, -inf  ;;  %v1600_v12 = vadd.f32 %v8968_v36, %v6492_v19  ;;  %v6595_v5 = vsel %vm434_vm1, %v1599_v17, -inf  ;;  %v1770_v61 = vadd.f32 %v8969_v42, %v6377_v25  ;;  %3424 = vmatpush.msrb.mxu0 %v231_v6  ;;  %3660 = vmatpush.msrb.mxu2 %v231_v6  ;;  %v8970_v52 = vld [vmem:[#allocation3_spill] sm:$0xff] }
 0x387   : > { %8964 = vst [vmem:[#allocation74_spill] sm:$0xff] %v6567_v2  ;;  %v6600_v51 = vsel %vm434_vm1, %v1769_v44, -inf  ;;  %v3284_v20 = vadd.f32 %v6475_v4, %v8760_v10  ;;  %v3114_v36 = vadd.f32 %v6569_v56, %v8716_v23  ;;  %v6609_v17 = vsel %vm434_vm1, %v1081_v9, -inf  ;;  %v8971_v23 = vld [vmem:[#allocation22_spill] sm:$0xff] }
 0x388   : > { %8965 = vst [vmem:[#allocation7_spill] sm:$0xff] %v6569_v56  ;;  %v736_v42 = vadd.f32 %v8970_v52, %v6567_v2  ;;  %v6616_v37 = vsel %vm434_vm1, %v1254_v26, -inf  ;;  %v6619_v10 = vsel %vm434_vm1, %v1427_v45, -inf  ;;  %v909_v6 = vadd.f32 %v8971_v23, %v6567_v2  ;;  %v8973_v9 = vld [vmem:[#allocation46_spill] sm:$0xff]  ;;  %v8976_v23 = vld [vmem:[#allocation100_spill] sm:$0xff] }
 0x389   : > { %v1082_v4 = vadd.f32 %v8972_v35, %v6567_v2  ;;  %v1255_v56 = vadd.f32 %v8973_v9, %v6567_v2  ;;  %v6628_v52 = vsel %vm434_vm1, %v1600_v12, -inf  ;;  %v6631_v44 = vadd.f32 %v584_v11, %v6330_v57  ;;  %v8975_v45 = vld [vmem:[#allocation70_spill] sm:$0xff] }
 0x38a   : > { %8974 = vst [vmem:[#allocation19_spill] sm:$0xff] %v6628_v52  ;;  %v1428_v40 = vadd.f32 %v8975_v45, %v6567_v2  ;;  %v1601_v29 = vadd.f32 %v8976_v23, %v6567_v2  ;;  %v6640_v35 = vsel %vm434_vm1, %v3284_v20, -inf  ;;  %v3140_v9 = vsel %vm434_vm1, %v3114_v36, -inf  ;;  %v8978_v20 = vld [vmem:[#allocation98_spill] sm:$0xff]  ;;  %v8980_v23 = vld [vmem:[#allocation21_spill] sm:$0xff]  ;;  %v6686_v27 = vpop.permute.xlu1 %3258 }
 0x38b   : > { %8977 = vst [vmem:[#allocation36_spill] sm:$0xff] %v6640_v35  ;;  %v6646_v11 = vsel %vm434_vm1, %v1770_v61, -inf  ;;  %v6649_v30 = vsel %vm434_vm1, %v736_v42, -inf  ;;  %v1771_v26 = vadd.f32 %v8978_v20, %v6424_v22  ;;  %v6658_v36 = vadd.f32 %v587_v1, %v6330_v57  ;;  %v8988_v52 = vld [vmem:[#allocation9_spill] sm:$0xff] }
 0x38c   : > { %v6661_v12 = vsel %vm434_vm1, %v909_v6, -inf  ;;  %v6664_v61 = vsel %vm434_vm1, %v1082_v4, -inf  ;;  %v6667_v42 = vsel %vm434_vm1, %v1255_v56, -inf  ;;  %v3141_v45 = vmax.f32 %v6389_v48, %v3140_v9  ;;  %v8982_v6 = vld [vmem:[#allocation15_spill] sm:$0xff]  ;;  %v8984_v56 = vld [vmem:[#allocation69_spill] sm:$0xff]  ;;  %v8985_v48 = vld [vmem:[#allocation62_spill] sm:$0xff] }
 0x38d   : > { %8979 = vst [vmem:[#allocation2_spill] sm:$0xff] %v6661_v12  ;;  %v737_v47 = vadd.f32 %v8980_v23, %v6631_v44  ;;  %v6673_v20 = vsel %vm434_vm1, %v1428_v40, -inf  ;;  %v6676_v1 = vsel %vm434_vm1, %v1601_v29, -inf  ;;  %v910_v49 = vadd.f32 %v8982_v6, %v6631_v44  ;;  %v8983_v4 = vld [vmem:[#allocation39_spill] sm:$0xff] }
 0x38e   : > { %v590_v35 = vpop.f32.mrf.mxu3  ;;  %8981 = vst [vmem:[#allocation12_spill] sm:$0xff] %v6676_v1  ;;  %v1083_v22 = vadd.f32 %v8983_v4, %v6631_v44  ;;  %v1256_v25 = vadd.f32 %v8984_v56, %v6631_v44  ;;  %v1429_v9 = vadd.f32 %v8985_v48, %v6631_v44  ;;  %v8987_v6 = vld [vmem:[#allocation87_spill] sm:$0xff]  ;;  %v738_v56 = vadd.f32 %v8988_v52, %v6658_v36 }
 0x38f   : > { %8986 = vst [vmem:[#allocation43_spill] sm:$0xff] %v6686_v27  ;;  %v1602_v4 = vadd.f32 %v8987_v6, %v6631_v44  ;;  %v6703_v40 = vsel %vm434_vm1, %v1771_v26, -inf  ;;  %v8990_v29 = vmax.f32 %v6313_v43, %v6511_v58  ;;  %v6711_v23 = vsel %vm434_vm1, %v737_v47, -inf  ;;  %v8992_v6 = vld [vmem:[#allocation91_spill] sm:$0xff]  ;;  %v8994_v47 = vld [vmem:[#allocation38_spill] sm:$0xff] }
 0x390   : > { %8989 = vst [vmem:[#allocation67_spill] sm:$0xff] %v6703_v40  ;;  %v6717_v48 = vadd.f32 %v8992_v6, %v6473_v31  ;;  %v6720_v7 = vsel %vm434_vm1, %v910_v49, -inf  ;;  %v6723_v26 = vsel %vm434_vm1, %v1083_v22, -inf  ;;  %v6726_v43 = vsel %vm434_vm1, %v1256_v25, -inf  ;;  %v8996_v6 = vld [vmem:[#allocation56_spill] sm:$0xff] }
 0x391   : > { %v6708_v12 = vmax.f32 %v3141_v45, %v8990_v29  ;;  %v6729_v58 = vsel %vm434_vm1, %v1429_v9, -inf  ;;  %v911_v45 = vadd.f32 %v8994_v47, %v6658_v36  ;;  %v8995_v29 = vld [vmem:[#allocation32_spill] sm:$0xff]  ;;  %v6738_v49 = vsel %vm434_vm1, %v1602_v4, -inf  ;;  %v8999_v9 = vld [vmem:[#allocation86_spill] sm:$0xff]  ;;  %v9000_v47 = vld [vmem:[#allocation101_spill] sm:$0xff] }
 0x392   : > { %8993 = vst [vmem:[#allocation88_spill] sm:$0xff] %v6729_v58  ;;  %v1084_v52 = vadd.f32 %v8995_v29, %v6658_v36  ;;  %v6741_v22 = vadd.f32 %v590_v35, %v6330_v57  ;;  %v6744_v31 = vsel %vm434_vm1, %v738_v56, -inf  ;;  %v1430_v1 = vadd.f32 %v8999_v9, %v6658_v36  ;;  %v9005_v9 = vld [vmem:[#allocation4_spill] sm:$0xff] }
 0x393   : > { %8991 = vst [vmem:[#allocation84_spill] sm:$0xff] %v6708_v12  ;;  %v1257_v12 = vadd.f32 %v8996_v6, %v6658_v36  ;;  %v1773_v62 = vadd.f32 %v9000_v47, %v6492_v19  ;;  %v9001_v6 = vld [vmem:[#allocation79_spill] sm:$0xff]  ;;  %v6760_v56 = vadd.f32 %v6686_v27, %v8817_v15 }
 0x394   : > { %8997 = vst [vmem:[#allocation29_spill] sm:$0xff] %v6738_v49  ;;  %v1603_v40 = vadd.f32 %v9001_v6, %v6658_v36  ;;  %v6774_v6 = vsel %vm434_vm1, %v911_v45, -inf  ;;  %v6777_v15 = vsel %vm434_vm1, %v1084_v52, -inf  ;;  %v739_v27 = vadd.f32 %v9005_v9, %v6741_v22  ;;  %v9009_v45 = vld [vmem:[#allocation25_spill] sm:$0xff]  ;;  %v9010_v52 = vld [vmem:[#allocation55_spill] sm:$0xff] }
 0x395   : > { %8998 = vst [vmem:[#allocation53_spill] sm:$0xff] %v6744_v31  ;;  %v6782_v47 = vsel %vm434_vm1, %v1257_v12, -inf  ;;  %v6785_v29 = vsel %vm434_vm1, %v1430_v1, -inf  ;;  %v912_v35 = vadd.f32 %v9009_v45, %v6741_v22  ;;  %v1085_v19 = vadd.f32 %v9010_v52, %v6741_v22  ;;  %v9011_v31 = vld [vmem:[#allocation48_spill] sm:$0xff]  ;;  %v9014_v45 = vld [vmem:[#allocation93_spill] sm:$0xff] }
 0x396   : > { %9002 = vst [vmem:[#allocation60_spill] sm:$0xff] %v6760_v56  ;;  %v6790_v56 = vpop.permute.xlu1 %3270  ;;  %v1258_v9 = vadd.f32 %v9011_v31, %v6741_v22  ;;  %v6799_v12 = vsel %vm434_vm1, %v1603_v40, -inf  ;;  %v1431_v49 = vadd.f32 %v9013_v33, %v6741_v22  ;;  %v1774_v24 = vadd.f32 %v9014_v45, %v6567_v2  ;;  %v9015_v52 = vld [vmem:[#allocation24_spill] sm:$0xff]  ;;  %v9018_v31 = vld [vmem:[#allocation17_spill] sm:$0xff] }
 0x397   : > { %9003 = vst [vmem:[#allocation77_spill] sm:$0xff] %v6774_v6  ;;  %v9016_v1 = vld [vmem:[#allocation104_spill] sm:$0xff]  ;;  %v932_v40 = vsel %vm434_vm1, %v912_v35, -inf }
 0x398   : > { %9004 = vst [vmem:[#allocation118_spill] sm:$0xff] %v6777_v15  ;;  %v1604_v6 = vadd.f32 %v9016_v1, %v6741_v22  ;;  %v759_v15 = vsel %vm434_vm1, %v739_v27, -inf  ;;  %v1105_v1 = vsel %vm434_vm1, %v1085_v19, -inf  ;;  %v9020_v27 = vld [vmem:[#allocation72_spill] sm:$0xff]  ;;  %v1451_v45 = vsel %vm434_vm1, %v1431_v49, -inf  ;;  %v9021_v19 = vld [vmem:[#allocation65_spill] sm:$0xff] }
 0x399   : > { %v593_v25 = vpop.f32.mrf.mxu3  ;;  %9006 = vst [vmem:[#allocation3_spill] sm:$0xff] %v6785_v29  ;;  %v1278_v29 = vsel %vm434_vm1, %v1258_v9, -inf  ;;  %v9023_v49 = vmax.f32 %v6416_v63, %v6579_v46  ;;  %v9027_v63 = vld [vmem:[#allocation123_spill] sm:$0xff] }
 0x39a   : > { %v6769_v4 = vadd.f32 %v593_v25, %v6330_v57  ;;  %v6788_v25 = vsel %vm434_vm1, %v1773_v62, -inf  ;;  %9008 = vst [vmem:[#allocation52_spill] sm:$0xff] %v6790_v56  ;;  %v6819_v62 = vadd.f32 %v6790_v56, %v8711_v50  ;;  %v9019_v50 = vld [vmem:[#allocation42_spill] sm:$0xff]  ;;  %v1624_v9 = vsel %vm434_vm1, %v1604_v6, -inf }
 0x39b   : > { %9007 = vst [vmem:[#allocation22_spill] sm:$0xff] %v6788_v25  ;;  %v1775_v46 = vadd.f32 %v9027_v63, %v6631_v44 }
 0x39c   : > { %9012 = vst [vmem:[#allocation46_spill] sm:$0xff] %v6799_v12  ;;  %v740_v58 = vadd.f32 %v9015_v52, %v6769_v4  ;;  %v913_v2 = vadd.f32 %v9018_v31, %v6769_v4  ;;  %v1086_v56 = vadd.f32 %v9019_v50, %v6769_v4  ;;  %v6837_v12 = vsel %vm434_vm1, %v1774_v24, -inf }
 0x39d   : > { %9017 = vst [vmem:[#allocation70_spill] sm:$0xff] %v6819_v62  ;;  %v1259_v62 = vadd.f32 %v9020_v27, %v6769_v4  ;;  %v1432_v31 = vadd.f32 %v9021_v19, %v6769_v4  ;;  %v9022_v50 = vmax.f32 %v6409_v18, %v6572_v13  ;;  %v6854_v24 = vmax.f32 %v9023_v49, %v932_v40  ;;  %v9032_v40 = vld [vmem:[#allocation11_spill] sm:$0xff] }
 0x39e   : > { %v761_v35 = vsel %vm434_vm1, %v740_v58, -inf  ;;  %v9025_v58 = vmax.f32 %v6430_v16, %v6616_v37  ;;  %v934_v6 = vsel %vm434_vm1, %v913_v2, -inf  ;;  %v9026_v18 = vmax.f32 %v6437_v28, %v6619_v10  ;;  %v9029_v2 = vld [vmem:[#allocation64_spill] sm:$0xff] }
 0x39f   : > { %v6849_v25 = vmax.f32 %v9022_v50, %v759_v15  ;;  %v1107_v37 = vsel %vm434_vm1, %v1086_v56, -inf  ;;  %v1280_v16 = vsel %vm434_vm1, %v1259_v62, -inf  ;;  %v1453_v49 = vsel %vm434_vm1, %v1432_v31, -inf  ;;  %v9035_v56 = vld [vmem:[#allocation2_spill] sm:$0xff] }
 0x3a0   : > { %v6864_v19 = vmax.f32 %v9025_v58, %v1278_v29  ;;  %v6870_v13 = vmax.f32 %v9026_v18, %v1451_v45  ;;  %v9030_v29 = vld [vmem:[#allocation19_spill] sm:$0xff]  ;;  %v9036_v62 = vmax.f32 %v6453_v3, %v9035_v56  ;;  %v9040_v3 = vld [vmem:[#allocation82_spill] sm:$0xff]  ;;  %v9043_v56 = vmax.f32 %v6484_v59, %v6667_v42 }
 0x3a1   : > { %v596_v33 = vpop.f32.mrf.mxu3  ;;  %v9031_v28 = vmax.f32 %v9029_v2, %v9030_v29  ;;  %v9038_v18 = vld [vmem:[#allocation59_spill] sm:$0xff] }
 0x3a2   : > { %v6840_v52 = vadd.f32 %v596_v33, %v6330_v57  ;;  %v9024_v33 = vmax.f32 %v6427_v8, %v6609_v17  ;;  %v9028_v17 = vmax.f32 %v6445_v53, %v6649_v30  ;;  %v9034_v30 = vld [vmem:[#allocation90_spill] sm:$0xff]  ;;  %v230_v29 = vld [vmem:[%s7832_s2 + $0x28] sm:$0xff] }
 0x3a3   : > { %v6886_v10 = vmax.f32 %v9031_v28, %v1624_v9  ;;  %v1605_v53 = vadd.f32 %v9034_v30, %v6769_v4  ;;  %v9037_v9 = vld [vmem:[#allocation34_spill] sm:$0xff]  ;;  %v9041_v28 = vld [vmem:[#allocation105_spill] sm:$0xff]  ;;  %3425 = vmatpush.msrb.mxu0 %v230_v29  ;;  %3661 = vmatpush.msrb.mxu2 %v230_v29  ;;  %v9042_v30 = vmax.f32 %v6456_v38, %v6664_v61 }
 0x3a4   : > { %v6859_v27 = vmax.f32 %v9024_v33, %v1105_v1  ;;  %v6879_v15 = vmax.f32 %v9028_v17, %v761_v35  ;;  %v741_v45 = vadd.f32 %v9032_v40, %v6840_v52  ;;  %v9033_v1 = vld [vmem:[#allocation41_spill] sm:$0xff]  ;;  %v6898_v33 = vmax.f32 %v9036_v62, %v934_v6 }
 0x3a5   : > { %v914_v50 = vadd.f32 %v9033_v1, %v6840_v52  ;;  %v1087_v58 = vadd.f32 %v9037_v9, %v6840_v52  ;;  %v1260_v63 = vadd.f32 %v9038_v18, %v6840_v52  ;;  %v9039_v17 = vld [vmem:[#allocation89_spill] sm:$0xff]  ;;  %v1606_v6 = vadd.f32 %v9040_v3, %v6840_v52  ;;  %v9048_v3 = vld [vmem:[#allocation58_spill] sm:$0xff] }
 0x3a6   : > { %v1433_v2 = vadd.f32 %v9039_v17, %v6840_v52  ;;  %v1776_v40 = vadd.f32 %v9041_v28, %v6658_v36  ;;  %v6917_v1 = vsel %vm434_vm1, %v1775_v46, -inf  ;;  %v6927_v62 = vmax.f32 %v9043_v56, %v1280_v16  ;;  %v9045_v17 = vld [vmem:[#allocation6_spill] sm:$0xff] }
 0x3a7   : > { %v9044_v9 = vmax.f32 %v6487_v14, %v6673_v20  ;;  %v6936_v46 = vsel %vm434_vm1, %v6717_v48, -inf  ;;  %v763_v38 = vsel %vm434_vm1, %v741_v45, -inf  ;;  %v936_v61 = vsel %vm434_vm1, %v914_v50, -inf  ;;  %v9046_v20 = vld [vmem:[#allocation67_spill] sm:$0xff]  ;;  %v9047_v48 = vld [vmem:[#allocation28_spill] sm:$0xff] }
 0x3a8   : > { %v1626_v59 = vsel %vm434_vm1, %v1605_v53, -inf  ;;  %v1109_v42 = vsel %vm434_vm1, %v1087_v58, -inf  ;;  %v1455_v14 = vsel %vm434_vm1, %v1433_v2, -inf  ;;  %v1628_v45 = vsel %vm434_vm1, %v1606_v6, -inf }
 0x3a9   : > { %v599_v35 = vpop.f32.mrf.mxu3  ;;  %v6932_v18 = vmax.f32 %v9044_v9, %v1453_v49  ;;  %v6954_v50 = vsel %vm434_vm1, %v1776_v40, -inf  ;;  %v9049_v53 = vmax.f32 %v6505_v60, %v6711_v23  ;;  %v9052_v9 = vld [vmem:[#allocation81_spill] sm:$0xff]  ;;  %v9055_v60 = vmax.f32 %v6516_v54, %v6723_v26  ;;  %v9063_v26 = vld [vmem:[#allocation96_spill] sm:$0xff] }
 0x3aa   : > { %v6907_v31 = vadd.f32 %v599_v35, %v6330_v57  ;;  %v6922_v35 = vmax.f32 %v9042_v30, %v1107_v37  ;;  %v1282_v37 = vsel %vm434_vm1, %v1260_v63, -inf  ;;  %v9050_v63 = vmax.f32 %v6508_v39, %v6720_v7  ;;  %v9051_v30 = vld [vmem:[#allocation51_spill] sm:$0xff] }
 0x3ab   : > { %v6959_v58 = vmax.f32 %v9049_v53, %v763_v38  ;;  %v6977_v23 = vmax.f32 %v9055_v60, %v1109_v42  ;;  %v9056_v7 = vmax.f32 %v6519_v0, %v6726_v43  ;;  %v9057_v38 = vld [vmem:[#allocation88_spill] sm:$0xff]  ;;  %v1777_v42 = vadd.f32 %v9063_v26, %v6741_v22  ;;  %v9066_v60 = vld [vmem:[#allocation53_spill] sm:$0xff] }
 0x3ac   : > { %v742_v29 = vadd.f32 %v9045_v17, %v6907_v31  ;;  %v915_v49 = vadd.f32 %v9047_v48, %v6907_v31  ;;  %v1088_v28 = vadd.f32 %v9048_v3, %v6907_v31  ;;  %v6964_v2 = vmax.f32 %v9050_v63, %v936_v61  ;;  %v9053_v17 = vld [vmem:[#allocation12_spill] sm:$0xff] }
 0x3ad   : > { %v1261_v56 = vadd.f32 %v9051_v30, %v6907_v31  ;;  %v9054_v48 = vmax.f32 %v9052_v9, %v9053_v17  ;;  %v6982_v39 = vmax.f32 %v9056_v7, %v1282_v37  ;;  %v9058_v61 = vmax.f32 %v6533_v32, %v9057_v38  ;;  %v9061_v30 = vld [vmem:[#allocation29_spill] sm:$0xff] }
 0x3ae   : > { %v765_v40 = vsel %vm434_vm1, %v742_v29, -inf  ;;  %v9060_v29 = vld [vmem:[#allocation35_spill] sm:$0xff]  ;;  %v938_v32 = vsel %vm434_vm1, %v915_v49, -inf  ;;  %v1111_v37 = vsel %vm434_vm1, %v1088_v28, -inf  ;;  %v9072_v28 = vld [vmem:[#allocation20_spill] sm:$0xff] }
 0x3af   : > { %v6971_v6 = vmax.f32 %v9054_v48, %v1626_v59  ;;  %v6987_v3 = vmax.f32 %v9058_v61, %v1455_v14  ;;  %v9059_v59 = vld [vmem:[#allocation75_spill] sm:$0xff]  ;;  %v9062_v9 = vmax.f32 %v9060_v29, %v9061_v30  ;;  %v9064_v14 = vld [vmem:[#allocation109_spill] sm:$0xff]  ;;  %v9065_v48 = vld [vmem:[#allocation50_spill] sm:$0xff]  ;;  %v1284_v38 = vsel %vm434_vm1, %v1261_v56, -inf }
 0x3b0   : > { %v1434_v63 = vadd.f32 %v9059_v59, %v6907_v31  ;;  %v1607_v17 = vadd.f32 %v9064_v14, %v6907_v31  ;;  %v9068_v61 = vld [vmem:[#allocation263_spill] sm:$0xff]  ;;  %v9069_v59 = vld [vmem:[#allocation116_spill] sm:$0xff]  ;;  %v9073_v14 = vld [vmem:[#allocation45_spill] sm:$0xff] }
 0x3b1   : > { %v602_v53 = vpop.f32.mrf.mxu3  ;;  %v6994_v54 = vmax.f32 %v9062_v9, %v1628_v45  ;;  %v9067_v45 = vmax.f32 %v9065_v48, %v9066_v60  ;;  %v1942_v29 = vadd.f32 %v9069_v59, %v9068_v61  ;;  %v9071_v49 = vld [vmem:[#allocation27_spill] sm:$0xff]  ;;  %v9075_v56 = vld [vmem:[#allocation77_spill] sm:$0xff]  ;;  %v9077_v59 = vld [vmem:[#allocation118_spill] sm:$0xff] }
 0x3b2   : > { %v7001_v43 = vadd.f32 %v602_v53, %v6330_v57  ;;  %v9070_v53 = vld [vmem:[#allocation165_spill] sm:$0xff]  ;;  %v9076_v60 = vmax.f32 %v6559_v41, %v9075_v56  ;;  %v9081_v41 = vld [vmem:[#allocation127_spill] sm:$0xff]  ;;  %v1797_v56 = vsel %vm434_vm1, %v1777_v42, -inf }
 0x3b3   : > { %v7010_v7 = vmax.f32 %v9067_v45, %v765_v40  ;;  %v2115_v30 = vadd.f32 %v9070_v53, %v9068_v61  ;;  %v9074_v40 = vld [vmem:[#allocation76_spill] sm:$0xff]  ;;  %v9078_v53 = vmax.f32 %v6564_v34, %v9077_v59  ;;  %v9082_v59 = vld [vmem:[#allocation14_spill] sm:$0xff]  ;;  %v7062_v42 = vsel %vm434_vm1, %v1942_v29, -inf }
 0x3b4   : > { %v743_v9 = vadd.f32 %v9071_v49, %v7001_v43  ;;  %v916_v26 = vadd.f32 %v9072_v28, %v7001_v43  ;;  %v1089_v0 = vadd.f32 %v9073_v14, %v7001_v43  ;;  %v1262_v48 = vadd.f32 %v9074_v40, %v7001_v43  ;;  %v9079_v49 = vld [vmem:[#allocation68_spill] sm:$0xff]  ;;  %9086 = vst [vmem:[#allocation100_spill] sm:$0xff] %v7062_v42 }
 0x3b5   : > { %v7028_v45 = vmax.f32 %v9076_v60, %v938_v32  ;;  %v7033_v16 = vmax.f32 %v9078_v53, %v1111_v37  ;;  %v1435_v8 = vadd.f32 %v9079_v49, %v7001_v43  ;;  %v1457_v28 = vsel %vm434_vm1, %v1434_v63, -inf  ;;  %v9083_v63 = vld [vmem:[#allocation106_spill] sm:$0xff] }
 0x3b6   : > { %v9080_v14 = vmax.f32 %v6582_v55, %v6782_v47  ;;  %v1630_v40 = vsel %vm434_vm1, %v1607_v17, -inf  ;;  %v1778_v32 = vadd.f32 %v9081_v41, %v6769_v4  ;;  %v767_v34 = vsel %vm434_vm1, %v743_v9, -inf  ;;  %v9084_v47 = vld [vmem:[#allocation3_spill] sm:$0xff] }
 0x3b7   : > { %v940_v37 = vsel %vm434_vm1, %v916_v26, -inf  ;;  %v1113_v60 = vsel %vm434_vm1, %v1089_v0, -inf  ;;  %v1943_v53 = vadd.f32 %v9083_v63, %v9082_v59  ;;  %v1286_v55 = vsel %vm434_vm1, %v1262_v48, -inf  ;;  %v9087_v26 = vld [vmem:[#allocation92_spill] sm:$0xff]  ;;  %v9090_v48 = vld [vmem:[#allocation22_spill] sm:$0xff] }
 0x3b8   : > { %v7041_v61 = vmax.f32 %v9080_v14, %v1284_v38  ;;  %v9085_v38 = vmax.f32 %v6585_v21, %v9084_v47  ;;  %v7059_v49 = vsel %vm434_vm1, %v1435_v8, -inf  ;;  %v1608_v0 = vadd.f32 %v9087_v26, %v7001_v43  ;;  %v9088_v14 = vld [vmem:[#allocation46_spill] sm:$0xff]  ;;  %v9092_v8 = vld [vmem:[#allocation139_spill] sm:$0xff] }
 0x3b9   : > { %v605_v9 = vpop.f32.mrf.mxu3  ;;  %v9089_v41 = vmax.f32 %v6595_v5, %v9088_v14  ;;  %v9091_v21 = vmax.f32 %v6600_v51, %v9090_v48  ;;  %v2116_v47 = vadd.f32 %v9092_v8, %v9082_v59  ;;  %v941_v26 = vmax.f32 %v6854_v24, %v940_v37  ;;  %v9093_v14 = vld [vmem:[#allocation13_spill] sm:$0xff]  ;;  %v9097_v37 = vld [vmem:[#allocation94_spill] sm:$0xff] }
 0x3ba   : > { %v7056_v17 = vmax.f32 %v9085_v38, %v1457_v28  ;;  %v7079_v29 = vadd.f32 %v605_v9, %v6330_v57  ;;  %v768_v38 = vmax.f32 %v6849_v25, %v767_v34  ;;  %v1114_v42 = vmax.f32 %v6859_v27, %v1113_v60  ;;  %v9095_v24 = vld [vmem:[#allocation37_spill] sm:$0xff]  ;;  %v9098_v60 = vld [vmem:[#allocation108_spill] sm:$0xff] }
 0x3bb   : > { %v7069_v63 = vmax.f32 %v9089_v41, %v1630_v40  ;;  %v7074_v28 = vmax.f32 %v9091_v21, %v1797_v56  ;;  %v1287_v5 = vmax.f32 %v6864_v19, %v1286_v55  ;;  %v1460_v40 = vmax.f32 %v6870_v13, %v7059_v49  ;;  %v9094_v41 = vld [vmem:[#allocation44_spill] sm:$0xff]  ;;  %v9096_v27 = vld [vmem:[#allocation61_spill] sm:$0xff]  ;;  %v9100_v49 = vld [vmem:[#allocation142_spill] sm:$0xff] }
 0x3bc   : > { %v1799_v51 = vsel %vm434_vm1, %v1778_v32, -inf  ;;  %v7089_v56 = vsel %vm434_vm1, %v1943_v53, -inf  ;;  %v744_v9 = vadd.f32 %v9093_v14, %v7079_v29  ;;  %v917_v25 = vadd.f32 %v9094_v41, %v7079_v29  ;;  %v9099_v55 = vld [vmem:[#allocation40_spill] sm:$0xff] }
 0x3bd   : > { %v1090_v34 = vadd.f32 %v9095_v24, %v7079_v29  ;;  %v1263_v19 = vadd.f32 %v9096_v27, %v7079_v29  ;;  %v1436_v13 = vadd.f32 %v9097_v37, %v7079_v29  ;;  %v1632_v32 = vsel %vm434_vm1, %v1608_v0, -inf }
 0x3be   : > { %v1779_v53 = vadd.f32 %v9098_v60, %v6840_v52  ;;  %v1944_v48 = vadd.f32 %v9100_v49, %v9099_v55  ;;  %v769_v21 = vsel %vm434_vm1, %v744_v9, -inf  ;;  %v942_v8 = vsel %vm434_vm1, %v917_v25, -inf  ;;  %v9101_v49 = vld [vmem:[#allocation85_spill] sm:$0xff] }
 0x3bf   : > { %v1115_v14 = vsel %vm434_vm1, %v1090_v34, -inf  ;;  %v1288_v41 = vsel %vm434_vm1, %v1263_v19, -inf  ;;  %v770_v24 = vmax.f32 %v6879_v15, %v769_v21  ;;  %v943_v27 = vmax.f32 %v6898_v33, %v942_v8  ;;  %v9103_v19 = vld [vmem:[#allocation129_spill] sm:$0xff] }
 0x3c0   : > { %v1116_v0 = vmax.f32 %v6922_v35, %v1115_v14  ;;  %v1289_v37 = vmax.f32 %v6927_v62, %v1288_v41  ;;  %v1461_v60 = vsel %vm434_vm1, %v1436_v13, -inf  ;;  %v1609_v59 = vadd.f32 %v9101_v49, %v7079_v29  ;;  %v9105_v14 = vld [vmem:[#allocation30_spill] sm:$0xff] }
 0x3c1   : > { %v9102_v9 = vmax.f32 %v6646_v11, %v6837_v12  ;;  %v7123_v34 = vsel %vm434_vm1, %v2115_v30, -inf  ;;  %v608_v15 = vpop.f32.mrf.mxu3  ;;  %v1633_v33 = vmax.f32 %v6886_v10, %v1632_v32  ;;  %v1801_v35 = vsel %vm434_vm1, %v1779_v53, -inf }
 0x3c2   : > { %v7128_v62 = vsel %vm434_vm1, %v1944_v48, -inf  ;;  %v7132_v13 = vadd.f32 %v9103_v19, %v9099_v55  ;;  %v7135_v21 = vadd.f32 %v608_v15, %v6330_v57  ;;  %v7137_v11 = vmax.f32 %v768_v38, %v770_v24  ;;  %v9104_v48 = vld [vmem:[#allocation8_spill] sm:$0xff]  ;;  %v9106_v38 = vld [vmem:[#allocation63_spill] sm:$0xff]  ;;  %v9107_v24 = vld [vmem:[#allocation54_spill] sm:$0xff] }
 0x3c3   : > { %v7120_v25 = vmax.f32 %v9102_v9, %v1799_v51  ;;  %v7139_v12 = vmax.f32 %v941_v26, %v943_v27  ;;  %v1634_v30 = vsel %vm434_vm1, %v1609_v59, -inf  ;;  %v7142_v51 = vmax.f32 %v1114_v42, %v1116_v0  ;;  %v9108_v42 = vld [vmem:[#allocation78_spill] sm:$0xff]  ;;  %v9109_v27 = vld [vmem:[#allocation99_spill] sm:$0xff] }
 0x3c4   : > { %v7144_v10 = vmax.f32 %v1287_v5, %v1289_v37  ;;  %v1462_v32 = vmax.f32 %v6932_v18, %v1461_v60  ;;  %v1635_v53 = vmax.f32 %v6971_v6, %v1634_v30  ;;  %v745_v8 = vadd.f32 %v9104_v48, %v7135_v21 }
 0x3c5   : > { %v918_v41 = vadd.f32 %v9105_v14, %v7135_v21  ;;  %v1091_v26 = vadd.f32 %v9106_v38, %v7135_v21  ;;  %v1264_v59 = vadd.f32 %v9107_v24, %v7135_v21  ;;  %v1437_v5 = vadd.f32 %v9108_v42, %v7135_v21 }
 0x3c6   : > { %v1780_v18 = vadd.f32 %v9109_v27, %v6907_v31  ;;  %v9110_v6 = vmax.f32 %v9046_v20, %v6917_v1  ;;  %v7166_v37 = vsel %vm434_vm1, %v2116_v47, -inf  ;;  %v771_v60 = vsel %vm434_vm1, %v745_v8, -inf  ;;  %v9111_v20 = vld [vmem:[#allocation114_spill] sm:$0xff] }
 0x3c7   : > { %v944_v49 = vsel %vm434_vm1, %v918_v41, -inf  ;;  %v1117_v9 = vsel %vm434_vm1, %v1091_v26, -inf  ;;  %v1290_v15 = vsel %vm434_vm1, %v1264_v59, -inf  ;;  %v772_v19 = vmax.f32 %v6959_v58, %v771_v60  ;;  %v9113_v41 = vld [vmem:[#allocation112_spill] sm:$0xff]  ;;  %v9117_v60 = vld [vmem:[#allocation23_spill] sm:$0xff] }
 0x3c8   : > { %v7163_v0 = vmax.f32 %v9110_v6, %v1801_v35  ;;  %v945_v30 = vmax.f32 %v6964_v2, %v944_v49  ;;  %v1467_v48 = vmax.f32 %v1460_v40, %v1462_v32  ;;  %v1640_v14 = vmax.f32 %v1633_v33, %v1635_v53  ;;  %v9112_v35 = vld [vmem:[#allocation133_spill] sm:$0xff]  ;;  %v9114_v2 = vld [vmem:[#allocation102_spill] sm:$0xff]  ;;  %v9118_v49 = vld [vmem:[#allocation47_spill] sm:$0xff] }
 0x3c9   : > { %v1463_v1 = vsel %vm434_vm1, %v1437_v5, -inf  ;;  %v1610_v47 = vadd.f32 %v9111_v20, %v7135_v21  ;;  %v1781_v8 = vadd.f32 %v9112_v35, %v7001_v43  ;;  %v1782_v38 = vadd.f32 %v9113_v41, %v7079_v29  ;;  %v611_v26 = vpop.f32.mrf.mxu3  ;;  %v9122_v20 = vld [vmem:[#allocation137_spill] sm:$0xff] }
 0x3ca   : > { %v1118_v24 = vmax.f32 %v6977_v23, %v1117_v9  ;;  %v1291_v58 = vmax.f32 %v6982_v39, %v1290_v15  ;;  %v1783_v40 = vadd.f32 %v9114_v2, %v7135_v21  ;;  %v1803_v33 = vsel %vm434_vm1, %v1780_v18, -inf  ;;  %v9116_v18 = vld [vmem:[#allocation31_spill] sm:$0xff]  ;;  %v9119_v15 = vld [vmem:[#allocation80_spill] sm:$0xff] }
 0x3cb   : > { %v7187_v32 = vadd.f32 %v611_v26, %v6330_v57  ;;  %v1464_v53 = vmax.f32 %v6987_v3, %v1463_v1  ;;  %v1636_v59 = vsel %vm434_vm1, %v1610_v47, -inf  ;;  %v1805_v42 = vsel %vm434_vm1, %v1781_v8, -inf  ;;  %v9120_v1 = vld [vmem:[#allocation71_spill] sm:$0xff] }
 0x3cc   : > { %v1637_v5 = vmax.f32 %v6994_v54, %v1636_v59  ;;  %v9115_v23 = vmax.f32 %v6936_v46, %v6954_v50  ;;  %v1806_v27 = vmax.f32 %v7074_v28, %v1805_v42  ;;  %v1807_v6 = vsel %vm434_vm1, %v1782_v38, -inf  ;;  %v9121_v50 = vld [vmem:[#allocation95_spill] sm:$0xff] }
 0x3cd   : > { %v746_v57 = vadd.f32 %v9116_v18, %v7187_v32  ;;  %v919_v3 = vadd.f32 %v9117_v60, %v7187_v32  ;;  %v1092_v9 = vadd.f32 %v9118_v49, %v7187_v32  ;;  %v1265_v54 = vadd.f32 %v9119_v15, %v7187_v32 }
 0x3ce   : > { %v1804_v39 = vmax.f32 %v9115_v23, %v1803_v33  ;;  %v1438_v46 = vadd.f32 %v9120_v1, %v7187_v32  ;;  %v1611_v28 = vadd.f32 %v9121_v50, %v7187_v32  ;;  %v1784_v47 = vadd.f32 %v9122_v20, %v7187_v32  ;;  %v9124_v20 = vld [vmem:[#allocation120_spill] sm:$0xff] }
 0x3cf   : > { %v1809_v35 = vsel %vm434_vm1, %v1783_v40, -inf  ;;  %v773_v8 = vsel %vm434_vm1, %v746_v57, -inf  ;;  %v946_v41 = vsel %vm434_vm1, %v919_v3, -inf  ;;  %v1119_v38 = vsel %vm434_vm1, %v1092_v9, -inf }
 0x3d0   : > { %v1292_v26 = vsel %vm434_vm1, %v1265_v54, -inf  ;;  %v774_v2 = vmax.f32 %v7010_v7, %v773_v8  ;;  %v947_v33 = vmax.f32 %v7028_v45, %v946_v41  ;;  %v1120_v59 = vmax.f32 %v7033_v16, %v1119_v38  ;;  %v9126_v8 = vld [vmem:[#allocation110_spill] sm:$0xff] }
 0x3d1   : > { %v1293_v42 = vmax.f32 %v7041_v61, %v1292_v26  ;;  %v1465_v23 = vsel %vm434_vm1, %v1438_v46, -inf  ;;  %v1638_v40 = vsel %vm434_vm1, %v1611_v28, -inf  ;;  %v1808_v18 = vmax.f32 %v7120_v25, %v1807_v6 }
 0x3d2   : > { %v1811_v57 = vsel %vm434_vm1, %v1784_v47, -inf  ;;  %v776_v60 = vmax.f32 %v772_v19, %v774_v2  ;;  %v949_v3 = vmax.f32 %v945_v30, %v947_v33  ;;  %v1122_v49 = vmax.f32 %v1118_v24, %v1120_v59 }
 0x3d3   : > { %v1295_v9 = vmax.f32 %v1291_v58, %v1293_v42  ;;  %v1466_v7 = vmax.f32 %v7056_v17, %v1465_v23  ;;  %v1639_v45 = vmax.f32 %v7069_v63, %v1638_v40  ;;  %v1810_v16 = vmax.f32 %v7163_v0, %v1809_v35  ;;  %v9127_v42 = vld [vmem:[#allocation74_spill] sm:$0xff]  ;;  %v9128_v23 = vld [vmem:[#allocation124_spill] sm:$0xff] }
 0x3d4   : > { %v1812_v15 = vmax.f32 %v1804_v39, %v1811_v57  ;;  %v777_v61 = vmax.f32 %v7137_v11, %v776_v60  ;;  %v950_v54 = vmax.f32 %v7139_v12, %v949_v3  ;;  %v1123_v1 = vmax.f32 %v7142_v51, %v1122_v49  ;;  %v9123_v39 = vld [vmem:[#allocation10_spill] sm:$0xff] }
 0x3d5   : > { %v1296_v25 = vmax.f32 %v7144_v10, %v1295_v9  ;;  %v1468_v6 = vmax.f32 %v1464_v53, %v1466_v7  ;;  %v1641_v19 = vmax.f32 %v1637_v5, %v1639_v45  ;;  %v1813_v30 = vmax.f32 %v1806_v27, %v1808_v18  ;;  %v9125_v27 = vld [vmem:[#allocation57_spill] sm:$0xff] }
 0x3d6   : > { %v1814_v24 = vmax.f32 %v1810_v16, %v1812_v15  ;;  %v778_v58 = vrot.slane %v777_v61, 4  ;;  %v951_v46 = vrot.slane %v950_v54, 4  ;;  %v1124_v17 = vrot.slane %v1123_v1, 4  ;;  %v9129_v45 = vld [vmem:[#allocation113_spill] sm:$0xff] }
 0x3d7   : > { %v1297_v50 = vrot.slane %v1296_v25, 4  ;;  %v1469_v63 = vmax.f32 %v1467_v48, %v1468_v6  ;;  %v1642_v28 = vmax.f32 %v1640_v14, %v1641_v19  ;;  %v7234_v11 = vadd.f32 %v9124_v20, %v9123_v39  ;;  %v9131_v20 = vld [vmem:[#allocation128_spill] sm:$0xff] }
 0x3d8   : > { %v1815_v0 = vmax.f32 %v1813_v30, %v1814_v24  ;;  %v779_v12 = vmax.f32 %v777_v61, %v778_v58  ;;  %v952_v47 = vmax.f32 %v950_v54, %v951_v46  ;;  %v1125_v51 = vmax.f32 %v1123_v1, %v1124_v17  ;;  %v9130_v30 = vld [vmem:[#allocation146_spill] sm:$0xff] }
 0x3d9   : > { %v1298_v35 = vmax.f32 %v1296_v25, %v1297_v50  ;;  %v1470_v10 = vrot.slane %v1469_v63, 4  ;;  %v1643_v53 = vrot.slane %v1642_v28, 4  ;;  %v1946_v41 = vadd.f32 %v9126_v8, %v9125_v27 }
 0x3da   : > { %v1816_v5 = vrot.slane %v1815_v0, 4  ;;  %v780_v38 = vrot.slane %v779_v12, 2  ;;  %v953_v26 = vrot.slane %v952_v47, 2  ;;  %v1126_v2 = vrot.slane %v1125_v51, 2 }
 0x3db   : > { %v1299_v48 = vrot.slane %v1298_v35, 2  ;;  %v1471_v14 = vmax.f32 %v1469_v63, %v1470_v10  ;;  %v1644_v33 = vmax.f32 %v1642_v28, %v1643_v53  ;;  %v1947_v40 = vadd.f32 %v9128_v23, %v9127_v42 }
 0x3dc   : > { %v1817_v59 = vmax.f32 %v1815_v0, %v1816_v5  ;;  %v781_v18 = vmax.f32 %v779_v12, %v780_v38  ;;  %v954_v57 = vmax.f32 %v952_v47, %v953_v26  ;;  %v1127_v60 = vmax.f32 %v1125_v51, %v1126_v2  ;;  %v9132_v38 = vld [vmem:[#allocation117_spill] sm:$0xff]  ;;  %v9133_v2 = vld [vmem:[#allocation155_spill] sm:$0xff] }
 0x3dd   : > { %v1300_v3 = vmax.f32 %v1298_v35, %v1299_v48  ;;  %v1472_v49 = vrot.slane %v1471_v14, 2  ;;  %v1645_v9 = vrot.slane %v1644_v33, 2  ;;  %v1948_v16 = vadd.f32 %v9129_v45, %v6631_v44  ;;  %v9141_v45 = vld [vmem:[#allocation119_spill] sm:$0xff] }
 0x3de   : > { %v1818_v7 = vrot.slane %v1817_v59, 2  ;;  %v782_v15 = vrot.slane %v781_v18, 1  ;;  %v955_v61 = vrot.slane %v954_v57, 1  ;;  %v1128_v54 = vrot.slane %v1127_v60, 1 }
 0x3df   : > { %v1301_v1 = vrot.slane %v1300_v3, 1  ;;  %v1473_v25 = vmax.f32 %v1471_v14, %v1472_v49  ;;  %v1646_v6 = vmax.f32 %v1644_v33, %v1645_v9  ;;  %v1949_v24 = vadd.f32 %v9130_v30, %v6658_v36  ;;  %v9135_v33 = vld [vmem:[#allocation226_spill] sm:$0xff]  ;;  %v9144_v30 = vld [vmem:[#allocation160_spill] sm:$0xff] }
 0x3e0   : > { %v1819_v19 = vmax.f32 %v1817_v59, %v1818_v7  ;;  %v783_v58 = vmax.f32 %v781_v18, %v782_v15  ;;  %v956_v46 = vmax.f32 %v954_v57, %v955_v61  ;;  %v1129_v17 = vmax.f32 %v1127_v60, %v1128_v54  ;;  %v9137_v18 = vld [vmem:[#allocation153_spill] sm:$0xff]  ;;  %v9138_v60 = vld [vmem:[#allocation131_spill] sm:$0xff]  ;;  %v9139_v49 = vld [vmem:[#allocation246_spill] sm:$0xff] }
 0x3e1   : > { %v1302_v50 = vmax.f32 %v1300_v3, %v1301_v1  ;;  %v1474_v63 = vrot.slane %v1473_v25, 1  ;;  %v1647_v28 = vrot.slane %v1646_v6, 1  ;;  %v1950_v12 = vadd.f32 %v9131_v20, %v6741_v22 }
 0x3e2   : > { %v1820_v0 = vrot.slane %v1819_v19, 1  ;;  %v785_v47 = vmax.f32 %v783_v58, 0.0  ;;  %v958_v51 = vmax.f32 %v956_v46, 0.0  ;;  %v1131_v35 = vmax.f32 %v1129_v17, 0.0  ;;  %v9145_v46 = vld [vmem:[#allocation135_spill] sm:$0xff] }
 0x3e3   : > { %v1304_v10 = vmax.f32 %v1302_v50, 0.0  ;;  %v1475_v53 = vmax.f32 %v1473_v25, %v1474_v63  ;;  %v1648_v5 = vmax.f32 %v1646_v6, %v1647_v28  ;;  %v1951_v26 = vadd.f32 %v9132_v38, %v6769_v4  ;;  %v9143_v6 = vld [vmem:[#allocation121_spill] sm:$0xff]  ;;  %v9146_v50 = vld [vmem:[#allocation163_spill] sm:$0xff] }
 0x3e4   : > { %v1821_v8 = vmax.f32 %v1819_v19, %v1820_v0  ;;  %v9134_v48 = vmax.f32 %v9133_v2, 0.0  ;;  %v9136_v59 = vmax.f32 %v9135_v33, 0.0  ;;  %v1952_v57 = vadd.f32 %v9137_v18, %v6840_v52  ;;  %v9148_v0 = vld [vmem:[#allocation125_spill] sm:$0xff] }
 0x3e5   : > { %v1953_v3 = vadd.f32 %v9138_v60, %v6907_v31  ;;  %v9140_v9 = vmax.f32 %v9139_v49, 0.0  ;;  %v9142_v15 = vmax.f32 %v9141_v45, 0.0  ;;  %v1477_v54 = vmax.f32 %v1475_v53, 0.0 }
 0x3e6   : > { %v786_v14 = vadd.f32 %v785_v47, %v9134_v48  ;;  %v959_v23 = vadd.f32 %v958_v51, %v9136_v59  ;;  %v1650_v1 = vmax.f32 %v1648_v5, 0.0  ;;  %v1823_v25 = vmax.f32 %v1821_v8, 0.0 }
 0x3e7   : > { %v1132_v7 = vadd.f32 %v1131_v35, %v9140_v9  ;;  %v1305_v61 = vadd.f32 %v1304_v10, %v9142_v15  ;;  %v1954_v19 = vadd.f32 %v9143_v6, %v7001_v43  ;;  %v1955_v58 = vadd.f32 %v9144_v30, %v7079_v29  ;;  %v9149_v35 = vld [vmem:[#allocation100_spill] sm:$0xff] }
 0x3e8   : > { %v1956_v17 = vadd.f32 %v9145_v46, %v7135_v21  ;;  %v9147_v63 = vmax.f32 %v9146_v50, 0.0  ;;  %v1957_v20 = vadd.f32 %v9148_v0, %v7187_v32  ;;  %v1961_v47 = vsel %vm434_vm1, %v7234_v11, -inf  ;;  %v9150_v6 = vld [vmem:[#allocation244_spill] sm:$0xff] }
 0x3e9   : > { %v1962_v51 = vsel %vm434_vm1, %v1946_v41, -inf  ;;  %v1964_v53 = vsel %vm434_vm1, %v1947_v40, -inf  ;;  %v1966_v5 = vsel %vm434_vm1, %v1948_v16, -inf  ;;  %v1968_v8 = vsel %vm434_vm1, %v1949_v24, -inf  ;;  %v9155_v0 = vld [vmem:[#allocation148_spill] sm:$0xff] }
 0x3ea   : > { %v1478_v28 = vadd.f32 %v1477_v54, %v9147_v63  ;;  %v1963_v10 = vmax.f32 %v9149_v35, %v1962_v51  ;;  %v1965_v38 = vmax.f32 %v7089_v56, %v1964_v53  ;;  %v1967_v2 = vmax.f32 %v7128_v62, %v1966_v5  ;;  %v9154_v63 = vld [vmem:[#allocation263_spill] sm:$0xff]  ;;  %v9157_v51 = vld [vmem:[#allocation132_spill] sm:$0xff] }
 0x3eb   : > { %v1969_v48 = vmax.f32 %v1961_v47, %v1968_v8  ;;  %v1970_v33 = vsel %vm434_vm1, %v1950_v12, -inf  ;;  %v1972_v11 = vsel %vm434_vm1, %v1951_v26, -inf  ;;  %v1974_v41 = vsel %vm434_vm1, %v1952_v57, -inf  ;;  %v9156_v47 = vld [vmem:[#allocation143_spill] sm:$0xff]  ;;  %v9160_v5 = vld [vmem:[#allocation136_spill] sm:$0xff] }
 0x3ec   : > { %v1971_v59 = vmax.f32 %v1963_v10, %v1970_v33  ;;  %v1976_v18 = vsel %vm434_vm1, %v1953_v3, -inf  ;;  %v1973_v60 = vmax.f32 %v1965_v38, %v1972_v11  ;;  %v1975_v40 = vmax.f32 %v1967_v2, %v1974_v41  ;;  %v9164_v41 = vld [vmem:[#allocation180_spill] sm:$0xff] }
 0x3ed   : > { %v1977_v49 = vmax.f32 %v1969_v48, %v1976_v18  ;;  %v1978_v16 = vsel %vm434_vm1, %v1954_v19, -inf  ;;  %v1980_v56 = vsel %vm434_vm1, %v1955_v58, -inf  ;;  %v1982_v62 = vsel %vm434_vm1, %v1956_v17, -inf  ;;  %v9152_v58 = vld [vmem:[#allocation250_spill] sm:$0xff]  ;;  %v9162_v48 = vld [vmem:[#allocation151_spill] sm:$0xff] }
 0x3ee   : > { %v1979_v24 = vmax.f32 %v1971_v59, %v1978_v16  ;;  %v1984_v9 = vsel %vm434_vm1, %v1957_v20, -inf  ;;  %v1981_v12 = vmax.f32 %v1973_v60, %v1980_v56  ;;  %v1983_v45 = vmax.f32 %v1975_v40, %v1982_v62  ;;  %v9163_v59 = vld [vmem:[#allocation140_spill] sm:$0xff]  ;;  %v9165_v60 = vld [vmem:[#allocation157_spill] sm:$0xff] }
 0x3ef   : > { %v1985_v15 = vmax.f32 %v1977_v49, %v1984_v9  ;;  %v3383_v26 = vsel %vm3382_vm2, %v786_v14, %v959_v23  ;;  %v9151_v19 = vmax.f32 %v9150_v6, 0.0  ;;  %v9153_v46 = vmax.f32 %v9152_v58, 0.0  ;;  %v9166_v49 = vld [vmem:[#allocation144_spill] sm:$0xff]  ;;  %v9168_v9 = vld [vmem:[#allocation161_spill] sm:$0xff] }
 0x3f0   : > { %v1986_v57 = vmax.f32 %v1979_v24, %v1981_v12  ;;  %v3385_v54 = vsel %vm3384_vm3, %v3383_v26, %v1132_v7  ;;  %v7296_v20 = vadd.f32 %v9155_v0, %v9154_v63  ;;  %v2118_v7 = vadd.f32 %v9156_v47, %v9123_v39  ;;  %v9167_v24 = vld [vmem:[#allocation185_spill] sm:$0xff] }
 0x3f1   : > { %v1987_v3 = vmax.f32 %v1983_v45, %v1985_v15  ;;  %v1651_v30 = vadd.f32 %v1650_v1, %v9151_v19  ;;  %v1824_v17 = vadd.f32 %v1823_v25, %v9153_v46  ;;  %v3387_v50 = vsel %vm3386_vm4, %v3385_v54, %v1305_v61  ;;  %v9158_v25 = vld [vmem:[#allocation168_spill] sm:$0xff]  ;;  %v9159_v61 = vld [vmem:[#allocation147_spill] sm:$0xff] }
 0x3f2   : > { %v3389_v23 = vsel %vm3388_vm5, %v3387_v50, %v1478_v28  ;;  %v2119_v35 = vadd.f32 %v9157_v51, %v9125_v27  ;;  %v2120_v10 = vadd.f32 %v9158_v25, %v9127_v42  ;;  %v2121_v53 = vadd.f32 %v9159_v61, %v6631_v44  ;;  %v9161_v28 = vld [vmem:[#allocation174_spill] sm:$0xff] }
 0x3f3   : > { %v1988_v14 = vmax.f32 %v1986_v57, %v1987_v3  ;;  %v3391_v1 = vsel %vm3390_vm6, %v3389_v23, %v1651_v30  ;;  %v2122_v8 = vadd.f32 %v9160_v5, %v6658_v36  ;;  %v2123_v2 = vadd.f32 %v9161_v28, %v6741_v22 }
 0x3f4   : > { %v2124_v33 = vadd.f32 %v9162_v48, %v6769_v4  ;;  %v2125_v11 = vadd.f32 %v9163_v59, %v6840_v52  ;;  %v2126_v18 = vadd.f32 %v9164_v41, %v6907_v31  ;;  %v2127_v40 = vadd.f32 %v9165_v60, %v7001_v43  ;;  %v9169_v48 = vld [vmem:[#allocation14_spill] sm:$0xff]  ;;  %v9172_v60 = vld [vmem:[#allocation152_spill] sm:$0xff] }
 0x3f5   : > { %v1989_v38 = vrot.slane %v1988_v14, 4  ;;  %v2128_v16 = vadd.f32 %v9166_v49, %v7079_v29  ;;  %v2129_v56 = vadd.f32 %v9167_v24, %v7135_v21  ;;  %v2130_v12 = vadd.f32 %v9168_v9, %v7187_v32  ;;  %v9173_v49 = vld [vmem:[#allocation171_spill] sm:$0xff] }
 0x3f6   : > { %v2133_v45 = vsel %vm434_vm1, %v7132_v13, -inf  ;;  %v2134_v15 = vsel %vm434_vm1, %v2118_v7, -inf  ;;  %v2135_v26 = vsel %vm434_vm1, %v2119_v35, -inf  ;;  %v2137_v57 = vsel %vm434_vm1, %v2120_v10, -inf }
 0x3f7   : > { %v1990_v62 = vmax.f32 %v1988_v14, %v1989_v38  ;;  %v2139_v3 = vsel %vm434_vm1, %v2121_v53, -inf  ;;  %v2141_v54 = vsel %vm434_vm1, %v2122_v8, -inf  ;;  %v2136_v19 = vmax.f32 %v7123_v34, %v2135_v26 }
 0x3f8   : > { %v2138_v30 = vmax.f32 %v7166_v37, %v2137_v57  ;;  %v2140_v58 = vmax.f32 %v2133_v45, %v2139_v3  ;;  %v2142_v46 = vmax.f32 %v2134_v15, %v2141_v54  ;;  %v2143_v50 = vsel %vm434_vm1, %v2123_v2, -inf  ;;  %v9177_v15 = vld [vmem:[#allocation162_spill] sm:$0xff]  ;;  %v9178_v57 = vld [vmem:[#allocation200_spill] sm:$0xff] }
 0x3f9   : > { %v1991_v6 = vrot.slane %v1990_v62, 2  ;;  %v2145_v13 = vsel %vm434_vm1, %v2124_v33, -inf  ;;  %v2147_v0 = vsel %vm434_vm1, %v2125_v11, -inf  ;;  %v2144_v23 = vmax.f32 %v2136_v19, %v2143_v50  ;;  %v9170_v33 = vld [vmem:[#allocation189_spill] sm:$0xff]  ;;  %v9171_v11 = vld [vmem:[#allocation167_spill] sm:$0xff]  ;;  %v9179_v54 = vld [vmem:[#allocation178_spill] sm:$0xff] }
 0x3fa   : > { %v2146_v47 = vmax.f32 %v2138_v30, %v2145_v13  ;;  %v2148_v7 = vmax.f32 %v2140_v58, %v2147_v0  ;;  %v2149_v51 = vsel %vm434_vm1, %v2126_v18, -inf  ;;  %v2151_v35 = vsel %vm434_vm1, %v2127_v40, -inf  ;;  %v9180_v19 = vld [vmem:[#allocation166_spill] sm:$0xff]  ;;  %v9183_v0 = vld [vmem:[#allocation204_spill] sm:$0xff] }
 0x3fb   : > { %v1992_v14 = vmax.f32 %v1990_v62, %v1991_v6  ;;  %v2153_v34 = vsel %vm434_vm1, %v2128_v16, -inf  ;;  %v2155_v37 = vsel %vm434_vm1, %v2129_v56, -inf  ;;  %v2150_v10 = vmax.f32 %v2142_v46, %v2149_v51  ;;  %v9175_v62 = vld [vmem:[#allocation195_spill] sm:$0xff]  ;;  %v9181_v58 = vld [vmem:[#allocation238_spill] sm:$0xff] }
 0x3fc   : > { %v2154_v61 = vmax.f32 %v2146_v47, %v2153_v34  ;;  %v3393_v53 = vsel %vm3392_vm7, %v3391_v1, %v1824_v17  ;;  %v2152_v5 = vmax.f32 %v2144_v23, %v2151_v35  ;;  %v2156_v8 = vmax.f32 %v2148_v7, %v2155_v37  ;;  %v9174_v17 = vld [vmem:[#allocation158_spill] sm:$0xff]  ;;  %v9184_v23 = vld [vmem:[#allocation183_spill] sm:$0xff] }
 0x3fd   : > { %v1993_v25 = vrot.slane %v1992_v14, 1  ;;  %v2157_v38 = vsel %vm434_vm1, %v2130_v12, -inf  ;;  %v2289_v59 = vadd.f32 %v9170_v33, %v9169_v48  ;;  %v2290_v41 = vadd.f32 %v9171_v11, %v9099_v55  ;;  %v9176_v12 = vld [vmem:[#allocation173_spill] sm:$0xff]  ;;  %v9185_v7 = vld [vmem:[#allocation170_spill] sm:$0xff]  ;;  %v9186_v35 = vld [vmem:[#allocation207_spill] sm:$0xff] }
 0x3fe   : > { %v2158_v2 = vmax.f32 %v2150_v10, %v2157_v38  ;;  %v2159_v18 = vmax.f32 %v2152_v5, %v2154_v61  ;;  %v2291_v40 = vadd.f32 %v9172_v60, %v9123_v39  ;;  %v2292_v16 = vadd.f32 %v9173_v49, %v9125_v27 }
 0x3ff   : > { %v1994_v28 = vmax.f32 %v1992_v14, %v1993_v25  ;;  %v2293_v1 = vadd.f32 %v9174_v17, %v9127_v42  ;;  %v2294_v9 = vadd.f32 %v9175_v62, %v6631_v44  ;;  %v2295_v45 = vadd.f32 %v9176_v12, %v6658_v36  ;;  %v9187_v12 = vld [vmem:[#allocation97_spill] sm:$0xff] }
 0x400   : > { %v2160_v56 = vmax.f32 %v2156_v8, %v2158_v2  ;;  %v2296_v26 = vadd.f32 %v9177_v15, %v6741_v22  ;;  %v2297_v3 = vadd.f32 %v9178_v57, %v6769_v4  ;;  %v2298_v6 = vadd.f32 %v9179_v54, %v6840_v52  ;;  %v9188_v15 = vld [vmem:[#allocation16_spill] sm:$0xff]  ;;  %v9192_v54 = vld [vmem:[#allocation18_spill] sm:$0xff] }
 0x401   : > { %v1996_v24 = vmax.f32 %v1994_v28, 0.0  ;;  %v2299_v30 = vadd.f32 %v9180_v19, %v6907_v31  ;;  %v9182_v46 = vmax.f32 %v9181_v58, 0.0  ;;  %v2300_v14 = vadd.f32 %v9183_v0, %v7001_v43  ;;  %v9196_v0 = vld [vmem:[#allocation83_spill] sm:$0xff] }
 0x402   : > { %v2161_v13 = vmax.f32 %v2159_v18, %v2160_v56  ;;  %v2301_v47 = vadd.f32 %v9184_v23, %v7079_v29  ;;  %v2302_v51 = vadd.f32 %v9185_v7, %v7135_v21  ;;  %v2303_v34 = vadd.f32 %v9186_v35, %v7187_v32  ;;  %v9198_v23 = vld [vmem:[#allocation36_spill] sm:$0xff] }
 0x403   : > { %v1997_v50 = vadd.f32 %v1996_v24, %v9182_v46  ;;  %v2304_v37 = vsel %vm434_vm1, %v7296_v20, -inf  ;;  %v2305_v25 = vsel %vm434_vm1, %v2289_v59, -inf  ;;  %v2306_v61 = vsel %vm434_vm1, %v2290_v41, -inf }
 0x404   : > { %v2308_v5 = vsel %vm434_vm1, %v2292_v16, -inf  ;;  %v2310_v8 = vsel %vm434_vm1, %v2293_v1, -inf  ;;  %v2307_v38 = vsel %vm434_vm1, %v2291_v40, -inf  ;;  %v2312_v2 = vsel %vm434_vm1, %v2294_v9, -inf }
 0x405   : > { %v3395_v10 = vsel %vm3394_vm8, %v3393_v53, %v1997_v50  ;;  %v2309_v28 = vmax.f32 %v2304_v37, %v2308_v5  ;;  %v2314_v33 = vsel %vm434_vm1, %v2295_v45, -inf  ;;  %v2311_v20 = vmax.f32 %v2305_v25, %v2310_v8  ;;  %v9195_v50 = vld [vmem:[#allocation26_spill] sm:$0xff]  ;;  %v9200_v25 = vld [vmem:[#allocation60_spill] sm:$0xff] }
 0x406   : > { %3647 = vmatmul.msk.f32.vlgmr.msrb.gmra.mxu0 %vm434_vm1, %v3395_v10  ;;  %v2313_v11 = vmax.f32 %v2306_v61, %v2312_v2  ;;  %v2315_v59 = vmax.f32 %v2307_v38, %v2314_v33  ;;  %v2316_v53 = vsel %vm434_vm1, %v2296_v26, -inf  ;;  %v2162_v18 = vrot.slane %v2161_v13, 4  ;;  %v9189_v26 = vld [vmem:[#allocation223_spill] sm:$0xff]  ;;  %v9201_v61 = vld [vmem:[#allocation70_spill] sm:$0xff] }
 0x407   : > { %v2318_v41 = vsel %vm434_vm1, %v2297_v3, -inf  ;;  %v2320_v60 = vsel %vm434_vm1, %v2298_v6, -inf  ;;  %v2322_v49 = vsel %vm434_vm1, %v2299_v30, -inf  ;;  %v2317_v16 = vmax.f32 %v2309_v28, %v2316_v53  ;;  %v9191_v3 = vld [vmem:[#allocation265_spill] sm:$0xff]  ;;  %v9202_v2 = vld [vmem:[#allocation187_spill] sm:$0xff] }
 0x408   : > { %v2319_v17 = vmax.f32 %v2311_v20, %v2318_v41  ;;  %v2321_v40 = vmax.f32 %v2313_v11, %v2320_v60  ;;  %v2323_v1 = vmax.f32 %v2315_v59, %v2322_v49  ;;  %v2324_v24 = vsel %vm434_vm1, %v2300_v14, -inf  ;;  %v9194_v30 = vld [vmem:[#allocation5_spill] sm:$0xff]  ;;  %v9203_v20 = vld [vmem:[#allocation175_spill] sm:$0xff]  ;;  %v9204_v59 = vld [vmem:[#allocation210_spill] sm:$0xff] }
 0x409   : > { %v2326_v56 = vsel %vm434_vm1, %v2301_v47, -inf  ;;  %v2328_v62 = vsel %vm434_vm1, %v2302_v51, -inf  ;;  %v2330_v9 = vsel %vm434_vm1, %v2303_v34, -inf  ;;  %v2860_v45 = vmax.f32 %v9187_v12, 0.0  ;;  %v9199_v34 = vld [vmem:[#allocation84_spill] sm:$0xff]  ;;  %v9205_v41 = vld [vmem:[#allocation179_spill] sm:$0xff] }
 0x40a   : > { %v9190_v57 = vmax.f32 %v9188_v15, %v9189_v26  ;;  %v9193_v6 = vmax.f32 %v9191_v3, %v9192_v54  ;;  %v2974_v58 = vrot.slane %v9194_v30, 4  ;;  %v2327_v46 = vmax.f32 %v2319_v17, %v2326_v56  ;;  %v9206_v49 = vld [vmem:[#allocation196_spill] sm:$0xff]  ;;  %v9211_v15 = vld [vmem:[#allocation201_spill] sm:$0xff]  ;;  %v9213_v54 = vld [vmem:[#allocation211_spill] sm:$0xff] }
 0x40b   : > { %v9197_v14 = vmax.f32 %v9195_v50, %v9196_v0  ;;  %v2325_v7 = vmax.f32 %v2317_v16, %v2324_v24  ;;  %v2329_v51 = vmax.f32 %v2321_v40, %v2328_v62  ;;  %v2331_v35 = vmax.f32 %v2323_v1, %v2330_v9  ;;  %v9208_v40 = vld [vmem:[#allocation191_spill] sm:$0xff]  ;;  %v9209_v24 = vld [vmem:[#allocation213_spill] sm:$0xff]  ;;  %v9210_v62 = vld [vmem:[#allocation208_spill] sm:$0xff] }
 0x40c   : > { %v3144_v19 = vmax.f32 %v9193_v6, %v9190_v57  ;;  %v3309_v10 = vsel %vm434_vm1, %v9200_v25, -inf  ;;  %v3315_v5 = vsel %vm434_vm1, %v9201_v61, -inf  ;;  %v7414_v8 = vmax.f32 %v2161_v13, %v2162_v18  ;;  %v9207_v13 = vld [vmem:[#allocation184_spill] sm:$0xff]  ;;  %v9212_v57 = vld [vmem:[#allocation217_spill] sm:$0xff] }
 0x40d   : > { %v3316_v47 = vmax.f32 %v9198_v23, %v9197_v14  ;;  %v2332_v38 = vmax.f32 %v2325_v7, %v2327_v46  ;;  %v2333_v28 = vmax.f32 %v2329_v51, %v2331_v35  ;;  %v2461_v33 = vadd.f32 %v9202_v2, %v9154_v63  ;;  %v9215_v0 = vld [vmem:[#allocation221_spill] sm:$0xff]  ;;  %v9216_v23 = vld [vmem:[#allocation254_spill] sm:$0xff] }
 0x40e   : > { %v7408_v37 = vmax.f32 %v3144_v19, %v9199_v34  ;;  %v2462_v11 = vadd.f32 %v9203_v20, %v9169_v48  ;;  %v2463_v53 = vadd.f32 %v9204_v59, %v9099_v55  ;;  %v2465_v60 = vadd.f32 %v9205_v41, %v9125_v27  ;;  %v9214_v19 = vld [vmem:[#allocation234_spill] sm:$0xff] }
 0x40f   : > { %v2466_v16 = vadd.f32 %v9206_v49, %v9127_v42  ;;  %v2467_v18 = vadd.f32 %v9207_v13, %v6631_v44  ;;  %v2334_v17 = vmax.f32 %v2332_v38, %v2333_v28  ;;  %v2464_v1 = vadd.f32 %v9208_v40, %v9123_v39  ;;  %v9217_v51 = vld [vmem:[#allocation186_spill] sm:$0xff] }
 0x410   : > { %v2468_v56 = vadd.f32 %v9209_v24, %v6658_v36  ;;  %v2469_v9 = vadd.f32 %v9210_v62, %v6741_v22  ;;  %v2470_v26 = vadd.f32 %v9211_v15, %v6769_v4  ;;  %v2471_v3 = vadd.f32 %v9212_v57, %v6840_v52 }
 0x411   : > { %v2472_v6 = vadd.f32 %v9213_v54, %v6907_v31  ;;  %v2473_v46 = vadd.f32 %v9214_v19, %v7001_v43  ;;  %v2335_v50 = vrot.slane %v2334_v17, 4  ;;  %v2474_v14 = vadd.f32 %v9215_v0, %v7079_v29 }
 0x412   : > { %v2475_v7 = vadd.f32 %v9216_v23, %v7135_v21  ;;  %v2476_v35 = vadd.f32 %v9217_v51, %v7187_v32  ;;  %v2478_v34 = vsel %vm434_vm1, %v2462_v11, -inf  ;;  %v2481_v25 = vsel %vm434_vm1, %v2465_v60, -inf  ;;  %v9218_v23 = vld [vmem:[#allocation199_spill] sm:$0xff]  ;;  %v9220_v51 = vld [vmem:[#allocation228_spill] sm:$0xff] }
 0x413   : > { %v2483_v61 = vsel %vm434_vm1, %v2466_v16, -inf  ;;  %v2485_v38 = vsel %vm434_vm1, %v2467_v18, -inf  ;;  %v2477_v28 = vsel %vm434_vm1, %v2461_v33, -inf  ;;  %v2479_v2 = vsel %vm434_vm1, %v2463_v53, -inf }
 0x414   : > { %v2480_v20 = vsel %vm434_vm1, %v2464_v1, -inf  ;;  %v2484_v59 = vmax.f32 %v2478_v34, %v2483_v61  ;;  %v2487_v41 = vsel %vm434_vm1, %v2468_v56, -inf  ;;  %v2489_v49 = vsel %vm434_vm1, %v2469_v9, -inf  ;;  %v9221_v34 = vld [vmem:[#allocation192_spill] sm:$0xff] }
 0x415   : > { %v2491_v13 = vsel %vm434_vm1, %v2470_v26, -inf  ;;  %v2493_v11 = vsel %vm434_vm1, %v2471_v3, -inf  ;;  %v2482_v60 = vmax.f32 %v2477_v28, %v2481_v25  ;;  %v2486_v40 = vmax.f32 %v2479_v2, %v2485_v38  ;;  %v9223_v38 = vld [vmem:[#allocation197_spill] sm:$0xff] }
 0x416   : > { %v2488_v16 = vmax.f32 %v2480_v20, %v2487_v41  ;;  %v2492_v24 = vmax.f32 %v2484_v59, %v2491_v13  ;;  %v7459_v18 = vmax.f32 %v2334_v17, %v2335_v50  ;;  %v2495_v33 = vsel %vm434_vm1, %v2472_v6, -inf  ;;  %v9224_v2 = vld [vmem:[#allocation237_spill] sm:$0xff]  ;;  %v9225_v41 = vld [vmem:[#allocation202_spill] sm:$0xff] }
 0x417   : > { %v2497_v53 = vsel %vm434_vm1, %v2473_v46, -inf  ;;  %v2499_v1 = vsel %vm434_vm1, %v2474_v14, -inf  ;;  %v2490_v62 = vmax.f32 %v2482_v60, %v2489_v49  ;;  %v2494_v56 = vmax.f32 %v2486_v40, %v2493_v11  ;;  %v9226_v13 = vld [vmem:[#allocation149_spill] sm:$0xff]  ;;  %v9227_v60 = vld [vmem:[#allocation224_spill] sm:$0xff] }
 0x418   : > { %v2496_v15 = vmax.f32 %v2488_v16, %v2495_v33  ;;  %v2500_v9 = vmax.f32 %v2492_v24, %v2499_v1  ;;  %v7465_v26 = vmax.f32 %v9194_v30, %v2974_v58  ;;  %v3318_v57 = vmax.f32 %v3309_v10, %v3316_v47  ;;  %v9219_v10 = vld [vmem:[#allocation188_spill] sm:$0xff]  ;;  %v9228_v16 = vld [vmem:[#allocation215_spill] sm:$0xff] }
 0x419   : > { %v2501_v3 = vsel %vm434_vm1, %v2475_v7, -inf  ;;  %v2503_v54 = vsel %vm434_vm1, %v2476_v35, -inf  ;;  %v3147_v17 = vrot.slane %v7408_v37, 4  ;;  %v2498_v19 = vmax.f32 %v2490_v62, %v2497_v53  ;;  %v9229_v33 = vld [vmem:[#allocation231_spill] sm:$0xff] }
 0x41a   : > { %v2502_v6 = vmax.f32 %v2494_v56, %v2501_v3  ;;  %v2504_v50 = vmax.f32 %v2496_v15, %v2503_v54  ;;  %v7470_v46 = vmax.f32 %v3315_v5, %v3318_v57  ;;  %v2164_v0 = vrot.slane %v7414_v8, 2  ;;  %v9222_v5 = vld [vmem:[#allocation205_spill] sm:$0xff]  ;;  %v9230_v1 = vld [vmem:[#allocation251_spill] sm:$0xff] }
 0x41b   : > { %v2337_v14 = vrot.slane %v7459_v18, 2  ;;  %v2634_v30 = vadd.f32 %v9218_v23, %v9154_v63  ;;  %v2505_v58 = vmax.f32 %v2498_v19, %v2500_v9  ;;  %v2635_v7 = vadd.f32 %v9219_v10, %v9169_v48  ;;  %v9231_v56 = vld [vmem:[#allocation253_spill] sm:$0xff]  ;;  %v9232_v57 = vld [vmem:[#allocation247_spill] sm:$0xff] }
 0x41c   : > { %v2506_v47 = vmax.f32 %v2502_v6, %v2504_v50  ;;  %v2636_v35 = vadd.f32 %v9220_v51, %v9099_v55  ;;  %v2638_v25 = vadd.f32 %v9221_v34, %v9125_v27  ;;  %v2639_v61 = vadd.f32 %v9222_v5, %v9127_v42  ;;  %v9233_v54 = vld [vmem:[#allocation245_spill] sm:$0xff] }
 0x41d   : > { %v2640_v28 = vadd.f32 %v9223_v38, %v6631_v44  ;;  %v2641_v20 = vadd.f32 %v9224_v2, %v6658_v36  ;;  %v2637_v49 = vadd.f32 %v9225_v41, %v9123_v39  ;;  %v2642_v11 = vadd.f32 %v9226_v13, %v6741_v22 }
 0x41e   : > { %v2507_v59 = vmax.f32 %v2505_v58, %v2506_v47  ;;  %v2643_v40 = vadd.f32 %v9227_v60, %v6769_v4  ;;  %v2644_v24 = vadd.f32 %v9228_v16, %v6840_v52  ;;  %v2645_v53 = vadd.f32 %v9229_v33, %v6907_v31 }
 0x41f   : > { %v2646_v62 = vadd.f32 %v9230_v1, %v7001_v43  ;;  %v2647_v15 = vadd.f32 %v9231_v56, %v7079_v29  ;;  %v2648_v3 = vadd.f32 %v9232_v57, %v7135_v21  ;;  %v2649_v19 = vadd.f32 %v9233_v54, %v7187_v32 }
 0x420   : > { %v2508_v9 = vrot.slane %v2507_v59, 4  ;;  %v2651_v6 = vsel %vm434_vm1, %v2635_v7, -inf  ;;  %v2654_v50 = vsel %vm434_vm1, %v2638_v25, -inf  ;;  %v2656_v23 = vsel %vm434_vm1, %v2639_v61, -inf }
 0x421   : > { %v2658_v58 = vsel %vm434_vm1, %v2640_v28, -inf  ;;  %v2660_v47 = vsel %vm434_vm1, %v2641_v20, -inf  ;;  %v2650_v10 = vsel %vm434_vm1, %v2634_v30, -inf  ;;  %v2652_v51 = vsel %vm434_vm1, %v2636_v35, -inf }
 0x422   : > { %v2653_v34 = vsel %vm434_vm1, %v2637_v49, -inf  ;;  %v2657_v5 = vmax.f32 %v2651_v6, %v2656_v23  ;;  %v7514_v38 = vmax.f32 %v2507_v59, %v2508_v9  ;;  %v2662_v2 = vsel %vm434_vm1, %v2642_v11, -inf }
 0x423   : > { %v2664_v7 = vsel %vm434_vm1, %v2643_v40, -inf  ;;  %v2666_v25 = vsel %vm434_vm1, %v2644_v24, -inf  ;;  %v2655_v61 = vmax.f32 %v2650_v10, %v2654_v50  ;;  %v2659_v41 = vmax.f32 %v2652_v51, %v2658_v58  ;;  %v9238_v58 = vld [vmem:[#allocation159_spill] sm:$0xff] }
 0x424   : > { %v2661_v28 = vmax.f32 %v2653_v34, %v2660_v47  ;;  %v2665_v13 = vmax.f32 %v2657_v5, %v2664_v7  ;;  %v2668_v20 = vsel %vm434_vm1, %v2645_v53, -inf  ;;  %v2670_v30 = vsel %vm434_vm1, %v2646_v62, -inf  ;;  %v9240_v10 = vld [vmem:[#allocation219_spill] sm:$0xff]  ;;  %v9241_v34 = vld [vmem:[#allocation212_spill] sm:$0xff]  ;;  %v9242_v7 = vld [vmem:[#allocation241_spill] sm:$0xff] }
 0x425   : > { %v2672_v35 = vsel %vm434_vm1, %v2647_v15, -inf  ;;  %v2674_v49 = vsel %vm434_vm1, %v2648_v3, -inf  ;;  %v2663_v59 = vmax.f32 %v2655_v61, %v2662_v2  ;;  %v2667_v60 = vmax.f32 %v2659_v41, %v2666_v25  ;;  %v9234_v3 = vld [vmem:[#allocation203_spill] sm:$0xff]  ;;  %v9243_v61 = vld [vmem:[#allocation169_spill] sm:$0xff] }
 0x426   : > { %v2669_v16 = vmax.f32 %v2661_v28, %v2668_v20  ;;  %v2673_v11 = vmax.f32 %v2665_v13, %v2672_v35  ;;  %v2976_v40 = vrot.slane %v7465_v26, 2  ;;  %v7525_v24 = vmax.f32 %v7408_v37, %v3147_v17  ;;  %v9235_v37 = vld [vmem:[#allocation214_spill] sm:$0xff]  ;;  %v9246_v35 = vld [vmem:[#allocation232_spill] sm:$0xff] }
 0x427   : > { %v3320_v33 = vrot.slane %v7470_v46, 4  ;;  %v2676_v1 = vsel %vm434_vm1, %v2649_v19, -inf  ;;  %v7530_v53 = vmax.f32 %v7414_v8, %v2164_v0  ;;  %v2671_v62 = vmax.f32 %v2663_v59, %v2670_v30  ;;  %v9236_v19 = vld [vmem:[#allocation206_spill] sm:$0xff]  ;;  %v9237_v0 = vld [vmem:[#allocation216_spill] sm:$0xff]  ;;  %v9247_v59 = vld [vmem:[#allocation235_spill] sm:$0xff] }
 0x428   : > { %v2675_v56 = vmax.f32 %v2667_v60, %v2674_v49  ;;  %v2677_v15 = vmax.f32 %v2669_v16, %v2676_v1  ;;  %v7533_v9 = vmax.f32 %v7459_v18, %v2337_v14  ;;  %v2510_v57 = vrot.slane %v7514_v38, 2  ;;  %v9239_v14 = vld [vmem:[#allocation209_spill] sm:$0xff]  ;;  %v9244_v28 = vld [vmem:[#allocation258_spill] sm:$0xff] }
 0x429   : > { %v2807_v54 = vadd.f32 %v9234_v3, %v9154_v63  ;;  %v2808_v17 = vadd.f32 %v9235_v37, %v9169_v48  ;;  %v2678_v6 = vmax.f32 %v2671_v62, %v2673_v11  ;;  %v2809_v8 = vadd.f32 %v9236_v19, %v9099_v55  ;;  %v9245_v20 = vld [vmem:[#allocation230_spill] sm:$0xff]  ;;  %v9248_v16 = vld [vmem:[#allocation181_spill] sm:$0xff] }
 0x42a   : > { %v2679_v50 = vmax.f32 %v2675_v56, %v2677_v15  ;;  %v2811_v23 = vadd.f32 %v9237_v0, %v9125_v27  ;;  %v2810_v18 = vadd.f32 %v9238_v58, %v9123_v39  ;;  %v2812_v47 = vadd.f32 %v9239_v14, %v9127_v42  ;;  %v9249_v1 = vld [vmem:[#allocation150_spill] sm:$0xff] }
 0x42b   : > { %v2813_v51 = vadd.f32 %v9240_v10, %v6631_v44  ;;  %v2814_v5 = vadd.f32 %v9241_v34, %v6658_v36  ;;  %v2815_v25 = vadd.f32 %v9242_v7, %v6741_v22  ;;  %v2816_v41 = vadd.f32 %v9243_v61, %v6769_v4 }
 0x42c   : > { %v2680_v2 = vmax.f32 %v2678_v6, %v2679_v50  ;;  %v2817_v13 = vadd.f32 %v9244_v28, %v6840_v52  ;;  %v2818_v30 = vadd.f32 %v9245_v20, %v6907_v31  ;;  %v2819_v49 = vadd.f32 %v9246_v35, %v7001_v43 }
 0x42d   : > { %v2820_v60 = vadd.f32 %v9247_v59, %v7079_v29  ;;  %v2821_v11 = vadd.f32 %v9248_v16, %v7135_v21  ;;  %v2822_v62 = vadd.f32 %v9249_v1, %v7187_v32  ;;  %v2823_v56 = vsel %vm434_vm1, %v2807_v54, -inf }
 0x42e   : > { %v2824_v15 = vsel %vm434_vm1, %v2808_v17, -inf  ;;  %v2827_v3 = vsel %vm434_vm1, %v2811_v23, -inf  ;;  %v2825_v37 = vsel %vm434_vm1, %v2809_v8, -inf  ;;  %v2829_v6 = vsel %vm434_vm1, %v2812_v47, -inf }
 0x42f   : > { %v2831_v50 = vsel %vm434_vm1, %v2813_v51, -inf  ;;  %v2833_v19 = vsel %vm434_vm1, %v2814_v5, -inf  ;;  %v2681_v0 = vrot.slane %v2680_v2, 4  ;;  %v2826_v58 = vsel %vm434_vm1, %v2810_v18, -inf }
 0x430   : > { %v2828_v14 = vmax.f32 %v2823_v56, %v2827_v3  ;;  %v2830_v10 = vmax.f32 %v2824_v15, %v2829_v6  ;;  %v2835_v34 = vsel %vm434_vm1, %v2815_v25, -inf  ;;  %v2837_v54 = vsel %vm434_vm1, %v2816_v41, -inf }
 0x431   : > { %v2839_v17 = vsel %vm434_vm1, %v2817_v13, -inf  ;;  %v2841_v23 = vsel %vm434_vm1, %v2818_v30, -inf  ;;  %v2166_v8 = vrot.slane %v7530_v53, 1  ;;  %v2832_v47 = vmax.f32 %v2825_v37, %v2831_v50  ;;  %v9252_v37 = vld [vmem:[#allocation239_spill] sm:$0xff] }
 0x432   : > { %v2834_v7 = vmax.f32 %v2826_v58, %v2833_v19  ;;  %v2838_v51 = vmax.f32 %v2830_v10, %v2837_v54  ;;  %v2836_v61 = vmax.f32 %v2828_v14, %v2835_v34  ;;  %v2843_v5 = vsel %vm434_vm1, %v2819_v49, -inf  ;;  %v9250_v49 = vld [vmem:[#allocation218_spill] sm:$0xff]  ;;  %v9257_v10 = vld [vmem:[#allocation249_spill] sm:$0xff] }
 0x433   : > { %v2845_v18 = vsel %vm434_vm1, %v2820_v60, -inf  ;;  %v2847_v28 = vsel %vm434_vm1, %v2821_v11, -inf  ;;  %v2339_v25 = vrot.slane %v7533_v9, 1  ;;  %v2840_v20 = vmax.f32 %v2832_v47, %v2839_v17  ;;  %v9251_v11 = vld [vmem:[#allocation255_spill] sm:$0xff]  ;;  %v9256_v58 = vld [vmem:[#allocation182_spill] sm:$0xff] }
 0x434   : > { %v2842_v41 = vmax.f32 %v2834_v7, %v2841_v23  ;;  %v2846_v35 = vmax.f32 %v2838_v51, %v2845_v18  ;;  %v7586_v13 = vmax.f32 %v7514_v38, %v2510_v57  ;;  %v7588_v30 = vmax.f32 %v2680_v2, %v2681_v0  ;;  %v9253_v38 = vld [vmem:[#allocation220_spill] sm:$0xff]  ;;  %v9258_v54 = vld [vmem:[#allocation122_spill] sm:$0xff]  ;;  %v9259_v23 = vld [vmem:[#allocation243_spill] sm:$0xff] }
 0x435   : > { %v2844_v59 = vmax.f32 %v2836_v61, %v2843_v5  ;;  %v2849_v16 = vsel %vm434_vm1, %v2822_v62, -inf  ;;  %v2848_v1 = vmax.f32 %v2840_v20, %v2847_v28  ;;  %v2980_v60 = vadd.f32 %v9250_v49, %v9154_v63  ;;  %v9254_v2 = vld [vmem:[#allocation172_spill] sm:$0xff]  ;;  %v9255_v62 = vld [vmem:[#allocation225_spill] sm:$0xff]  ;;  %v9262_v28 = vld [vmem:[#allocation194_spill] sm:$0xff] }
 0x436   : > { %v2850_v56 = vmax.f32 %v2842_v41, %v2849_v16  ;;  %v2981_v15 = vadd.f32 %v9251_v11, %v9169_v48  ;;  %v2982_v6 = vadd.f32 %v9252_v37, %v9099_v55  ;;  %v2983_v57 = vadd.f32 %v9253_v38, %v9123_v39  ;;  %v9260_v7 = vld [vmem:[#allocation164_spill] sm:$0xff]  ;;  %v9263_v41 = vld [vmem:[#allocation242_spill] sm:$0xff] }
 0x437   : > { %v2851_v3 = vmax.f32 %v2844_v59, %v2846_v35  ;;  %v2984_v50 = vadd.f32 %v9254_v2, %v9125_v27  ;;  %v2985_v0 = vadd.f32 %v9255_v62, %v9127_v42  ;;  %v2986_v14 = vadd.f32 %v9256_v58, %v6631_v44  ;;  %v9261_v61 = vld [vmem:[#allocation260_spill] sm:$0xff]  ;;  %v9264_v59 = vld [vmem:[#allocation261_spill] sm:$0xff] }
 0x438   : > { %v2852_v19 = vmax.f32 %v2848_v1, %v2850_v56  ;;  %v2987_v34 = vadd.f32 %v9257_v10, %v6658_v36  ;;  %v2988_v17 = vadd.f32 %v9258_v54, %v6741_v22  ;;  %v2989_v47 = vadd.f32 %v9259_v23, %v6769_v4  ;;  %v9265_v1 = vld [vmem:[#allocation236_spill] sm:$0xff] }
 0x439   : > { %v2990_v51 = vadd.f32 %v9260_v7, %v6840_v52  ;;  %v2991_v5 = vadd.f32 %v9261_v61, %v6907_v31  ;;  %v2992_v20 = vadd.f32 %v9262_v28, %v7001_v43  ;;  %v2993_v35 = vadd.f32 %v9263_v41, %v7079_v29 }
 0x43a   : > { %v2853_v18 = vmax.f32 %v2851_v3, %v2852_v19  ;;  %v2994_v16 = vadd.f32 %v9264_v59, %v7135_v21  ;;  %v2995_v56 = vadd.f32 %v9265_v1, %v7187_v32  ;;  %v2996_v49 = vsel %vm434_vm1, %v2980_v60, -inf }
 0x43b   : > { %v2997_v11 = vsel %vm434_vm1, %v2981_v15, -inf  ;;  %v2998_v37 = vsel %vm434_vm1, %v2982_v6, -inf  ;;  %v2999_v3 = vsel %vm434_vm1, %v2983_v57, -inf  ;;  %v3000_v2 = vsel %vm434_vm1, %v2984_v50, -inf }
 0x43c   : > { %v2854_v38 = vrot.slane %v2853_v18, 4  ;;  %v3002_v19 = vsel %vm434_vm1, %v2985_v0, -inf  ;;  %v3001_v62 = vmax.f32 %v2996_v49, %v3000_v2  ;;  %v3004_v10 = vsel %vm434_vm1, %v2986_v14, -inf }
 0x43d   : > { %v3003_v58 = vmax.f32 %v2997_v11, %v3002_v19  ;;  %v3006_v54 = vsel %vm434_vm1, %v2987_v34, -inf  ;;  %v3005_v7 = vmax.f32 %v2998_v37, %v3004_v10  ;;  %v3008_v15 = vsel %vm434_vm1, %v2988_v17, -inf  ;;  %v9268_v19 = vld [vmem:[#allocation256_spill] sm:$0xff]  ;;  %v9270_v10 = vld [vmem:[#allocation257_spill] sm:$0xff] }
 0x43e   : > { %v2855_v23 = vmax.f32 %v2853_v18, %v2854_v38  ;;  %v3007_v60 = vmax.f32 %v2999_v3, %v3006_v54  ;;  %v3009_v61 = vmax.f32 %v3001_v62, %v3008_v15  ;;  %v3010_v6 = vsel %vm434_vm1, %v2989_v47, -inf }
 0x43f   : > { %v3012_v57 = vsel %vm434_vm1, %v2990_v51, -inf  ;;  %v3014_v50 = vsel %vm434_vm1, %v2991_v5, -inf  ;;  %v3011_v0 = vmax.f32 %v3003_v58, %v3010_v6  ;;  %v3016_v14 = vsel %vm434_vm1, %v2992_v20, -inf  ;;  %v9273_v6 = vld [vmem:[#allocation130_spill] sm:$0xff] }
 0x440   : > { %v2856_v28 = vrot.slane %v2855_v23, 2  ;;  %v3013_v41 = vmax.f32 %v3005_v7, %v3012_v57  ;;  %v3015_v59 = vmax.f32 %v3007_v60, %v3014_v50  ;;  %v3018_v34 = vsel %vm434_vm1, %v2993_v35, -inf  ;;  %v9272_v60 = vld [vmem:[#allocation259_spill] sm:$0xff]  ;;  %v9274_v50 = vld [vmem:[#allocation154_spill] sm:$0xff] }
 0x441   : > { %v3020_v18 = vsel %vm434_vm1, %v2994_v16, -inf  ;;  %v3022_v1 = vsel %vm434_vm1, %v2995_v56, -inf  ;;  %v7642_v17 = vmax.f32 %v7530_v53, %v2166_v8  ;;  %v3017_v51 = vmax.f32 %v3009_v61, %v3016_v14  ;;  %v9266_v56 = vld [vmem:[#allocation252_spill] sm:$0xff]  ;;  %v9267_v53 = vld [vmem:[#allocation233_spill] sm:$0xff]  ;;  %v9276_v14 = vld [vmem:[#allocation126_spill] sm:$0xff] }
 0x442   : > { %v2857_v47 = vmax.f32 %v2855_v23, %v2856_v28  ;;  %v3019_v5 = vmax.f32 %v3011_v0, %v3018_v34  ;;  %v7645_v49 = vmax.f32 %v7533_v9, %v2339_v25  ;;  %v2512_v11 = vrot.slane %v7586_v13, 1  ;;  %v9269_v9 = vld [vmem:[#allocation111_spill] sm:$0xff]  ;;  %v9275_v0 = vld [vmem:[#allocation177_spill] sm:$0xff] }
 0x443   : > { %v3021_v20 = vmax.f32 %v3013_v41, %v3020_v18  ;;  %v3023_v37 = vmax.f32 %v3015_v59, %v3022_v1  ;;  %v2683_v35 = vrot.slane %v7588_v30, 2  ;;  %v3153_v3 = vadd.f32 %v9266_v56, %v9154_v63  ;;  %v9271_v23 = vld [vmem:[#allocation227_spill] sm:$0xff]  ;;  %v9277_v18 = vld [vmem:[#allocation222_spill] sm:$0xff]  ;;  %v9281_v56 = vld [vmem:[#allocation49_spill] sm:$0xff] }
 0x444   : > { %v2858_v16 = vrot.slane %v2857_v47, 1  ;;  %v3024_v38 = vmax.f32 %v3017_v51, %v3019_v5  ;;  %v3154_v8 = vadd.f32 %v9267_v53, %v9169_v48  ;;  %v3155_v62 = vadd.f32 %v9268_v19, %v9099_v55 }
 0x445   : > { %v3025_v2 = vmax.f32 %v3021_v20, %v3023_v37  ;;  %v3156_v25 = vadd.f32 %v9269_v9, %v9123_v39  ;;  %v3157_v54 = vadd.f32 %v9270_v10, %v9125_v27  ;;  %v3158_v7 = vadd.f32 %v9271_v23, %v9127_v42  ;;  %v9279_v20 = vld [vmem:[#allocation198_spill] sm:$0xff] }
 0x446   : > { %v2859_v58 = vmax.f32 %v2857_v47, %v2858_v16  ;;  %v3159_v15 = vadd.f32 %v9272_v60, %v6631_v44  ;;  %v3160_v57 = vadd.f32 %v9273_v6, %v6658_v36  ;;  %v3161_v28 = vadd.f32 %v9274_v50, %v6741_v22  ;;  %v9278_v47 = vld [vmem:[#allocation262_spill] sm:$0xff]  ;;  %v9280_v16 = vld [vmem:[#allocation7_spill] sm:$0xff] }
 0x447   : > { %v3026_v61 = vmax.f32 %v3024_v38, %v3025_v2  ;;  %v3162_v41 = vadd.f32 %v9275_v0, %v6769_v4  ;;  %v3163_v34 = vadd.f32 %v9276_v14, %v6840_v52  ;;  %v3164_v1 = vadd.f32 %v9277_v18, %v6907_v31 }
 0x448   : > { %v2861_v59 = vmax.f32 %v2859_v58, 0.0  ;;  %v3165_v51 = vadd.f32 %v9278_v47, %v7001_v43  ;;  %v3166_v37 = vadd.f32 %v9279_v20, %v7079_v29  ;;  %v3167_v38 = vadd.f32 %v9280_v16, %v7135_v21 }
 0x449   : > { %v3027_v5 = vrot.slane %v3026_v61, 4  ;;  %v3168_v2 = vadd.f32 %v9281_v56, %v7187_v32  ;;  %v3169_v19 = vsel %vm434_vm1, %v3153_v3, -inf  ;;  %v3170_v9 = vsel %vm434_vm1, %v3154_v8, -inf  ;;  %v9282_v56 = vld [vmem:[#allocation240_spill] sm:$0xff] }
 0x44a   : > { %v7683_v53 = vadd.f32 %v2861_v59, %v2860_v45  ;;  %v3171_v58 = vsel %vm434_vm1, %v3155_v62, -inf  ;;  %v3172_v10 = vsel %vm434_vm1, %v3156_v25, -inf  ;;  %v3173_v23 = vsel %vm434_vm1, %v3157_v54, -inf }
 0x44b   : > { %v3175_v60 = vsel %vm434_vm1, %v3158_v7, -inf  ;;  %v3177_v6 = vsel %vm434_vm1, %v3159_v15, -inf  ;;  %v3028_v50 = vmax.f32 %v3026_v61, %v3027_v5  ;;  %v3174_v0 = vmax.f32 %v3169_v19, %v3173_v23  ;;  %v9284_v19 = vld [vmem:[#allocation264_spill] sm:$0xff] }
 0x44c   : > { %v3176_v14 = vmax.f32 %v3170_v9, %v3175_v60  ;;  %v3179_v12 = vsel %vm434_vm1, %v3160_v57, -inf  ;;  %v3178_v45 = vmax.f32 %v3171_v58, %v3177_v6  ;;  %v3181_v3 = vsel %vm434_vm1, %v3161_v28, -inf }
 0x44d   : > { %v3180_v59 = vmax.f32 %v3172_v10, %v3179_v12  ;;  %v3183_v8 = vsel %vm434_vm1, %v3162_v41, -inf  ;;  %v7696_v62 = vmax.f32 %v7588_v30, %v2683_v35  ;;  %v3182_v25 = vmax.f32 %v3174_v0, %v3181_v3  ;;  %v9285_v0 = vld [vmem:[#allocation190_spill] sm:$0xff] }
 0x44e   : > { %v3185_v54 = vsel %vm434_vm1, %v3163_v34, -inf  ;;  %v3187_v7 = vsel %vm434_vm1, %v3164_v1, -inf  ;;  %v3184_v15 = vmax.f32 %v3176_v14, %v3183_v8  ;;  %v3189_v47 = vsel %vm434_vm1, %v3165_v51, -inf  ;;  %v9287_v14 = vld [vmem:[#allocation248_spill] sm:$0xff]  ;;  %v9291_v3 = vld [vmem:[#allocation138_spill] sm:$0xff] }
 0x44f   : > { %v3186_v61 = vmax.f32 %v3178_v45, %v3185_v54  ;;  %v3188_v18 = vmax.f32 %v3180_v59, %v3187_v7  ;;  %v3029_v57 = vrot.slane %v3028_v50, 2  ;;  %v3191_v5 = vsel %vm434_vm1, %v3166_v37, -inf  ;;  %v9290_v59 = vld [vmem:[#allocation141_spill] sm:$0xff] }
 0x450   : > { %v3193_v28 = vsel %vm434_vm1, %v3167_v38, -inf  ;;  %v3195_v41 = vsel %vm434_vm1, %v3168_v2, -inf  ;;  %v3190_v20 = vmax.f32 %v3182_v25, %v3189_v47  ;;  %v3192_v30 = vmax.f32 %v3184_v15, %v3191_v5  ;;  %v9299_v5 = vld [vmem:[#allocation229_spill] sm:$0xff] }
 0x451   : > { %v3194_v35 = vmax.f32 %v3186_v61, %v3193_v28  ;;  %v3196_v16 = vmax.f32 %v3188_v18, %v3195_v41  ;;  %v9283_v34 = vrot.slane %v9282_v56, 1  ;;  %v2632_v9 = vrot.slane %v9284_v19, 1  ;;  %v9300_v28 = vld [vmem:[#allocation52_spill] sm:$0xff] }
 0x452   : > { %v7713_v51 = vmax.f32 %v7465_v26, %v2976_v40  ;;  %v3149_v37 = vrot.slane %v7525_v24, 2  ;;  %v7719_v38 = vmax.f32 %v7470_v46, %v3320_v33  ;;  %v2169_v2 = vmax.f32 %v7642_v17, 0.0  ;;  %v9286_v33 = vld [vmem:[#allocation134_spill] sm:$0xff] }
 0x453   : > { %v7707_v1 = vmax.f32 %v9282_v56, %v9283_v34  ;;  %v3197_v58 = vmax.f32 %v3190_v20, %v3192_v30  ;;  %v3198_v10 = vmax.f32 %v3194_v35, %v3196_v16  ;;  %v2342_v23 = vmax.f32 %v7645_v49, 0.0  ;;  %v9288_v49 = vld [vmem:[#allocation176_spill] sm:$0xff] }
 0x454   : > { %v7726_v60 = vmax.f32 %v7586_v13, %v2512_v11  ;;  %v2685_v26 = vrot.slane %v7696_v62, 1  ;;  %v7729_v40 = vmax.f32 %v3028_v50, %v3029_v57  ;;  %v3326_v46 = vadd.f32 %v9285_v0, %v9154_v63  ;;  %v9289_v13 = vld [vmem:[#allocation107_spill] sm:$0xff]  ;;  %v9292_v63 = vld [vmem:[#allocation193_spill] sm:$0xff] }
 0x455   : > { %v3199_v6 = vmax.f32 %v3197_v58, %v3198_v10  ;;  %v3327_v17 = vadd.f32 %v9286_v33, %v9169_v48  ;;  %v3328_v12 = vadd.f32 %v9287_v14, %v9099_v55  ;;  %v3330_v45 = vadd.f32 %v9288_v49, %v9125_v27  ;;  %v9293_v48 = vld [vmem:[#allocation156_spill] sm:$0xff]  ;;  %v9294_v55 = vld [vmem:[#allocation266_spill] sm:$0xff]  ;;  %v9295_v27 = vld [vmem:[#allocation115_spill] sm:$0xff] }
 0x456   : > { %v3331_v11 = vadd.f32 %v9289_v13, %v9127_v42  ;;  %v3332_v50 = vadd.f32 %v9290_v59, %v6631_v44  ;;  %v3333_v8 = vadd.f32 %v9291_v3, %v6658_v36  ;;  %v3329_v54 = vadd.f32 %v9292_v63, %v9123_v39  ;;  %v9296_v42 = vld [vmem:[#allocation33_spill] sm:$0xff]  ;;  %v9297_v44 = vld [vmem:[#allocation43_spill] sm:$0xff]  ;;  %v9298_v36 = vld [vmem:[#allocation66_spill] sm:$0xff] }
 0x457   : > { %v3200_v25 = vrot.slane %v3199_v6, 4  ;;  %v3334_v7 = vadd.f32 %v9293_v48, %v6741_v22  ;;  %v3335_v15 = vadd.f32 %v9294_v55, %v6769_v4  ;;  %v3336_v61 = vadd.f32 %v9295_v27, %v6840_v52  ;;  %v235_v39 = vld [vmem:[%s7832_s2 + $0x50] sm:$0xff]  ;;  %v9301_v59 = vld [vmem:[#allocation145_spill] sm:$0xff] }
 0x458   : > { %v3337_v18 = vadd.f32 %v9296_v42, %v6907_v31  ;;  %v3338_v47 = vadd.f32 %v9297_v44, %v7001_v43  ;;  %v3339_v57 = vadd.f32 %v9298_v36, %v7079_v29  ;;  %v3340_v4 = vadd.f32 %v9299_v5, %v7135_v21  ;;  %3469 = vmatpush.msra.mxu2 %v235_v39 }
 0x459   : > { %v3201_v22 = vmax.f32 %v3199_v6, %v3200_v25  ;;  %v3341_v52 = vadd.f32 %v9300_v28, %v7187_v32  ;;  %v3343_v41 = vsel %vm434_vm1, %v3327_v17, -inf  ;;  %v3346_v31 = vsel %vm434_vm1, %v3330_v45, -inf }
 0x45a   : > { %v3348_v43 = vsel %vm434_vm1, %v3331_v11, -inf  ;;  %v3350_v29 = vsel %vm434_vm1, %v3332_v50, -inf  ;;  %v3352_v20 = vsel %vm434_vm1, %v3333_v8, -inf  ;;  %v3342_v30 = vsel %vm434_vm1, %v3326_v46, -inf  ;;  %v9303_v8 = vld [vmem:[#allocation103_spill] sm:$0xff] }
 0x45b   : > { %v3344_v35 = vsel %vm434_vm1, %v3328_v12, -inf  ;;  %v3345_v21 = vsel %vm434_vm1, %v3329_v54, -inf  ;;  %v3349_v16 = vmax.f32 %v3343_v41, %v3348_v43  ;;  %v3202_v56 = vrot.slane %v3201_v22, 2 }
 0x45c   : > { %v3354_v32 = vsel %vm434_vm1, %v3334_v7, -inf  ;;  %v3356_v34 = vsel %vm434_vm1, %v3335_v15, -inf  ;;  %v3358_v58 = vsel %vm434_vm1, %v3336_v61, -inf  ;;  %v3347_v10 = vmax.f32 %v3342_v30, %v3346_v31 }
 0x45d   : > { %v3351_v6 = vmax.f32 %v3344_v35, %v3350_v29  ;;  %v3353_v0 = vmax.f32 %v3345_v21, %v3352_v20  ;;  %v3357_v33 = vmax.f32 %v3349_v16, %v3356_v34  ;;  %v3360_v17 = vsel %vm434_vm1, %v3337_v18, -inf }
 0x45e   : > { %v3362_v46 = vsel %vm434_vm1, %v3338_v47, -inf  ;;  %v3364_v14 = vsel %vm434_vm1, %v3339_v57, -inf  ;;  %v3366_v12 = vsel %vm434_vm1, %v3340_v4, -inf  ;;  %v3355_v49 = vmax.f32 %v3347_v10, %v3354_v32 }
 0x45f   : > { %v3359_v45 = vmax.f32 %v3351_v6, %v3358_v58  ;;  %v3361_v13 = vmax.f32 %v3353_v0, %v3360_v17  ;;  %v3365_v11 = vmax.f32 %v3357_v33, %v3364_v14  ;;  %v9302_v50 = vmax.f32 %v9301_v59, 0.0  ;;  %v223_v59 = vld [vmem:[%s3874_s19] sm:$0xff] }
 0x460   : > { %v9304_v25 = vmax.f32 %v9303_v8, 0.0  ;;  %v2515_v54 = vmax.f32 %v7726_v60, 0.0  ;;  %v3368_v48 = vsel %vm434_vm1, %v3341_v52, -inf  ;;  %v2686_v7 = vmax.f32 %v7696_v62, %v2685_v26 }
 0x461   : > { %v2170_v3 = vadd.f32 %v2169_v2, %v9302_v50  ;;  %v3363_v55 = vmax.f32 %v3355_v49, %v3362_v46  ;;  %v3367_v15 = vmax.f32 %v3359_v45, %v3366_v12  ;;  %v3369_v27 = vmax.f32 %v3361_v13, %v3368_v48 }
 0x462   : > { %v2343_v63 = vadd.f32 %v2342_v23, %v9304_v25  ;;  %v2514_v61 = vmax.f32 %v7707_v1, 0.0  ;;  %v2633_v42 = vmax.f32 %v9284_v19, %v2632_v9  ;;  %v3203_v18 = vmax.f32 %v3201_v22, %v3202_v56  ;;  %v234_v19 = vld [vmem:[%s7832_s2 + $0x48] sm:$0xff] }
 0x463   : > { %v3322_v2 = vrot.slane %v7719_v38, 2  ;;  %v3031_v23 = vrot.slane %v7729_v40, 1  ;;  %v3370_v44 = vmax.f32 %v3363_v55, %v3365_v11  ;;  %v3371_v60 = vmax.f32 %v3367_v15, %v3369_v27  ;;  %3470 = vmatpush.msra.mxu2 %v234_v19  ;;  %v224_v11 = vld [vmem:[%s3874_s19 + $0x8] sm:$0xff]  ;;  %s3657_s19 = sshll.u32 %s9306_s13, 4 }
 0x464   : > { %v3150_v62 = vmax.f32 %v7525_v24, %v3149_v37  ;;  %v2516_v26 = vadd.f32 %v2515_v54, %v2514_v61  ;;  %v2978_v47 = vrot.slane %v7713_v51, 1  ;;  %v2688_v36 = vmax.f32 %v2686_v7, 0.0  ;;  %s190_s29 = scalar_lea.vmem %s7833_s3, %s3657_s19 }
 0x465   : > { %v3372_v1 = vmax.f32 %v3370_v44, %v3371_v60  ;;  %v3396_v57 = vsel %vm3382_vm2, %v2170_v3, %v2343_v63  ;;  %v3204_v39 = vrot.slane %v3203_v18, 1  ;;  %v2687_v9 = vmax.f32 %v2633_v42, 0.0  ;;  %v236_v63 = vld [vmem:[%s7832_s2 + $0x58] sm:$0xff] }
 0x466   : > { %v3032_v22 = vmax.f32 %v7729_v40, %v3031_v23  ;;  %v3323_v5 = vmax.f32 %v7719_v38, %v3322_v2  ;;  %v3151_v24 = vrot.slane %v3150_v62, 1  ;;  %v3397_v37 = vsel %vm3384_vm3, %v3396_v57, %v2516_v26  ;;  %3505 = vmatpush.msra.mxu0 %v236_v63 }
 0x467   : > { %v3373_v4 = vrot.slane %v3372_v1, 4  ;;  %v2979_v28 = vmax.f32 %v7713_v51, %v2978_v47  ;;  %v2689_v52 = vadd.f32 %v2688_v36, %v2687_v9  ;;  %v3205_v31 = vmax.f32 %v3203_v18, %v3204_v39 }
 0x468   : > { %v3034_v43 = vmax.f32 %v3032_v22, 0.0  ;;  %v3324_v29 = vrot.slane %v3323_v5, 1  ;;  %v3152_v35 = vmax.f32 %v3150_v62, %v3151_v24  ;;  %v3834_v50 = vmov 24  }
 0x469   : > { %v3374_v41 = vmax.f32 %v3372_v1, %v3373_v4  ;;  %v3398_v30 = vsel %vm3386_vm4, %v3397_v37, %v2689_v52  ;;  %v3033_v21 = vmax.f32 %v2979_v28, 0.0  ;;  %v3207_v16 = vmax.f32 %v3205_v31, 0.0  ;;  %3760 = vset.pattern.permute.xlu1 %v3834_v50  ;;  %3759 = vset.pattern.permute.xlu2 %v3834_v50 }
 0x46a   : > { %v3399_v38 = vsel %vm3388_vm5, %v3398_v30, %v7683_v53  ;;  %v3325_v32 = vmax.f32 %v3323_v5, %v3324_v29  ;;  %v3206_v58 = vmax.f32 %v3152_v35, 0.0  ;;  %v3809_v53 = vld [vmem:[%s7832_s2 + $0x60] sm:$0xff]  ;;  %3442 = vperm.xlu1 %3760, %v224_v11   ;;  %3437 = vperm.xlu2 %3759, %v223_v59  }
 0x46b   : > { %v3375_v20 = vrot.slane %v3374_v41, 2  ;;  %v3035_v56 = vadd.f32 %v3034_v43, %v3033_v21  ;;  %v3403_v12 = vperm.slane %v3809_v53, 2  ;;  %3761 = vset.pattern.permute.xlu0 %v3834_v50  ;;  %v3445_v54 = vperm.slane %v3809_v53, 3 }
 0x46c   : > { %v3208_v6 = vadd.f32 %v3207_v16, %v3206_v58  ;;  %v3379_v0 = vmax.f32 %v3325_v32, 0.0  ;;  %v3478_v15 = vperm.slane %v3809_v53, 4  ;;  %v3483_v26 = vperm.slane %v3809_v53, 5 }
 0x46d   : > { %v3376_v40 = vmax.f32 %v3374_v41, %v3375_v20  ;;  %v3400_v10 = vsel %vm3390_vm6, %v3399_v38, %v3035_v56 }
 0x46e   : > { %v3401_v17 = vsel %vm3392_vm7, %v3400_v10, %v3208_v6 }
 0x46f   : > { %v3377_v34 = vrot.slane %v3376_v40, 1 }
 0x471   : > { %v3378_v51 = vmax.f32 %v3376_v40, %v3377_v34 }
 0x473   : > { %v3380_v33 = vmax.f32 %v3378_v51, 0.0 }
 0x475   : > { %v3381_v46 = vadd.f32 %v3380_v33, %v3379_v0 }
 0x477   : > { %v3402_v14 = vsel %vm3394_vm8, %v3401_v17, %v3381_v46 }
 0x478   : > { %3648 = vmatmul.msk.f32.vlgmr.msrb.gmra.mxu2 %vm434_vm1, %v3402_v14 }
 0x483   : > { %v3427_v49 = vpop.f32.mrf.mxu0 }
 0x484   : > { %v3428_v45 = vadd.f32 %v3427_v49, %v3403_v12 }
 0x486   : > { %v3433_v13 = vmax.f32 %v3428_v45, 0.0 }
 0x488   : > { %3649 = vmatmul.msk.f32.vlgmr.msra.gmra.mxu2 %vm3448_vm9, %v3433_v13 }
 0x4c4   : > { %v3438_v48 = vpop.permute.xlu2 %3437 }
 0x4c5   : > { %v3446_v55 = vmul.f32 %v3445_v54, %v3438_v48 }
 0x4dc   : > { %v3443_v18 = vpop.permute.xlu1 %3442 }
 0x4dd   : > { %v3447_v2 = vmul.f32 %v3445_v54, %v3443_v18 }
 0x4fb   : > { %v3430_v3 = vpop.f32.mrf.mxu2 }
 0x4fc   : > { %v3431_v8 = vadd.f32 %v3430_v3, %v3403_v12 }
 0x4fe   : > { %v3434_v25 = vmax.f32 %v3431_v8, 0.0 }
 0x500   : > { %3650 = vmatmul.msk.f32.gmra.mxu2 %vm3448_vm9, %v3434_v25 }
 0x50b   : > { %v3472_v7 = vpop.f32.mrf.mxu2 }
 0x50c   : > { %v3473_v27 = vadd.f32 %v3472_v7, %v3446_v55 }
 0x50e   : > { %v3479_v61 = vadd.f32 %v3478_v15, %v3473_v27 }
 0x510   : > { %v3481_v42 = vmax.f32 %v3479_v61, 0.0 }
 0x512   : > { %3651 = vmatmul.msk.f32.vlgmr.msra.gmra.mxu0 %vm238_vm0, %v3481_v42 }
 0x583   : > { %v3475_v23 = vpop.f32.mrf.mxu2 }
 0x584   : > { %v3476_v44 = vadd.f32 %v3475_v23, %v3447_v2 }
 0x586   : > { %v3480_v60 = vadd.f32 %v3478_v15, %v3476_v44 }
 0x588   : > { %v3482_v62 = vmax.f32 %v3480_v60, 0.0 }
 0x58a   : > { %3652 = vmatmul.msk.f32.gmra.mxu0 %vm238_vm0, %v3482_v62 }
 0x58f   : > { %v3507_v47 = vpop.f32.mrf.mxu0 }
 0x590   : > { %v3508_v36 = vadd.f32 %v3507_v47, %v3483_v26 }
 0x592   : > { %3513 = vmax.xlane.f32.xlu2 %v3508_v36 }
 0x605   : > { %v3514_v39 = vpop.xlane.xlu2 %3513 }
 0x606   : > { %v3517_v19 = vsub.f32 %v3508_v36, %v3514_v39 }
 0x607   : > { %v3510_v1 = vpop.f32.mrf.mxu0 }
 0x608   : > { %v3511_v57 = vadd.f32 %v3510_v1, %v3483_v26  ;;  %v3519_v9 = vmul.f32 1.442695, %v3517_v19 }
 0x60a   : > { %3515 = vmax.xlane.f32.xlu0 %v3511_v57  ;;  %3762 = vpow2.f32 %v3519_v9 }
 0x610   : > { %v3763_v22 = vpop.eup %3762 }
 0x611   : > { %3523 = vadd.xlane.f32.xlu1 %v3763_v22 }
 0x67d   : > { %v3516_v5 = vpop.xlane.xlu0 %3515 }
 0x67e   : > { %v3518_v4 = vsub.f32 %v3511_v57, %v3516_v5 }
 0x680   : > { %v3521_v24 = vmul.f32 1.442695, %v3518_v4 }
 0x682   : > { %3764 = vpow2.f32 %v3521_v24 }
 0x684   : > { %v3524_v28 = vpop.xlane.xlu1 %3523 }
 0x685   : > { %3766 = vlog2.f32 %v3524_v28 }
 0x688   : > { %v3765_v37 = vpop.eup %3764 }
 0x689   : > { %3525 = vadd.xlane.f32.xlu2 %v3765_v37 }
 0x68b   : > { %v3767_v52 = vpop.eup %3766 }
 0x68c   : > { %v3528_v41 = vmul.f32 0.6931472, %v3767_v52 }
 0x68e   : > { %v3531_v31 = vadd.f32 %v3528_v41, %v3514_v39 }
 0x690   : > { %v3533_v43 = vsub.f32 %v3508_v36, %v3531_v31 }
 0x692   : > { %3535 = vst [vmem:[%s190_s29] sm:$0xff] %v3533_v43 }
 0x6fc   : > { %v3526_v29 = vpop.xlane.xlu2 %3525 }
 0x6fd   : > { %3768 = vlog2.f32 %v3526_v29 }
 0x703   : > { %v3769_v20 = vpop.eup %3768 }
 0x704   : > { %v3530_v30 = vmul.f32 0.6931472, %v3769_v20 }
 0x706   : > { %v3532_v35 = vadd.f32 %v3530_v30, %v3516_v5 }
 0x708   : > { %v3534_v21 = vsub.f32 %v3511_v57, %v3532_v35 }
 0x70a   : > { %3536 = vst [vmem:[%s190_s29 + $0x8] sm:$0xff] %v3534_v21 }
 0x70b PF: > { %s13_s12 = sadd.s32 1, %s3816_s12  }
 0x70c   : > { %p10_p4 = scmp.ge.s32.totalorder %s13_s12, 4  }
 0x70e   :  { %12 = sbr.rel (!%p10_p4) target bundleno = 1 (0x1), region = 65 }

</bundles_post_ra>
